<compile_context>
chip_gen: v7x
topology: tpu7x:2x2x1
jax: 0.10.0
libtpu: 0.0.40
codegen_flags: <defaults>
</compile_context>

<pallas_src>
import math

import jax
import jax.numpy as jnp
import numpy as np
from jax.experimental import pallas as pl
from jax.experimental.pallas import tpu as pltpu

LN_EPS = 1e-12  # pytorch_pretrained_bert BertLayerNorm default epsilon


def _round_up(x, m):
    return (x + m - 1) // m * m


def _layer_norm(y, gamma, beta):
    mu = jnp.mean(y, axis=-1, keepdims=True)
    var = jnp.mean(jnp.square(y - mu), axis=-1, keepdims=True)
    return (y - mu) * jax.lax.rsqrt(var + LN_EPS) * gamma + beta


# TODO(synk): exact erf-based GELU (pytorch_pretrained_bert) once lax.erf
# lowers robustly in Mosaic; the tanh approximation below differs by < 1e-3.
def _gelu_tanh(x):
    return 0.5 * x * (1.0 + jnp.tanh(
        0.7978845608028654 * (x + 0.044715 * x * x * x)))


def _make_kernel(num_heads: int, head_size: int, R: int, T: int, H: int):
    nh, hd = num_heads, head_size

    def kernel(x_ref, mask_ref,
               wqkv_ref, bqkv_ref, wo_ref, bo_ref, g1_ref, b1_ref,
               wi_ref, bi_ref, wo2_ref, bo2_ref, g2_ref, b2_ref,
               out_ref):
        # (R, T, H) -> (R*T, H): leading-dim collapse (T is a multiple of 8),
        # no concat copies.  x streams as bf16; f32 copy only for the residual.
        xb = x_ref[...].reshape(R * T, H)                       # bf16
        x2 = xb.astype(jnp.float32)                             # (R*T, H) f32
        mask = mask_ref[...].astype(jnp.float32)                # (T, R) additive key-row mask

        # Fused Q/K/V projection: one lane-dense MXU matmul.  1/sqrt(hd) is
        # pre-folded into the Q weight columns / bias on the host.
        qkv = jnp.dot(xb, wqkv_ref[...],
                      preferred_element_type=jnp.float32) + bqkv_ref[...]   # (R*T, 3H)

        ctx_heads = []
        for h in range(nh):
            qh = qkv[:, h * hd:(h + 1) * hd]                    # (R*T, hd)
            kh = qkv[:, H + h * hd:H + (h + 1) * hd]
            vh = qkv[:, 2 * H + h * hd:2 * H + (h + 1) * hd]
            q_r = [qh[r * T:(r + 1) * T, :] for r in range(R)]  # aligned (T, hd) slices
            k_r = [kh[r * T:(r + 1) * T, :] for r in range(R)]
            v_r = [vh[r * T:(r + 1) * T, :] for r in range(R)]

            ctx_rows = []
            for r in range(R):
                # Scores of query-row r against every key-row u, batched over
                # the T sequence positions (VPU multiply + lane reduction; R
                # is tiny so this beats pushing R x R matrices through the MXU).
                s = [jnp.sum(q_r[r] * k_r[u], axis=-1, keepdims=True)
                     + mask[:, u:u + 1] for u in range(R)]      # each (T, 1)
                m = s[0]
                for u in range(1, R):
                    m = jnp.maximum(m, s[u])
                p = [jnp.exp(su - m) for su in s]
                denom = p[0]
                for u in range(1, R):
                    denom = denom + p[u]
                inv = pl.reciprocal(denom, approx=True)         # (T, 1)
                ctx = (p[0] * inv) * v_r[0]
                for u in range(1, R):
                    ctx = ctx + (p[u] * inv) * v_r[u]           # (T, hd)
                ctx_rows.append(ctx)
            ctx_heads.append(jnp.concatenate(ctx_rows, axis=0))  # (R*T, hd)

        # Assemble all heads once and do a single lane-dense output projection.
        ctx2 = jnp.concatenate(ctx_heads, axis=-1)              # (R*T, H)

        # BertSelfOutput: dense(+bias) + dropout(identity) + residual + LayerNorm
        attn = jnp.dot(ctx2.astype(jnp.bfloat16), wo_ref[...],
                       preferred_element_type=jnp.float32) + bo_ref[...]
        a_out = _layer_norm(attn + x2, g1_ref[...], b1_ref[...])            # (R*T, H) f32

        # BertIntermediate: dense + GELU (GELU in bf16; its output feeds a
        # bf16 MXU matmul anyway).
        inter = jnp.dot(a_out.astype(jnp.bfloat16), wi_ref[...],
                        preferred_element_type=jnp.float32) + bi_ref[...]
        inter = _gelu_tanh(inter.astype(jnp.bfloat16))                      # (R*T, di) bf16

        # BertOutput: dense(+bias) + dropout(identity) + residual + LayerNorm
        ffn = jnp.dot(inter, wo2_ref[...],
                      preferred_element_type=jnp.float32) + bo2_ref[...]
        out2 = _layer_norm(ffn + a_out, g2_ref[...], b2_ref[...])
        out_ref[...] = out2.astype(out_ref.dtype).reshape(R, T, H)

    return kernel


def bert_vertical_layer(hidden_states, attention_mask, params, num_heads):
    """hidden_states: (B, R, S, H).  attention_mask: additive key-row mask
    broadcastable to (B, S, R) (0 for valid rows, -10000 for masked rows), as
    used by TaBERT's vertical attention."""
    B, R, S, H = hidden_states.shape
    nh = num_heads
    assert H % nh == 0
    hd = H // nh
    di = params["wi"].shape[1]
    inv_sqrt_d = 1.0 / math.sqrt(hd)

    # Tile the sequence axis; all R rows of a position stay in the same block.
    # Target R*TS = 512 LHS rows per grid step: fills the 256-high MXU on
    # v6e/v7x and stays inside the tighter v7x VMEM budget.  TS is kept a
    # multiple of 8 for dense sublane layout.
    ts_target = _round_up(max(8, 512 // max(R, 1)), 8)
    TS = min(ts_target, _round_up(S, 8))
    S_pad = _round_up(S, TS)

    f32, bf16 = jnp.float32, jnp.bfloat16

    # Stream activations as bf16 through HBM (halves x/out traffic).
    x = hidden_states.astype(bf16)
    if S_pad != S:
        x = jnp.pad(x, ((0, 0), (0, 0), (0, S_pad - S), (0, 0)))
    mask = jnp.broadcast_to(attention_mask, (B, S, R)).astype(f32)
    if S_pad != S:
        mask = jnp.pad(mask, ((0, 0), (0, S_pad - S), (0, 0)))

    # Host-side weight prep: fused (H, 3H) QKV with 1/sqrt(hd) folded into the
    # Q columns / bias; everything bf16 except biases / LN params.
    wqkv = jnp.concatenate(
        [params["wq"] * inv_sqrt_d, params["wk"], params["wv"]], axis=1).astype(bf16)
    bqkv = jnp.concatenate(
        [params["bq"] * inv_sqrt_d, params["bk"], params["bv"]]).reshape(1, 3 * H).astype(f32)
    wo = params["wo"].astype(bf16)                              # (H, H)
    bo = params["bo"].reshape(1, H).astype(f32)
    g1 = params["gamma1"].reshape(1, H).astype(f32)
    b1 = params["beta1"].reshape(1, H).astype(f32)
    wi = params["wi"].astype(bf16)                              # (H, di)
    bi = params["bi"].reshape(1, di).astype(f32)
    wo2 = params["wo2"].astype(bf16)                            # (di, H)
    bo2 = params["bo2"].reshape(1, H).astype(f32)
    g2 = params["gamma2"].reshape(1, H).astype(f32)
    b2 = params["beta2"].reshape(1, H).astype(f32)
    weight_args = (wqkv, bqkv, wo, bo, g1, b1, wi, bi, wo2, bo2, g2, b2)

    # VMEM budget: ~75% of physical VMEM, capped (=> ~48 MiB on v7x,
    # ~96 MiB on v5e/v6e), never below the v6e/v7x 32 MiB default.
    try:
        vmem_limit = min(int(pltpu.get_tpu_info().vmem_capacity_bytes) * 3 // 4,
                         96 * 1024 * 1024)
    except Exception:
        vmem_limit = 48 * 1024 * 1024
    vmem_limit = max(vmem_limit, 32 * 1024 * 1024)

    kernel = _make_kernel(nh, hd, R, TS, H)

    def run(single_buffer_weights):
        def const_spec(arr):
            nd = arr.ndim
            idx = lambda b, s, _nd=nd: (0,) * _nd
            if single_buffer_weights:
                # Constant index_map -> fetched once; single buffer halves the
                # weight VMEM footprint (~14 MiB bf16 at BERT-base dims).
                return pl.BlockSpec(arr.shape, idx, pipeline_mode=pl.Buffered(1))
            return pl.BlockSpec(arr.shape, idx)

        in_specs = [
            pl.BlockSpec((None, R, TS, H), lambda b, s: (b, 0, s, 0)),  # x (orig layout)
            pl.BlockSpec((None, TS, R), lambda b, s: (b, s, 0)),        # row mask
        ] + [const_spec(w) for w in weight_args]
        out_specs = pl.BlockSpec((None, R, TS, H), lambda b, s: (b, 0, s, 0))

        return pl.pallas_call(
            kernel,
            grid=(B, S_pad // TS),
            in_specs=in_specs,
            out_specs=out_specs,
            out_shape=jax.ShapeDtypeStruct((B, R, S_pad, H), bf16),
            compiler_params=pltpu.CompilerParams(
                dimension_semantics=("parallel", "parallel"),
                vmem_limit_bytes=vmem_limit),
        )(x, mask, *weight_args)

    try:
        out = run(True)
        out.block_until_ready()
    except Exception:
        # Fallback if this Pallas build rejects single-buffered BlockSpecs.
        out = run(False)

    if S_pad != S:
        out = out[:, :, :S, :]
    return out.astype(hidden_states.dtype)


def reference(hidden, attention_mask, p, nh):
    """Pure-JAX f32 re-implementation of the PyTorch BertVerticalLayer forward
    (eval mode), using the same tanh-GELU as the kernel."""
    B, R, S, H = hidden.shape
    hd = H // nh

    def proj(w, b):
        y = hidden @ w + b
        return y.reshape(B, R, S, nh, hd).transpose(0, 2, 3, 1, 4)  # (B,S,nh,R,hd)

    q = proj(p["wq"], p["bq"])
    k = proj(p["wk"], p["bk"])
    v = proj(p["wv"], p["bv"])
    scores = jnp.einsum("bsnrd,bsnud->bsnru", q, k) / math.sqrt(hd)
    mask = jnp.broadcast_to(attention_mask, (B, S, R))
    scores = scores + mask[:, :, None, None, :]
    probs = jax.nn.softmax(scores, axis=-1)
    ctx = jnp.einsum("bsnru,bsnud->bsnrd", probs, v)
    ctx = ctx.transpose(0, 3, 1, 2, 4).reshape(B, R, S, H)

    y = ctx @ p["wo"] + p["bo"] + hidden
    a_out = _layer_norm(y, p["gamma1"], p["beta1"])

    inter = _gelu_tanh(a_out @ p["wi"] + p["bi"])
    z = inter @ p["wo2"] + p["bo2"] + a_out
    return _layer_norm(z, p["gamma2"], p["beta2"])


if __name__ == "__main__":
    B, R, S, H, NH = 2, 4, 8, 32, 2   # batch, table rows, seq len, hidden, vertical heads
    DI = 4 * H                        # intermediate (FFN) size

    key = jax.random.PRNGKey(0)
    ks = jax.random.split(key, 16)

    def mat(k, shape):
        return jax.random.normal(k, shape, jnp.float32) * 0.02

    params = {
        "wq": mat(ks[0], (H, H)), "bq": mat(ks[1], (H,)),
        "wk": mat(ks[2], (H, H)), "bk": mat(ks[3], (H,)),
        "wv": mat(ks[4], (H, H)), "bv": mat(ks[5], (H,)),
        "wo": mat(ks[6], (H, H)), "bo": mat(ks[7], (H,)),
        "gamma1": jnp.ones((H,), jnp.float32), "beta1": jnp.zeros((H,), jnp.float32),
        "wi": mat(ks[8], (H, DI)), "bi": mat(ks[9], (DI,)),
        "wo2": mat(ks[10], (DI, H)), "bo2": mat(ks[11], (H,)),
        "gamma2": jnp.ones((H,), jnp.float32), "beta2": jnp.zeros((H,), jnp.float32),
    }

    hidden = jax.random.normal(ks[12], (B, R, S, H), jnp.float32)
    # Additive row mask: 0 for valid rows, -10000 for masked rows, applied
    # along the key-row axis (broadcastable to (B, S, R)).
    row_valid = (jax.random.uniform(ks[13], (B, 1, R)) > 0.2).astype(jnp.float32)
    row_valid = row_valid.at[..., 0].set(1.0)   # keep at least one valid row
    attention_mask = (1.0 - row_valid) * -10000.0

    out = bert_vertical_layer(hidden, attention_mask, params, NH)
    jax.block_until_ready(out)

    ref = reference(hidden, attention_mask, params, NH)
    np.testing.assert_allclose(np.asarray(out), np.asarray(ref), atol=2e-2, rtol=2e-2)
    print("KERNEL_OK")
</pallas_src>

<mosaic_0001>
module attributes {stable_mosaic.version = 11 : i64} {
  func.func @kernel(%arg0: i32, %arg1: i32, %arg2: memref<1x4x8x32xbf16, #tpu.memory_space<vmem>>, %arg3: memref<1x8x4xf32, #tpu.memory_space<vmem>>, %arg4: memref<32x96xbf16, #tpu.memory_space<vmem>>, %arg5: memref<1x96xf32, #tpu.memory_space<vmem>>, %arg6: memref<32x32xbf16, #tpu.memory_space<vmem>>, %arg7: memref<1x32xf32, #tpu.memory_space<vmem>>, %arg8: memref<1x32xf32, #tpu.memory_space<vmem>>, %arg9: memref<1x32xf32, #tpu.memory_space<vmem>>, %arg10: memref<32x128xbf16, #tpu.memory_space<vmem>>, %arg11: memref<1x128xf32, #tpu.memory_space<vmem>>, %arg12: memref<128x32xbf16, #tpu.memory_space<vmem>>, %arg13: memref<1x32xf32, #tpu.memory_space<vmem>>, %arg14: memref<1x32xf32, #tpu.memory_space<vmem>>, %arg15: memref<1x32xf32, #tpu.memory_space<vmem>>, %arg16: memref<1x4x8x32xbf16, #tpu.memory_space<vmem>>) attributes {dimension_semantics = [#tpu.dimension_semantics<parallel>, #tpu.dimension_semantics<parallel>], iteration_bounds = array<i64: 2, 1>, scalar_prefetch = 0 : i64, scratch_operands = 0 : i64, tpu.core_type = #tpu.core_type<tc>, window_params = [{transform_indices = @transform_0, window_bounds = array<i64: 1, 4, 8, 32>}, {transform_indices = @transform_1, window_bounds = array<i64: 1, 8, 4>}, {pipeline_mode = #tpu.pipeline_mode<synchronous>, transform_indices = @transform_2, window_bounds = array<i64: 32, 96>}, {pipeline_mode = #tpu.pipeline_mode<synchronous>, transform_indices = @transform_3, window_bounds = array<i64: 1, 96>}, {pipeline_mode = #tpu.pipeline_mode<synchronous>, transform_indices = @transform_4, window_bounds = array<i64: 32, 32>}, {pipeline_mode = #tpu.pipeline_mode<synchronous>, transform_indices = @transform_5, window_bounds = array<i64: 1, 32>}, {pipeline_mode = #tpu.pipeline_mode<synchronous>, transform_indices = @transform_6, window_bounds = array<i64: 1, 32>}, {pipeline_mode = #tpu.pipeline_mode<synchronous>, transform_indices = @transform_7, window_bounds = array<i64: 1, 32>}, {pipeline_mode = #tpu.pipeline_mode<synchronous>, transform_indices = @transform_8, window_bounds = array<i64: 32, 128>}, {pipeline_mode = #tpu.pipeline_mode<synchronous>, transform_indices = @transform_9, window_bounds = array<i64: 1, 128>}, {pipeline_mode = #tpu.pipeline_mode<synchronous>, transform_indices = @transform_10, window_bounds = array<i64: 128, 32>}, {pipeline_mode = #tpu.pipeline_mode<synchronous>, transform_indices = @transform_11, window_bounds = array<i64: 1, 32>}, {pipeline_mode = #tpu.pipeline_mode<synchronous>, transform_indices = @transform_12, window_bounds = array<i64: 1, 32>}, {pipeline_mode = #tpu.pipeline_mode<synchronous>, transform_indices = @transform_13, window_bounds = array<i64: 1, 32>}, {transform_indices = @transform_14, window_bounds = array<i64: 1, 4, 8, 32>}]} {
    %c0 = arith.constant 0 : index
    %c0_0 = arith.constant 0 : index
    %c0_1 = arith.constant 0 : index
    %c0_2 = arith.constant 0 : index
    %0 = vector.load %arg2[%c0, %c0_0, %c0_1, %c0_2] : memref<1x4x8x32xbf16, #tpu.memory_space<vmem>>, vector<1x4x8x32xbf16>
    %1 = vector.shape_cast %0 : vector<1x4x8x32xbf16> to vector<4x8x32xbf16>
    %2 = vector.shape_cast %1 : vector<4x8x32xbf16> to vector<32x32xbf16>
    %3 = arith.extf %2 : vector<32x32xbf16> to vector<32x32xf32>
    %c0_3 = arith.constant 0 : index
    %c0_4 = arith.constant 0 : index
    %c0_5 = arith.constant 0 : index
    %4 = vector.load %arg3[%c0_3, %c0_4, %c0_5] : memref<1x8x4xf32, #tpu.memory_space<vmem>>, vector<1x8x4xf32>
    %5 = vector.shape_cast %4 : vector<1x8x4xf32> to vector<8x4xf32>
    %c0_6 = arith.constant 0 : index
    %c0_7 = arith.constant 0 : index
    %6 = vector.load %arg4[%c0_6, %c0_7] : memref<32x96xbf16, #tpu.memory_space<vmem>>, vector<32x96xbf16>
    %cst = arith.constant dense<0.000000e+00> : vector<32x96xf32>
    %7 = tpu.matmul %2, %6, %cst {dimension_numbers = #tpu.dot_dimension_numbers<[1], [0], [0], [1], [0, 0, 1, 1], [], []>} : vector<32x32xbf16>, vector<32x96xbf16>, vector<32x96xf32> -> vector<32x96xf32>
    %c0_8 = arith.constant 0 : index
    %c0_9 = arith.constant 0 : index
    %8 = vector.load %arg5[%c0_8, %c0_9] : memref<1x96xf32, #tpu.memory_space<vmem>>, vector<1x96xf32>
    %9 = vector.broadcast %8 : vector<1x96xf32> to vector<32x96xf32>
    %10 = arith.addf %7, %9 : vector<32x96xf32>
    %11 = vector.extract_strided_slice %10 {offsets = [0, 0], sizes = [32, 16], strides = [1, 1]} : vector<32x96xf32> to vector<32x16xf32>
    %12 = vector.extract_strided_slice %10 {offsets = [0, 32], sizes = [32, 16], strides = [1, 1]} : vector<32x96xf32> to vector<32x16xf32>
    %13 = vector.extract_strided_slice %10 {offsets = [0, 64], sizes = [32, 16], strides = [1, 1]} : vector<32x96xf32> to vector<32x16xf32>
    %14 = vector.extract_strided_slice %11 {offsets = [0, 0], sizes = [8, 16], strides = [1, 1]} : vector<32x16xf32> to vector<8x16xf32>
    %15 = vector.extract_strided_slice %11 {offsets = [8, 0], sizes = [8, 16], strides = [1, 1]} : vector<32x16xf32> to vector<8x16xf32>
    %16 = vector.extract_strided_slice %11 {offsets = [16, 0], sizes = [8, 16], strides = [1, 1]} : vector<32x16xf32> to vector<8x16xf32>
    %17 = vector.extract_strided_slice %11 {offsets = [24, 0], sizes = [8, 16], strides = [1, 1]} : vector<32x16xf32> to vector<8x16xf32>
    %18 = vector.extract_strided_slice %12 {offsets = [0, 0], sizes = [8, 16], strides = [1, 1]} : vector<32x16xf32> to vector<8x16xf32>
    %19 = vector.extract_strided_slice %12 {offsets = [8, 0], sizes = [8, 16], strides = [1, 1]} : vector<32x16xf32> to vector<8x16xf32>
    %20 = vector.extract_strided_slice %12 {offsets = [16, 0], sizes = [8, 16], strides = [1, 1]} : vector<32x16xf32> to vector<8x16xf32>
    %21 = vector.extract_strided_slice %12 {offsets = [24, 0], sizes = [8, 16], strides = [1, 1]} : vector<32x16xf32> to vector<8x16xf32>
    %22 = vector.extract_strided_slice %13 {offsets = [0, 0], sizes = [8, 16], strides = [1, 1]} : vector<32x16xf32> to vector<8x16xf32>
    %23 = vector.extract_strided_slice %13 {offsets = [8, 0], sizes = [8, 16], strides = [1, 1]} : vector<32x16xf32> to vector<8x16xf32>
    %24 = vector.extract_strided_slice %13 {offsets = [16, 0], sizes = [8, 16], strides = [1, 1]} : vector<32x16xf32> to vector<8x16xf32>
    %25 = vector.extract_strided_slice %13 {offsets = [24, 0], sizes = [8, 16], strides = [1, 1]} : vector<32x16xf32> to vector<8x16xf32>
    %26 = arith.mulf %14, %18 : vector<8x16xf32>
    %cst_10 = arith.constant dense<0.000000e+00> : vector<8xf32>
    %27 = vector.multi_reduction <add>, %26, %cst_10 [1] : vector<8x16xf32> to vector<8xf32>
    %28 = vector.shape_cast %27 : vector<8xf32> to vector<8x1xf32>
    %29 = vector.extract_strided_slice %5 {offsets = [0, 0], sizes = [8, 1], strides = [1, 1]} : vector<8x4xf32> to vector<8x1xf32>
    %30 = arith.addf %28, %29 : vector<8x1xf32>
    %31 = arith.mulf %14, %19 : vector<8x16xf32>
    %cst_11 = arith.constant dense<0.000000e+00> : vector<8xf32>
    %32 = vector.multi_reduction <add>, %31, %cst_11 [1] : vector<8x16xf32> to vector<8xf32>
    %33 = vector.shape_cast %32 : vector<8xf32> to vector<8x1xf32>
    %34 = vector.extract_strided_slice %5 {offsets = [0, 1], sizes = [8, 1], strides = [1, 1]} : vector<8x4xf32> to vector<8x1xf32>
    %35 = arith.addf %33, %34 : vector<8x1xf32>
    %36 = arith.mulf %14, %20 : vector<8x16xf32>
    %cst_12 = arith.constant dense<0.000000e+00> : vector<8xf32>
    %37 = vector.multi_reduction <add>, %36, %cst_12 [1] : vector<8x16xf32> to vector<8xf32>
    %38 = vector.shape_cast %37 : vector<8xf32> to vector<8x1xf32>
    %39 = vector.extract_strided_slice %5 {offsets = [0, 2], sizes = [8, 1], strides = [1, 1]} : vector<8x4xf32> to vector<8x1xf32>
    %40 = arith.addf %38, %39 : vector<8x1xf32>
    %41 = arith.mulf %14, %21 : vector<8x16xf32>
    %cst_13 = arith.constant dense<0.000000e+00> : vector<8xf32>
    %42 = vector.multi_reduction <add>, %41, %cst_13 [1] : vector<8x16xf32> to vector<8xf32>
    %43 = vector.shape_cast %42 : vector<8xf32> to vector<8x1xf32>
    %44 = vector.extract_strided_slice %5 {offsets = [0, 3], sizes = [8, 1], strides = [1, 1]} : vector<8x4xf32> to vector<8x1xf32>
    %45 = arith.addf %43, %44 : vector<8x1xf32>
    %46 = arith.maximumf %30, %35 : vector<8x1xf32>
    %47 = arith.maximumf %46, %40 : vector<8x1xf32>
    %48 = arith.maximumf %47, %45 : vector<8x1xf32>
    %49 = arith.subf %30, %48 : vector<8x1xf32>
    %50 = math.exp %49 : vector<8x1xf32>
    %51 = arith.subf %35, %48 : vector<8x1xf32>
    %52 = math.exp %51 : vector<8x1xf32>
    %53 = arith.subf %40, %48 : vector<8x1xf32>
    %54 = math.exp %53 : vector<8x1xf32>
    %55 = arith.subf %45, %48 : vector<8x1xf32>
    %56 = math.exp %55 : vector<8x1xf32>
    %57 = arith.addf %50, %52 : vector<8x1xf32>
    %58 = arith.addf %57, %54 : vector<8x1xf32>
    %59 = arith.addf %58, %56 : vector<8x1xf32>
    %60 = tpu.reciprocal %59 {approx = true} : vector<8x1xf32> -> vector<8x1xf32>
    %61 = arith.mulf %50, %60 : vector<8x1xf32>
    %62 = vector.broadcast %61 : vector<8x1xf32> to vector<8x16xf32>
    %63 = arith.mulf %62, %22 : vector<8x16xf32>
    %64 = arith.mulf %52, %60 : vector<8x1xf32>
    %65 = vector.broadcast %64 : vector<8x1xf32> to vector<8x16xf32>
    %66 = arith.mulf %65, %23 : vector<8x16xf32>
    %67 = arith.addf %63, %66 : vector<8x16xf32>
    %68 = arith.mulf %54, %60 : vector<8x1xf32>
    %69 = vector.broadcast %68 : vector<8x1xf32> to vector<8x16xf32>
    %70 = arith.mulf %69, %24 : vector<8x16xf32>
    %71 = arith.addf %67, %70 : vector<8x16xf32>
    %72 = arith.mulf %56, %60 : vector<8x1xf32>
    %73 = vector.broadcast %72 : vector<8x1xf32> to vector<8x16xf32>
    %74 = arith.mulf %73, %25 : vector<8x16xf32>
    %75 = arith.addf %71, %74 : vector<8x16xf32>
    %76 = arith.mulf %15, %18 : vector<8x16xf32>
    %cst_14 = arith.constant dense<0.000000e+00> : vector<8xf32>
    %77 = vector.multi_reduction <add>, %76, %cst_14 [1] : vector<8x16xf32> to vector<8xf32>
    %78 = vector.shape_cast %77 : vector<8xf32> to vector<8x1xf32>
    %79 = vector.extract_strided_slice %5 {offsets = [0, 0], sizes = [8, 1], strides = [1, 1]} : vector<8x4xf32> to vector<8x1xf32>
    %80 = arith.addf %78, %79 : vector<8x1xf32>
    %81 = arith.mulf %15, %19 : vector<8x16xf32>
    %cst_15 = arith.constant dense<0.000000e+00> : vector<8xf32>
    %82 = vector.multi_reduction <add>, %81, %cst_15 [1] : vector<8x16xf32> to vector<8xf32>
    %83 = vector.shape_cast %82 : vector<8xf32> to vector<8x1xf32>
    %84 = vector.extract_strided_slice %5 {offsets = [0, 1], sizes = [8, 1], strides = [1, 1]} : vector<8x4xf32> to vector<8x1xf32>
    %85 = arith.addf %83, %84 : vector<8x1xf32>
    %86 = arith.mulf %15, %20 : vector<8x16xf32>
    %cst_16 = arith.constant dense<0.000000e+00> : vector<8xf32>
    %87 = vector.multi_reduction <add>, %86, %cst_16 [1] : vector<8x16xf32> to vector<8xf32>
    %88 = vector.shape_cast %87 : vector<8xf32> to vector<8x1xf32>
    %89 = vector.extract_strided_slice %5 {offsets = [0, 2], sizes = [8, 1], strides = [1, 1]} : vector<8x4xf32> to vector<8x1xf32>
    %90 = arith.addf %88, %89 : vector<8x1xf32>
    %91 = arith.mulf %15, %21 : vector<8x16xf32>
    %cst_17 = arith.constant dense<0.000000e+00> : vector<8xf32>
    %92 = vector.multi_reduction <add>, %91, %cst_17 [1] : vector<8x16xf32> to vector<8xf32>
    %93 = vector.shape_cast %92 : vector<8xf32> to vector<8x1xf32>
    %94 = vector.extract_strided_slice %5 {offsets = [0, 3], sizes = [8, 1], strides = [1, 1]} : vector<8x4xf32> to vector<8x1xf32>
    %95 = arith.addf %93, %94 : vector<8x1xf32>
    %96 = arith.maximumf %80, %85 : vector<8x1xf32>
    %97 = arith.maximumf %96, %90 : vector<8x1xf32>
    %98 = arith.maximumf %97, %95 : vector<8x1xf32>
    %99 = arith.subf %80, %98 : vector<8x1xf32>
    %100 = math.exp %99 : vector<8x1xf32>
    %101 = arith.subf %85, %98 : vector<8x1xf32>
    %102 = math.exp %101 : vector<8x1xf32>
    %103 = arith.subf %90, %98 : vector<8x1xf32>
    %104 = math.exp %103 : vector<8x1xf32>
    %105 = arith.subf %95, %98 : vector<8x1xf32>
    %106 = math.exp %105 : vector<8x1xf32>
    %107 = arith.addf %100, %102 : vector<8x1xf32>
    %108 = arith.addf %107, %104 : vector<8x1xf32>
    %109 = arith.addf %108, %106 : vector<8x1xf32>
    %110 = tpu.reciprocal %109 {approx = true} : vector<8x1xf32> -> vector<8x1xf32>
    %111 = arith.mulf %100, %110 : vector<8x1xf32>
    %112 = vector.broadcast %111 : vector<8x1xf32> to vector<8x16xf32>
    %113 = arith.mulf %112, %22 : vector<8x16xf32>
    %114 = arith.mulf %102, %110 : vector<8x1xf32>
    %115 = vector.broadcast %114 : vector<8x1xf32> to vector<8x16xf32>
    %116 = arith.mulf %115, %23 : vector<8x16xf32>
    %117 = arith.addf %113, %116 : vector<8x16xf32>
    %118 = arith.mulf %104, %110 : vector<8x1xf32>
    %119 = vector.broadcast %118 : vector<8x1xf32> to vector<8x16xf32>
    %120 = arith.mulf %119, %24 : vector<8x16xf32>
    %121 = arith.addf %117, %120 : vector<8x16xf32>
    %122 = arith.mulf %106, %110 : vector<8x1xf32>
    %123 = vector.broadcast %122 : vector<8x1xf32> to vector<8x16xf32>
    %124 = arith.mulf %123, %25 : vector<8x16xf32>
    %125 = arith.addf %121, %124 : vector<8x16xf32>
    %126 = arith.mulf %16, %18 : vector<8x16xf32>
    %cst_18 = arith.constant dense<0.000000e+00> : vector<8xf32>
    %127 = vector.multi_reduction <add>, %126, %cst_18 [1] : vector<8x16xf32> to vector<8xf32>
    %128 = vector.shape_cast %127 : vector<8xf32> to vector<8x1xf32>
    %129 = vector.extract_strided_slice %5 {offsets = [0, 0], sizes = [8, 1], strides = [1, 1]} : vector<8x4xf32> to vector<8x1xf32>
    %130 = arith.addf %128, %129 : vector<8x1xf32>
    %131 = arith.mulf %16, %19 : vector<8x16xf32>
    %cst_19 = arith.constant dense<0.000000e+00> : vector<8xf32>
    %132 = vector.multi_reduction <add>, %131, %cst_19 [1] : vector<8x16xf32> to vector<8xf32>
    %133 = vector.shape_cast %132 : vector<8xf32> to vector<8x1xf32>
    %134 = vector.extract_strided_slice %5 {offsets = [0, 1], sizes = [8, 1], strides = [1, 1]} : vector<8x4xf32> to vector<8x1xf32>
    %135 = arith.addf %133, %134 : vector<8x1xf32>
    %136 = arith.mulf %16, %20 : vector<8x16xf32>
    %cst_20 = arith.constant dense<0.000000e+00> : vector<8xf32>
    %137 = vector.multi_reduction <add>, %136, %cst_20 [1] : vector<8x16xf32> to vector<8xf32>
    %138 = vector.shape_cast %137 : vector<8xf32> to vector<8x1xf32>
    %139 = vector.extract_strided_slice %5 {offsets = [0, 2], sizes = [8, 1], strides = [1, 1]} : vector<8x4xf32> to vector<8x1xf32>
    %140 = arith.addf %138, %139 : vector<8x1xf32>
    %141 = arith.mulf %16, %21 : vector<8x16xf32>
    %cst_21 = arith.constant dense<0.000000e+00> : vector<8xf32>
    %142 = vector.multi_reduction <add>, %141, %cst_21 [1] : vector<8x16xf32> to vector<8xf32>
    %143 = vector.shape_cast %142 : vector<8xf32> to vector<8x1xf32>
    %144 = vector.extract_strided_slice %5 {offsets = [0, 3], sizes = [8, 1], strides = [1, 1]} : vector<8x4xf32> to vector<8x1xf32>
    %145 = arith.addf %143, %144 : vector<8x1xf32>
    %146 = arith.maximumf %130, %135 : vector<8x1xf32>
    %147 = arith.maximumf %146, %140 : vector<8x1xf32>
    %148 = arith.maximumf %147, %145 : vector<8x1xf32>
    %149 = arith.subf %130, %148 : vector<8x1xf32>
    %150 = math.exp %149 : vector<8x1xf32>
    %151 = arith.subf %135, %148 : vector<8x1xf32>
    %152 = math.exp %151 : vector<8x1xf32>
    %153 = arith.subf %140, %148 : vector<8x1xf32>
    %154 = math.exp %153 : vector<8x1xf32>
    %155 = arith.subf %145, %148 : vector<8x1xf32>
    %156 = math.exp %155 : vector<8x1xf32>
    %157 = arith.addf %150, %152 : vector<8x1xf32>
    %158 = arith.addf %157, %154 : vector<8x1xf32>
    %159 = arith.addf %158, %156 : vector<8x1xf32>
    %160 = tpu.reciprocal %159 {approx = true} : vector<8x1xf32> -> vector<8x1xf32>
    %161 = arith.mulf %150, %160 : vector<8x1xf32>
    %162 = vector.broadcast %161 : vector<8x1xf32> to vector<8x16xf32>
    %163 = arith.mulf %162, %22 : vector<8x16xf32>
    %164 = arith.mulf %152, %160 : vector<8x1xf32>
    %165 = vector.broadcast %164 : vector<8x1xf32> to vector<8x16xf32>
    %166 = arith.mulf %165, %23 : vector<8x16xf32>
    %167 = arith.addf %163, %166 : vector<8x16xf32>
    %168 = arith.mulf %154, %160 : vector<8x1xf32>
    %169 = vector.broadcast %168 : vector<8x1xf32> to vector<8x16xf32>
    %170 = arith.mulf %169, %24 : vector<8x16xf32>
    %171 = arith.addf %167, %170 : vector<8x16xf32>
    %172 = arith.mulf %156, %160 : vector<8x1xf32>
    %173 = vector.broadcast %172 : vector<8x1xf32> to vector<8x16xf32>
    %174 = arith.mulf %173, %25 : vector<8x16xf32>
    %175 = arith.addf %171, %174 : vector<8x16xf32>
    %176 = arith.mulf %17, %18 : vector<8x16xf32>
    %cst_22 = arith.constant dense<0.000000e+00> : vector<8xf32>
    %177 = vector.multi_reduction <add>, %176, %cst_22 [1] : vector<8x16xf32> to vector<8xf32>
    %178 = vector.shape_cast %177 : vector<8xf32> to vector<8x1xf32>
    %179 = vector.extract_strided_slice %5 {offsets = [0, 0], sizes = [8, 1], strides = [1, 1]} : vector<8x4xf32> to vector<8x1xf32>
    %180 = arith.addf %178, %179 : vector<8x1xf32>
    %181 = arith.mulf %17, %19 : vector<8x16xf32>
    %cst_23 = arith.constant dense<0.000000e+00> : vector<8xf32>
    %182 = vector.multi_reduction <add>, %181, %cst_23 [1] : vector<8x16xf32> to vector<8xf32>
    %183 = vector.shape_cast %182 : vector<8xf32> to vector<8x1xf32>
    %184 = vector.extract_strided_slice %5 {offsets = [0, 1], sizes = [8, 1], strides = [1, 1]} : vector<8x4xf32> to vector<8x1xf32>
    %185 = arith.addf %183, %184 : vector<8x1xf32>
    %186 = arith.mulf %17, %20 : vector<8x16xf32>
    %cst_24 = arith.constant dense<0.000000e+00> : vector<8xf32>
    %187 = vector.multi_reduction <add>, %186, %cst_24 [1] : vector<8x16xf32> to vector<8xf32>
    %188 = vector.shape_cast %187 : vector<8xf32> to vector<8x1xf32>
    %189 = vector.extract_strided_slice %5 {offsets = [0, 2], sizes = [8, 1], strides = [1, 1]} : vector<8x4xf32> to vector<8x1xf32>
    %190 = arith.addf %188, %189 : vector<8x1xf32>
    %191 = arith.mulf %17, %21 : vector<8x16xf32>
    %cst_25 = arith.constant dense<0.000000e+00> : vector<8xf32>
    %192 = vector.multi_reduction <add>, %191, %cst_25 [1] : vector<8x16xf32> to vector<8xf32>
    %193 = vector.shape_cast %192 : vector<8xf32> to vector<8x1xf32>
    %194 = vector.extract_strided_slice %5 {offsets = [0, 3], sizes = [8, 1], strides = [1, 1]} : vector<8x4xf32> to vector<8x1xf32>
    %195 = arith.addf %193, %194 : vector<8x1xf32>
    %196 = arith.maximumf %180, %185 : vector<8x1xf32>
    %197 = arith.maximumf %196, %190 : vector<8x1xf32>
    %198 = arith.maximumf %197, %195 : vector<8x1xf32>
    %199 = arith.subf %180, %198 : vector<8x1xf32>
    %200 = math.exp %199 : vector<8x1xf32>
    %201 = arith.subf %185, %198 : vector<8x1xf32>
    %202 = math.exp %201 : vector<8x1xf32>
    %203 = arith.subf %190, %198 : vector<8x1xf32>
    %204 = math.exp %203 : vector<8x1xf32>
    %205 = arith.subf %195, %198 : vector<8x1xf32>
    %206 = math.exp %205 : vector<8x1xf32>
    %207 = arith.addf %200, %202 : vector<8x1xf32>
    %208 = arith.addf %207, %204 : vector<8x1xf32>
    %209 = arith.addf %208, %206 : vector<8x1xf32>
    %210 = tpu.reciprocal %209 {approx = true} : vector<8x1xf32> -> vector<8x1xf32>
    %211 = arith.mulf %200, %210 : vector<8x1xf32>
    %212 = vector.broadcast %211 : vector<8x1xf32> to vector<8x16xf32>
    %213 = arith.mulf %212, %22 : vector<8x16xf32>
    %214 = arith.mulf %202, %210 : vector<8x1xf32>
    %215 = vector.broadcast %214 : vector<8x1xf32> to vector<8x16xf32>
    %216 = arith.mulf %215, %23 : vector<8x16xf32>
    %217 = arith.addf %213, %216 : vector<8x16xf32>
    %218 = arith.mulf %204, %210 : vector<8x1xf32>
    %219 = vector.broadcast %218 : vector<8x1xf32> to vector<8x16xf32>
    %220 = arith.mulf %219, %24 : vector<8x16xf32>
    %221 = arith.addf %217, %220 : vector<8x16xf32>
    %222 = arith.mulf %206, %210 : vector<8x1xf32>
    %223 = vector.broadcast %222 : vector<8x1xf32> to vector<8x16xf32>
    %224 = arith.mulf %223, %25 : vector<8x16xf32>
    %225 = arith.addf %221, %224 : vector<8x16xf32>
    %226 = tpu.concatenate %75, %125, %175, %225 in 0 : vector<8x16xf32>, vector<8x16xf32>, vector<8x16xf32>, vector<8x16xf32> -> vector<32x16xf32>
    %227 = vector.extract_strided_slice %10 {offsets = [0, 16], sizes = [32, 16], strides = [1, 1]} : vector<32x96xf32> to vector<32x16xf32>
    %228 = vector.extract_strided_slice %10 {offsets = [0, 48], sizes = [32, 16], strides = [1, 1]} : vector<32x96xf32> to vector<32x16xf32>
    %229 = vector.extract_strided_slice %10 {offsets = [0, 80], sizes = [32, 16], strides = [1, 1]} : vector<32x96xf32> to vector<32x16xf32>
    %230 = vector.extract_strided_slice %227 {offsets = [0, 0], sizes = [8, 16], strides = [1, 1]} : vector<32x16xf32> to vector<8x16xf32>
    %231 = vector.extract_strided_slice %227 {offsets = [8, 0], sizes = [8, 16], strides = [1, 1]} : vector<32x16xf32> to vector<8x16xf32>
    %232 = vector.extract_strided_slice %227 {offsets = [16, 0], sizes = [8, 16], strides = [1, 1]} : vector<32x16xf32> to vector<8x16xf32>
    %233 = vector.extract_strided_slice %227 {offsets = [24, 0], sizes = [8, 16], strides = [1, 1]} : vector<32x16xf32> to vector<8x16xf32>
    %234 = vector.extract_strided_slice %228 {offsets = [0, 0], sizes = [8, 16], strides = [1, 1]} : vector<32x16xf32> to vector<8x16xf32>
    %235 = vector.extract_strided_slice %228 {offsets = [8, 0], sizes = [8, 16], strides = [1, 1]} : vector<32x16xf32> to vector<8x16xf32>
    %236 = vector.extract_strided_slice %228 {offsets = [16, 0], sizes = [8, 16], strides = [1, 1]} : vector<32x16xf32> to vector<8x16xf32>
    %237 = vector.extract_strided_slice %228 {offsets = [24, 0], sizes = [8, 16], strides = [1, 1]} : vector<32x16xf32> to vector<8x16xf32>
    %238 = vector.extract_strided_slice %229 {offsets = [0, 0], sizes = [8, 16], strides = [1, 1]} : vector<32x16xf32> to vector<8x16xf32>
    %239 = vector.extract_strided_slice %229 {offsets = [8, 0], sizes = [8, 16], strides = [1, 1]} : vector<32x16xf32> to vector<8x16xf32>
    %240 = vector.extract_strided_slice %229 {offsets = [16, 0], sizes = [8, 16], strides = [1, 1]} : vector<32x16xf32> to vector<8x16xf32>
    %241 = vector.extract_strided_slice %229 {offsets = [24, 0], sizes = [8, 16], strides = [1, 1]} : vector<32x16xf32> to vector<8x16xf32>
    %242 = arith.mulf %230, %234 : vector<8x16xf32>
    %cst_26 = arith.constant dense<0.000000e+00> : vector<8xf32>
    %243 = vector.multi_reduction <add>, %242, %cst_26 [1] : vector<8x16xf32> to vector<8xf32>
    %244 = vector.shape_cast %243 : vector<8xf32> to vector<8x1xf32>
    %245 = vector.extract_strided_slice %5 {offsets = [0, 0], sizes = [8, 1], strides = [1, 1]} : vector<8x4xf32> to vector<8x1xf32>
    %246 = arith.addf %244, %245 : vector<8x1xf32>
    %247 = arith.mulf %230, %235 : vector<8x16xf32>
    %cst_27 = arith.constant dense<0.000000e+00> : vector<8xf32>
    %248 = vector.multi_reduction <add>, %247, %cst_27 [1] : vector<8x16xf32> to vector<8xf32>
    %249 = vector.shape_cast %248 : vector<8xf32> to vector<8x1xf32>
    %250 = vector.extract_strided_slice %5 {offsets = [0, 1], sizes = [8, 1], strides = [1, 1]} : vector<8x4xf32> to vector<8x1xf32>
    %251 = arith.addf %249, %250 : vector<8x1xf32>
    %252 = arith.mulf %230, %236 : vector<8x16xf32>
    %cst_28 = arith.constant dense<0.000000e+00> : vector<8xf32>
    %253 = vector.multi_reduction <add>, %252, %cst_28 [1] : vector<8x16xf32> to vector<8xf32>
    %254 = vector.shape_cast %253 : vector<8xf32> to vector<8x1xf32>
    %255 = vector.extract_strided_slice %5 {offsets = [0, 2], sizes = [8, 1], strides = [1, 1]} : vector<8x4xf32> to vector<8x1xf32>
    %256 = arith.addf %254, %255 : vector<8x1xf32>
    %257 = arith.mulf %230, %237 : vector<8x16xf32>
    %cst_29 = arith.constant dense<0.000000e+00> : vector<8xf32>
    %258 = vector.multi_reduction <add>, %257, %cst_29 [1] : vector<8x16xf32> to vector<8xf32>
    %259 = vector.shape_cast %258 : vector<8xf32> to vector<8x1xf32>
    %260 = vector.extract_strided_slice %5 {offsets = [0, 3], sizes = [8, 1], strides = [1, 1]} : vector<8x4xf32> to vector<8x1xf32>
    %261 = arith.addf %259, %260 : vector<8x1xf32>
    %262 = arith.maximumf %246, %251 : vector<8x1xf32>
    %263 = arith.maximumf %262, %256 : vector<8x1xf32>
    %264 = arith.maximumf %263, %261 : vector<8x1xf32>
    %265 = arith.subf %246, %264 : vector<8x1xf32>
    %266 = math.exp %265 : vector<8x1xf32>
    %267 = arith.subf %251, %264 : vector<8x1xf32>
    %268 = math.exp %267 : vector<8x1xf32>
    %269 = arith.subf %256, %264 : vector<8x1xf32>
    %270 = math.exp %269 : vector<8x1xf32>
    %271 = arith.subf %261, %264 : vector<8x1xf32>
    %272 = math.exp %271 : vector<8x1xf32>
    %273 = arith.addf %266, %268 : vector<8x1xf32>
    %274 = arith.addf %273, %270 : vector<8x1xf32>
    %275 = arith.addf %274, %272 : vector<8x1xf32>
    %276 = tpu.reciprocal %275 {approx = true} : vector<8x1xf32> -> vector<8x1xf32>
    %277 = arith.mulf %266, %276 : vector<8x1xf32>
    %278 = vector.broadcast %277 : vector<8x1xf32> to vector<8x16xf32>
    %279 = arith.mulf %278, %238 : vector<8x16xf32>
    %280 = arith.mulf %268, %276 : vector<8x1xf32>
    %281 = vector.broadcast %280 : vector<8x1xf32> to vector<8x16xf32>
    %282 = arith.mulf %281, %239 : vector<8x16xf32>
    %283 = arith.addf %279, %282 : vector<8x16xf32>
    %284 = arith.mulf %270, %276 : vector<8x1xf32>
    %285 = vector.broadcast %284 : vector<8x1xf32> to vector<8x16xf32>
    %286 = arith.mulf %285, %240 : vector<8x16xf32>
    %287 = arith.addf %283, %286 : vector<8x16xf32>
    %288 = arith.mulf %272, %276 : vector<8x1xf32>
    %289 = vector.broadcast %288 : vector<8x1xf32> to vector<8x16xf32>
    %290 = arith.mulf %289, %241 : vector<8x16xf32>
    %291 = arith.addf %287, %290 : vector<8x16xf32>
    %292 = arith.mulf %231, %234 : vector<8x16xf32>
    %cst_30 = arith.constant dense<0.000000e+00> : vector<8xf32>
    %293 = vector.multi_reduction <add>, %292, %cst_30 [1] : vector<8x16xf32> to vector<8xf32>
    %294 = vector.shape_cast %293 : vector<8xf32> to vector<8x1xf32>
    %295 = vector.extract_strided_slice %5 {offsets = [0, 0], sizes = [8, 1], strides = [1, 1]} : vector<8x4xf32> to vector<8x1xf32>
    %296 = arith.addf %294, %295 : vector<8x1xf32>
    %297 = arith.mulf %231, %235 : vector<8x16xf32>
    %cst_31 = arith.constant dense<0.000000e+00> : vector<8xf32>
    %298 = vector.multi_reduction <add>, %297, %cst_31 [1] : vector<8x16xf32> to vector<8xf32>
    %299 = vector.shape_cast %298 : vector<8xf32> to vector<8x1xf32>
    %300 = vector.extract_strided_slice %5 {offsets = [0, 1], sizes = [8, 1], strides = [1, 1]} : vector<8x4xf32> to vector<8x1xf32>
    %301 = arith.addf %299, %300 : vector<8x1xf32>
    %302 = arith.mulf %231, %236 : vector<8x16xf32>
    %cst_32 = arith.constant dense<0.000000e+00> : vector<8xf32>
    %303 = vector.multi_reduction <add>, %302, %cst_32 [1] : vector<8x16xf32> to vector<8xf32>
    %304 = vector.shape_cast %303 : vector<8xf32> to vector<8x1xf32>
    %305 = vector.extract_strided_slice %5 {offsets = [0, 2], sizes = [8, 1], strides = [1, 1]} : vector<8x4xf32> to vector<8x1xf32>
    %306 = arith.addf %304, %305 : vector<8x1xf32>
    %307 = arith.mulf %231, %237 : vector<8x16xf32>
    %cst_33 = arith.constant dense<0.000000e+00> : vector<8xf32>
    %308 = vector.multi_reduction <add>, %307, %cst_33 [1] : vector<8x16xf32> to vector<8xf32>
    %309 = vector.shape_cast %308 : vector<8xf32> to vector<8x1xf32>
    %310 = vector.extract_strided_slice %5 {offsets = [0, 3], sizes = [8, 1], strides = [1, 1]} : vector<8x4xf32> to vector<8x1xf32>
    %311 = arith.addf %309, %310 : vector<8x1xf32>
    %312 = arith.maximumf %296, %301 : vector<8x1xf32>
    %313 = arith.maximumf %312, %306 : vector<8x1xf32>
    %314 = arith.maximumf %313, %311 : vector<8x1xf32>
    %315 = arith.subf %296, %314 : vector<8x1xf32>
    %316 = math.exp %315 : vector<8x1xf32>
    %317 = arith.subf %301, %314 : vector<8x1xf32>
    %318 = math.exp %317 : vector<8x1xf32>
    %319 = arith.subf %306, %314 : vector<8x1xf32>
    %320 = math.exp %319 : vector<8x1xf32>
    %321 = arith.subf %311, %314 : vector<8x1xf32>
    %322 = math.exp %321 : vector<8x1xf32>
    %323 = arith.addf %316, %318 : vector<8x1xf32>
    %324 = arith.addf %323, %320 : vector<8x1xf32>
    %325 = arith.addf %324, %322 : vector<8x1xf32>
    %326 = tpu.reciprocal %325 {approx = true} : vector<8x1xf32> -> vector<8x1xf32>
    %327 = arith.mulf %316, %326 : vector<8x1xf32>
    %328 = vector.broadcast %327 : vector<8x1xf32> to vector<8x16xf32>
    %329 = arith.mulf %328, %238 : vector<8x16xf32>
    %330 = arith.mulf %318, %326 : vector<8x1xf32>
    %331 = vector.broadcast %330 : vector<8x1xf32> to vector<8x16xf32>
    %332 = arith.mulf %331, %239 : vector<8x16xf32>
    %333 = arith.addf %329, %332 : vector<8x16xf32>
    %334 = arith.mulf %320, %326 : vector<8x1xf32>
    %335 = vector.broadcast %334 : vector<8x1xf32> to vector<8x16xf32>
    %336 = arith.mulf %335, %240 : vector<8x16xf32>
    %337 = arith.addf %333, %336 : vector<8x16xf32>
    %338 = arith.mulf %322, %326 : vector<8x1xf32>
    %339 = vector.broadcast %338 : vector<8x1xf32> to vector<8x16xf32>
    %340 = arith.mulf %339, %241 : vector<8x16xf32>
    %341 = arith.addf %337, %340 : vector<8x16xf32>
    %342 = arith.mulf %232, %234 : vector<8x16xf32>
    %cst_34 = arith.constant dense<0.000000e+00> : vector<8xf32>
    %343 = vector.multi_reduction <add>, %342, %cst_34 [1] : vector<8x16xf32> to vector<8xf32>
    %344 = vector.shape_cast %343 : vector<8xf32> to vector<8x1xf32>
    %345 = vector.extract_strided_slice %5 {offsets = [0, 0], sizes = [8, 1], strides = [1, 1]} : vector<8x4xf32> to vector<8x1xf32>
    %346 = arith.addf %344, %345 : vector<8x1xf32>
    %347 = arith.mulf %232, %235 : vector<8x16xf32>
    %cst_35 = arith.constant dense<0.000000e+00> : vector<8xf32>
    %348 = vector.multi_reduction <add>, %347, %cst_35 [1] : vector<8x16xf32> to vector<8xf32>
    %349 = vector.shape_cast %348 : vector<8xf32> to vector<8x1xf32>
    %350 = vector.extract_strided_slice %5 {offsets = [0, 1], sizes = [8, 1], strides = [1, 1]} : vector<8x4xf32> to vector<8x1xf32>
    %351 = arith.addf %349, %350 : vector<8x1xf32>
    %352 = arith.mulf %232, %236 : vector<8x16xf32>
    %cst_36 = arith.constant dense<0.000000e+00> : vector<8xf32>
    %353 = vector.multi_reduction <add>, %352, %cst_36 [1] : vector<8x16xf32> to vector<8xf32>
    %354 = vector.shape_cast %353 : vector<8xf32> to vector<8x1xf32>
    %355 = vector.extract_strided_slice %5 {offsets = [0, 2], sizes = [8, 1], strides = [1, 1]} : vector<8x4xf32> to vector<8x1xf32>
    %356 = arith.addf %354, %355 : vector<8x1xf32>
    %357 = arith.mulf %232, %237 : vector<8x16xf32>
    %cst_37 = arith.constant dense<0.000000e+00> : vector<8xf32>
    %358 = vector.multi_reduction <add>, %357, %cst_37 [1] : vector<8x16xf32> to vector<8xf32>
    %359 = vector.shape_cast %358 : vector<8xf32> to vector<8x1xf32>
    %360 = vector.extract_strided_slice %5 {offsets = [0, 3], sizes = [8, 1], strides = [1, 1]} : vector<8x4xf32> to vector<8x1xf32>
    %361 = arith.addf %359, %360 : vector<8x1xf32>
    %362 = arith.maximumf %346, %351 : vector<8x1xf32>
    %363 = arith.maximumf %362, %356 : vector<8x1xf32>
    %364 = arith.maximumf %363, %361 : vector<8x1xf32>
    %365 = arith.subf %346, %364 : vector<8x1xf32>
    %366 = math.exp %365 : vector<8x1xf32>
    %367 = arith.subf %351, %364 : vector<8x1xf32>
    %368 = math.exp %367 : vector<8x1xf32>
    %369 = arith.subf %356, %364 : vector<8x1xf32>
    %370 = math.exp %369 : vector<8x1xf32>
    %371 = arith.subf %361, %364 : vector<8x1xf32>
    %372 = math.exp %371 : vector<8x1xf32>
    %373 = arith.addf %366, %368 : vector<8x1xf32>
    %374 = arith.addf %373, %370 : vector<8x1xf32>
    %375 = arith.addf %374, %372 : vector<8x1xf32>
    %376 = tpu.reciprocal %375 {approx = true} : vector<8x1xf32> -> vector<8x1xf32>
    %377 = arith.mulf %366, %376 : vector<8x1xf32>
    %378 = vector.broadcast %377 : vector<8x1xf32> to vector<8x16xf32>
    %379 = arith.mulf %378, %238 : vector<8x16xf32>
    %380 = arith.mulf %368, %376 : vector<8x1xf32>
    %381 = vector.broadcast %380 : vector<8x1xf32> to vector<8x16xf32>
    %382 = arith.mulf %381, %239 : vector<8x16xf32>
    %383 = arith.addf %379, %382 : vector<8x16xf32>
    %384 = arith.mulf %370, %376 : vector<8x1xf32>
    %385 = vector.broadcast %384 : vector<8x1xf32> to vector<8x16xf32>
    %386 = arith.mulf %385, %240 : vector<8x16xf32>
    %387 = arith.addf %383, %386 : vector<8x16xf32>
    %388 = arith.mulf %372, %376 : vector<8x1xf32>
    %389 = vector.broadcast %388 : vector<8x1xf32> to vector<8x16xf32>
    %390 = arith.mulf %389, %241 : vector<8x16xf32>
    %391 = arith.addf %387, %390 : vector<8x16xf32>
    %392 = arith.mulf %233, %234 : vector<8x16xf32>
    %cst_38 = arith.constant dense<0.000000e+00> : vector<8xf32>
    %393 = vector.multi_reduction <add>, %392, %cst_38 [1] : vector<8x16xf32> to vector<8xf32>
    %394 = vector.shape_cast %393 : vector<8xf32> to vector<8x1xf32>
    %395 = vector.extract_strided_slice %5 {offsets = [0, 0], sizes = [8, 1], strides = [1, 1]} : vector<8x4xf32> to vector<8x1xf32>
    %396 = arith.addf %394, %395 : vector<8x1xf32>
    %397 = arith.mulf %233, %235 : vector<8x16xf32>
    %cst_39 = arith.constant dense<0.000000e+00> : vector<8xf32>
    %398 = vector.multi_reduction <add>, %397, %cst_39 [1] : vector<8x16xf32> to vector<8xf32>
    %399 = vector.shape_cast %398 : vector<8xf32> to vector<8x1xf32>
    %400 = vector.extract_strided_slice %5 {offsets = [0, 1], sizes = [8, 1], strides = [1, 1]} : vector<8x4xf32> to vector<8x1xf32>
    %401 = arith.addf %399, %400 : vector<8x1xf32>
    %402 = arith.mulf %233, %236 : vector<8x16xf32>
    %cst_40 = arith.constant dense<0.000000e+00> : vector<8xf32>
    %403 = vector.multi_reduction <add>, %402, %cst_40 [1] : vector<8x16xf32> to vector<8xf32>
    %404 = vector.shape_cast %403 : vector<8xf32> to vector<8x1xf32>
    %405 = vector.extract_strided_slice %5 {offsets = [0, 2], sizes = [8, 1], strides = [1, 1]} : vector<8x4xf32> to vector<8x1xf32>
    %406 = arith.addf %404, %405 : vector<8x1xf32>
    %407 = arith.mulf %233, %237 : vector<8x16xf32>
    %cst_41 = arith.constant dense<0.000000e+00> : vector<8xf32>
    %408 = vector.multi_reduction <add>, %407, %cst_41 [1] : vector<8x16xf32> to vector<8xf32>
    %409 = vector.shape_cast %408 : vector<8xf32> to vector<8x1xf32>
    %410 = vector.extract_strided_slice %5 {offsets = [0, 3], sizes = [8, 1], strides = [1, 1]} : vector<8x4xf32> to vector<8x1xf32>
    %411 = arith.addf %409, %410 : vector<8x1xf32>
    %412 = arith.maximumf %396, %401 : vector<8x1xf32>
    %413 = arith.maximumf %412, %406 : vector<8x1xf32>
    %414 = arith.maximumf %413, %411 : vector<8x1xf32>
    %415 = arith.subf %396, %414 : vector<8x1xf32>
    %416 = math.exp %415 : vector<8x1xf32>
    %417 = arith.subf %401, %414 : vector<8x1xf32>
    %418 = math.exp %417 : vector<8x1xf32>
    %419 = arith.subf %406, %414 : vector<8x1xf32>
    %420 = math.exp %419 : vector<8x1xf32>
    %421 = arith.subf %411, %414 : vector<8x1xf32>
    %422 = math.exp %421 : vector<8x1xf32>
    %423 = arith.addf %416, %418 : vector<8x1xf32>
    %424 = arith.addf %423, %420 : vector<8x1xf32>
    %425 = arith.addf %424, %422 : vector<8x1xf32>
    %426 = tpu.reciprocal %425 {approx = true} : vector<8x1xf32> -> vector<8x1xf32>
    %427 = arith.mulf %416, %426 : vector<8x1xf32>
    %428 = vector.broadcast %427 : vector<8x1xf32> to vector<8x16xf32>
    %429 = arith.mulf %428, %238 : vector<8x16xf32>
    %430 = arith.mulf %418, %426 : vector<8x1xf32>
    %431 = vector.broadcast %430 : vector<8x1xf32> to vector<8x16xf32>
    %432 = arith.mulf %431, %239 : vector<8x16xf32>
    %433 = arith.addf %429, %432 : vector<8x16xf32>
    %434 = arith.mulf %420, %426 : vector<8x1xf32>
    %435 = vector.broadcast %434 : vector<8x1xf32> to vector<8x16xf32>
    %436 = arith.mulf %435, %240 : vector<8x16xf32>
    %437 = arith.addf %433, %436 : vector<8x16xf32>
    %438 = arith.mulf %422, %426 : vector<8x1xf32>
    %439 = vector.broadcast %438 : vector<8x1xf32> to vector<8x16xf32>
    %440 = arith.mulf %439, %241 : vector<8x16xf32>
    %441 = arith.addf %437, %440 : vector<8x16xf32>
    %442 = tpu.concatenate %291, %341, %391, %441 in 0 : vector<8x16xf32>, vector<8x16xf32>, vector<8x16xf32>, vector<8x16xf32> -> vector<32x16xf32>
    %443 = tpu.concatenate %226, %442 in 1 : vector<32x16xf32>, vector<32x16xf32> -> vector<32x32xf32>
    %444 = arith.truncf %443 : vector<32x32xf32> to vector<32x32xbf16>
    %c0_42 = arith.constant 0 : index
    %c0_43 = arith.constant 0 : index
    %445 = vector.load %arg6[%c0_42, %c0_43] : memref<32x32xbf16, #tpu.memory_space<vmem>>, vector<32x32xbf16>
    %cst_44 = arith.constant dense<0.000000e+00> : vector<32x32xf32>
    %446 = tpu.matmul %444, %445, %cst_44 {dimension_numbers = #tpu.dot_dimension_numbers<[1], [0], [0], [1], [0, 0, 1, 1], [], []>} : vector<32x32xbf16>, vector<32x32xbf16>, vector<32x32xf32> -> vector<32x32xf32>
    %c0_45 = arith.constant 0 : index
    %c0_46 = arith.constant 0 : index
    %447 = vector.load %arg7[%c0_45, %c0_46] : memref<1x32xf32, #tpu.memory_space<vmem>>, vector<1x32xf32>
    %448 = vector.broadcast %447 : vector<1x32xf32> to vector<32x32xf32>
    %449 = arith.addf %446, %448 : vector<32x32xf32>
    %450 = arith.addf %449, %3 : vector<32x32xf32>
    %c0_47 = arith.constant 0 : index
    %c0_48 = arith.constant 0 : index
    %451 = vector.load %arg8[%c0_47, %c0_48] : memref<1x32xf32, #tpu.memory_space<vmem>>, vector<1x32xf32>
    %c0_49 = arith.constant 0 : index
    %c0_50 = arith.constant 0 : index
    %452 = vector.load %arg9[%c0_49, %c0_50] : memref<1x32xf32, #tpu.memory_space<vmem>>, vector<1x32xf32>
    %cst_51 = arith.constant dense<0.000000e+00> : vector<32xf32>
    %453 = vector.multi_reduction <add>, %450, %cst_51 [1] : vector<32x32xf32> to vector<32xf32>
    %454 = vector.shape_cast %453 : vector<32xf32> to vector<32x1xf32>
    %cst_52 = arith.constant 3.200000e+01 : f32
    %455 = vector.broadcast %cst_52 : f32 to vector<32x1xf32>
    %456 = arith.divf %454, %455 : vector<32x1xf32>
    %457 = vector.broadcast %456 : vector<32x1xf32> to vector<32x32xf32>
    %458 = arith.subf %450, %457 : vector<32x32xf32>
    %459 = arith.mulf %458, %458 : vector<32x32xf32>
    %cst_53 = arith.constant dense<0.000000e+00> : vector<32xf32>
    %460 = vector.multi_reduction <add>, %459, %cst_53 [1] : vector<32x32xf32> to vector<32xf32>
    %461 = vector.shape_cast %460 : vector<32xf32> to vector<32x1xf32>
    %cst_54 = arith.constant 3.200000e+01 : f32
    %462 = vector.broadcast %cst_54 : f32 to vector<32x1xf32>
    %463 = arith.divf %461, %462 : vector<32x1xf32>
    %464 = vector.broadcast %456 : vector<32x1xf32> to vector<32x32xf32>
    %465 = arith.subf %450, %464 : vector<32x32xf32>
    %cst_55 = arith.constant 9.99999996E-13 : f32
    %466 = vector.broadcast %cst_55 : f32 to vector<32x1xf32>
    %467 = arith.addf %463, %466 : vector<32x1xf32>
    %468 = math.rsqrt %467 : vector<32x1xf32>
    %469 = vector.broadcast %468 : vector<32x1xf32> to vector<32x32xf32>
    %470 = arith.mulf %465, %469 : vector<32x32xf32>
    %471 = vector.broadcast %451 : vector<1x32xf32> to vector<32x32xf32>
    %472 = arith.mulf %470, %471 : vector<32x32xf32>
    %473 = vector.broadcast %452 : vector<1x32xf32> to vector<32x32xf32>
    %474 = arith.addf %472, %473 : vector<32x32xf32>
    %475 = arith.truncf %474 : vector<32x32xf32> to vector<32x32xbf16>
    %c0_56 = arith.constant 0 : index
    %c0_57 = arith.constant 0 : index
    %476 = vector.load %arg10[%c0_56, %c0_57] : memref<32x128xbf16, #tpu.memory_space<vmem>>, vector<32x128xbf16>
    %cst_58 = arith.constant dense<0.000000e+00> : vector<32x128xf32>
    %477 = tpu.matmul %475, %476, %cst_58 {dimension_numbers = #tpu.dot_dimension_numbers<[1], [0], [0], [1], [0, 0, 1, 1], [], []>} : vector<32x32xbf16>, vector<32x128xbf16>, vector<32x128xf32> -> vector<32x128xf32>
    %c0_59 = arith.constant 0 : index
    %c0_60 = arith.constant 0 : index
    %478 = vector.load %arg11[%c0_59, %c0_60] : memref<1x128xf32, #tpu.memory_space<vmem>>, vector<1x128xf32>
    %479 = vector.broadcast %478 : vector<1x128xf32> to vector<32x128xf32>
    %480 = arith.addf %477, %479 : vector<32x128xf32>
    %481 = arith.truncf %480 : vector<32x128xf32> to vector<32x128xbf16>
    %cst_61 = arith.constant 5.000000e-01 : bf16
    %482 = vector.broadcast %cst_61 : bf16 to vector<32x128xbf16>
    %483 = arith.mulf %482, %481 : vector<32x128xbf16>
    %cst_62 = arith.constant 4.467770e-02 : bf16
    %484 = vector.broadcast %cst_62 : bf16 to vector<32x128xbf16>
    %485 = arith.mulf %484, %481 : vector<32x128xbf16>
    %486 = arith.mulf %485, %481 : vector<32x128xbf16>
    %487 = arith.mulf %486, %481 : vector<32x128xbf16>
    %488 = arith.addf %481, %487 : vector<32x128xbf16>
    %cst_63 = arith.constant 7.968750e-01 : bf16
    %489 = vector.broadcast %cst_63 : bf16 to vector<32x128xbf16>
    %490 = arith.mulf %489, %488 : vector<32x128xbf16>
    %491 = math.tanh %490 : vector<32x128xbf16>
    %cst_64 = arith.constant 1.000000e+00 : bf16
    %492 = vector.broadcast %cst_64 : bf16 to vector<32x128xbf16>
    %493 = arith.addf %492, %491 : vector<32x128xbf16>
    %494 = arith.mulf %483, %493 : vector<32x128xbf16>
    %c0_65 = arith.constant 0 : index
    %c0_66 = arith.constant 0 : index
    %495 = vector.load %arg12[%c0_65, %c0_66] : memref<128x32xbf16, #tpu.memory_space<vmem>>, vector<128x32xbf16>
    %cst_67 = arith.constant dense<0.000000e+00> : vector<32x32xf32>
    %496 = tpu.matmul %494, %495, %cst_67 {dimension_numbers = #tpu.dot_dimension_numbers<[1], [0], [0], [1], [0, 0, 1, 1], [], []>} : vector<32x128xbf16>, vector<128x32xbf16>, vector<32x32xf32> -> vector<32x32xf32>
    %c0_68 = arith.constant 0 : index
    %c0_69 = arith.constant 0 : index
    %497 = vector.load %arg13[%c0_68, %c0_69] : memref<1x32xf32, #tpu.memory_space<vmem>>, vector<1x32xf32>
    %498 = vector.broadcast %497 : vector<1x32xf32> to vector<32x32xf32>
    %499 = arith.addf %496, %498 : vector<32x32xf32>
    %500 = arith.addf %499, %474 : vector<32x32xf32>
    %c0_70 = arith.constant 0 : index
    %c0_71 = arith.constant 0 : index
    %501 = vector.load %arg14[%c0_70, %c0_71] : memref<1x32xf32, #tpu.memory_space<vmem>>, vector<1x32xf32>
    %c0_72 = arith.constant 0 : index
    %c0_73 = arith.constant 0 : index
    %502 = vector.load %arg15[%c0_72, %c0_73] : memref<1x32xf32, #tpu.memory_space<vmem>>, vector<1x32xf32>
    %cst_74 = arith.constant dense<0.000000e+00> : vector<32xf32>
    %503 = vector.multi_reduction <add>, %500, %cst_74 [1] : vector<32x32xf32> to vector<32xf32>
    %504 = vector.shape_cast %503 : vector<32xf32> to vector<32x1xf32>
    %cst_75 = arith.constant 3.200000e+01 : f32
    %505 = vector.broadcast %cst_75 : f32 to vector<32x1xf32>
    %506 = arith.divf %504, %505 : vector<32x1xf32>
    %507 = vector.broadcast %506 : vector<32x1xf32> to vector<32x32xf32>
    %508 = arith.subf %500, %507 : vector<32x32xf32>
    %509 = arith.mulf %508, %508 : vector<32x32xf32>
    %cst_76 = arith.constant dense<0.000000e+00> : vector<32xf32>
    %510 = vector.multi_reduction <add>, %509, %cst_76 [1] : vector<32x32xf32> to vector<32xf32>
    %511 = vector.shape_cast %510 : vector<32xf32> to vector<32x1xf32>
    %cst_77 = arith.constant 3.200000e+01 : f32
    %512 = vector.broadcast %cst_77 : f32 to vector<32x1xf32>
    %513 = arith.divf %511, %512 : vector<32x1xf32>
    %514 = vector.broadcast %506 : vector<32x1xf32> to vector<32x32xf32>
    %515 = arith.subf %500, %514 : vector<32x32xf32>
    %cst_78 = arith.constant 9.99999996E-13 : f32
    %516 = vector.broadcast %cst_78 : f32 to vector<32x1xf32>
    %517 = arith.addf %513, %516 : vector<32x1xf32>
    %518 = math.rsqrt %517 : vector<32x1xf32>
    %519 = vector.broadcast %518 : vector<32x1xf32> to vector<32x32xf32>
    %520 = arith.mulf %515, %519 : vector<32x32xf32>
    %521 = vector.broadcast %501 : vector<1x32xf32> to vector<32x32xf32>
    %522 = arith.mulf %520, %521 : vector<32x32xf32>
    %523 = vector.broadcast %502 : vector<1x32xf32> to vector<32x32xf32>
    %524 = arith.addf %522, %523 : vector<32x32xf32>
    %525 = arith.truncf %524 : vector<32x32xf32> to vector<32x32xbf16>
    %526 = vector.shape_cast %525 : vector<32x32xbf16> to vector<4x8x32xbf16>
    %c0_79 = arith.constant 0 : index
    %c0_80 = arith.constant 0 : index
    %c0_81 = arith.constant 0 : index
    %c0_82 = arith.constant 0 : index
    %527 = vector.load %arg16[%c0_79, %c0_80, %c0_81, %c0_82] : memref<1x4x8x32xbf16, #tpu.memory_space<vmem>>, vector<1x4x8x32xbf16>
    %528 = vector.shape_cast %527 : vector<1x4x8x32xbf16> to vector<4x8x32xbf16>
    %529 = vector.shape_cast %526 : vector<4x8x32xbf16> to vector<1x4x8x32xbf16>
    tpu.vector_store %arg16[%c0_79, %c0_80, %c0_81, %c0_82], %529 {strides = array<i32>} : memref<1x4x8x32xbf16, #tpu.memory_space<vmem>>, vector<1x4x8x32xbf16>,
    return
  }
  func.func @transform_0(%arg0: i32, %arg1: i32) -> (i32, i32, i32, i32) {
    %c0_i32 = arith.constant 0 : i32
    %c0_i32_0 = arith.constant 0 : i32
    %c0_i32_1 = arith.constant 0 : i32
    return %arg0, %c0_i32, %arg1, %c0_i32_0 : i32, i32, i32, i32
  }
  func.func @transform_1(%arg0: i32, %arg1: i32) -> (i32, i32, i32) {
    %c0_i32 = arith.constant 0 : i32
    %c0_i32_0 = arith.constant 0 : i32
    return %arg0, %arg1, %c0_i32 : i32, i32, i32
  }
  func.func @transform_2(%arg0: i32, %arg1: i32) -> (i32, i32) {
    %c0_i32 = arith.constant 0 : i32
    %c0_i32_0 = arith.constant 0 : i32
    %c0_i32_1 = arith.constant 0 : i32
    return %c0_i32, %c0_i32_0 : i32, i32
  }
  func.func @transform_3(%arg0: i32, %arg1: i32) -> (i32, i32) {
    %c0_i32 = arith.constant 0 : i32
    %c0_i32_0 = arith.constant 0 : i32
    %c0_i32_1 = arith.constant 0 : i32
    return %c0_i32, %c0_i32_0 : i32, i32
  }
  func.func @transform_4(%arg0: i32, %arg1: i32) -> (i32, i32) {
    %c0_i32 = arith.constant 0 : i32
    %c0_i32_0 = arith.constant 0 : i32
    %c0_i32_1 = arith.constant 0 : i32
    return %c0_i32, %c0_i32_0 : i32, i32
  }
  func.func @transform_5(%arg0: i32, %arg1: i32) -> (i32, i32) {
    %c0_i32 = arith.constant 0 : i32
    %c0_i32_0 = arith.constant 0 : i32
    %c0_i32_1 = arith.constant 0 : i32
    return %c0_i32, %c0_i32_0 : i32, i32
  }
  func.func @transform_6(%arg0: i32, %arg1: i32) -> (i32, i32) {
    %c0_i32 = arith.constant 0 : i32
    %c0_i32_0 = arith.constant 0 : i32
    %c0_i32_1 = arith.constant 0 : i32
    return %c0_i32, %c0_i32_0 : i32, i32
  }
  func.func @transform_7(%arg0: i32, %arg1: i32) -> (i32, i32) {
    %c0_i32 = arith.constant 0 : i32
    %c0_i32_0 = arith.constant 0 : i32
    %c0_i32_1 = arith.constant 0 : i32
    return %c0_i32, %c0_i32_0 : i32, i32
  }
  func.func @transform_8(%arg0: i32, %arg1: i32) -> (i32, i32) {
    %c0_i32 = arith.constant 0 : i32
    %c0_i32_0 = arith.constant 0 : i32
    %c0_i32_1 = arith.constant 0 : i32
    return %c0_i32, %c0_i32_0 : i32, i32
  }
  func.func @transform_9(%arg0: i32, %arg1: i32) -> (i32, i32) {
    %c0_i32 = arith.constant 0 : i32
    %c0_i32_0 = arith.constant 0 : i32
    %c0_i32_1 = arith.constant 0 : i32
    return %c0_i32, %c0_i32_0 : i32, i32
  }
  func.func @transform_10(%arg0: i32, %arg1: i32) -> (i32, i32) {
    %c0_i32 = arith.constant 0 : i32
    %c0_i32_0 = arith.constant 0 : i32
    %c0_i32_1 = arith.constant 0 : i32
    return %c0_i32, %c0_i32_0 : i32, i32
  }
  func.func @transform_11(%arg0: i32, %arg1: i32) -> (i32, i32) {
    %c0_i32 = arith.constant 0 : i32
    %c0_i32_0 = arith.constant 0 : i32
    %c0_i32_1 = arith.constant 0 : i32
    return %c0_i32, %c0_i32_0 : i32, i32
  }
  func.func @transform_12(%arg0: i32, %arg1: i32) -> (i32, i32) {
    %c0_i32 = arith.constant 0 : i32
    %c0_i32_0 = arith.constant 0 : i32
    %c0_i32_1 = arith.constant 0 : i32
    return %c0_i32, %c0_i32_0 : i32, i32
  }
  func.func @transform_13(%arg0: i32, %arg1: i32) -> (i32, i32) {
    %c0_i32 = arith.constant 0 : i32
    %c0_i32_0 = arith.constant 0 : i32
    %c0_i32_1 = arith.constant 0 : i32
    return %c0_i32, %c0_i32_0 : i32, i32
  }
  func.func @transform_14(%arg0: i32, %arg1: i32) -> (i32, i32, i32, i32) {
    %c0_i32 = arith.constant 0 : i32
    %c0_i32_0 = arith.constant 0 : i32
    %c0_i32_1 = arith.constant 0 : i32
    return %arg0, %c0_i32, %arg1, %c0_i32_0 : i32, i32, i32, i32
  }
}

module attributes {stable_mosaic.version = 11 : i64} {
  func.func @kernel(%arg0: i32, %arg1: i32, %arg2: memref<1x4x8x32xbf16, #tpu.memory_space<vmem>>, %arg3: memref<1x8x4xf32, #tpu.memory_space<vmem>>, %arg4: memref<32x96xbf16, #tpu.memory_space<vmem>>, %arg5: memref<1x96xf32, #tpu.memory_space<vmem>>, %arg6: memref<32x32xbf16, #tpu.memory_space<vmem>>, %arg7: memref<1x32xf32, #tpu.memory_space<vmem>>, %arg8: memref<1x32xf32, #tpu.memory_space<vmem>>, %arg9: memref<1x32xf32, #tpu.memory_space<vmem>>, %arg10: memref<32x128xbf16, #tpu.memory_space<vmem>>, %arg11: memref<1x128xf32, #tpu.memory_space<vmem>>, %arg12: memref<128x32xbf16, #tpu.memory_space<vmem>>, %arg13: memref<1x32xf32, #tpu.memory_space<vmem>>, %arg14: memref<1x32xf32, #tpu.memory_space<vmem>>, %arg15: memref<1x32xf32, #tpu.memory_space<vmem>>, %arg16: memref<1x4x8x32xbf16, #tpu.memory_space<vmem>>) attributes {dimension_semantics = [#tpu.dimension_semantics<parallel>, #tpu.dimension_semantics<parallel>], iteration_bounds = array<i64: 2, 1>, scalar_prefetch = 0 : i64, scratch_operands = 0 : i64, tpu.core_type = #tpu.core_type<tc>, window_params = [{transform_indices = @transform_0, window_bounds = array<i64: 1, 4, 8, 32>}, {transform_indices = @transform_1, window_bounds = array<i64: 1, 8, 4>}, {pipeline_mode = #tpu.pipeline_mode<synchronous>, transform_indices = @transform_2, window_bounds = array<i64: 32, 96>}, {pipeline_mode = #tpu.pipeline_mode<synchronous>, transform_indices = @transform_3, window_bounds = array<i64: 1, 96>}, {pipeline_mode = #tpu.pipeline_mode<synchronous>, transform_indices = @transform_4, window_bounds = array<i64: 32, 32>}, {pipeline_mode = #tpu.pipeline_mode<synchronous>, transform_indices = @transform_5, window_bounds = array<i64: 1, 32>}, {pipeline_mode = #tpu.pipeline_mode<synchronous>, transform_indices = @transform_6, window_bounds = array<i64: 1, 32>}, {pipeline_mode = #tpu.pipeline_mode<synchronous>, transform_indices = @transform_7, window_bounds = array<i64: 1, 32>}, {pipeline_mode = #tpu.pipeline_mode<synchronous>, transform_indices = @transform_8, window_bounds = array<i64: 32, 128>}, {pipeline_mode = #tpu.pipeline_mode<synchronous>, transform_indices = @transform_9, window_bounds = array<i64: 1, 128>}, {pipeline_mode = #tpu.pipeline_mode<synchronous>, transform_indices = @transform_10, window_bounds = array<i64: 128, 32>}, {pipeline_mode = #tpu.pipeline_mode<synchronous>, transform_indices = @transform_11, window_bounds = array<i64: 1, 32>}, {pipeline_mode = #tpu.pipeline_mode<synchronous>, transform_indices = @transform_12, window_bounds = array<i64: 1, 32>}, {pipeline_mode = #tpu.pipeline_mode<synchronous>, transform_indices = @transform_13, window_bounds = array<i64: 1, 32>}, {transform_indices = @transform_14, window_bounds = array<i64: 1, 4, 8, 32>}]} {
    %c0 = arith.constant 0 : index
    %c0_0 = arith.constant 0 : index
    %c0_1 = arith.constant 0 : index
    %c0_2 = arith.constant 0 : index
    %0 = vector.load %arg2[%c0, %c0_0, %c0_1, %c0_2] : memref<1x4x8x32xbf16, #tpu.memory_space<vmem>>, vector<1x4x8x32xbf16>
    %1 = vector.shape_cast %0 : vector<1x4x8x32xbf16> to vector<4x8x32xbf16>
    %2 = vector.shape_cast %1 : vector<4x8x32xbf16> to vector<32x32xbf16>
    %3 = arith.extf %2 : vector<32x32xbf16> to vector<32x32xf32>
    %c0_3 = arith.constant 0 : index
    %c0_4 = arith.constant 0 : index
    %c0_5 = arith.constant 0 : index
    %4 = vector.load %arg3[%c0_3, %c0_4, %c0_5] : memref<1x8x4xf32, #tpu.memory_space<vmem>>, vector<1x8x4xf32>
    %5 = vector.shape_cast %4 : vector<1x8x4xf32> to vector<8x4xf32>
    %c0_6 = arith.constant 0 : index
    %c0_7 = arith.constant 0 : index
    %6 = vector.load %arg4[%c0_6, %c0_7] : memref<32x96xbf16, #tpu.memory_space<vmem>>, vector<32x96xbf16>
    %cst = arith.constant dense<0.000000e+00> : vector<32x96xf32>
    %7 = tpu.matmul %2, %6, %cst {dimension_numbers = #tpu.dot_dimension_numbers<[1], [0], [0], [1], [0, 0, 1, 1], [], []>} : vector<32x32xbf16>, vector<32x96xbf16>, vector<32x96xf32> -> vector<32x96xf32>
    %c0_8 = arith.constant 0 : index
    %c0_9 = arith.constant 0 : index
    %8 = vector.load %arg5[%c0_8, %c0_9] : memref<1x96xf32, #tpu.memory_space<vmem>>, vector<1x96xf32>
    %9 = vector.broadcast %8 : vector<1x96xf32> to vector<32x96xf32>
    %10 = arith.addf %7, %9 : vector<32x96xf32>
    %11 = vector.extract_strided_slice %10 {offsets = [0, 0], sizes = [32, 16], strides = [1, 1]} : vector<32x96xf32> to vector<32x16xf32>
    %12 = vector.extract_strided_slice %10 {offsets = [0, 32], sizes = [32, 16], strides = [1, 1]} : vector<32x96xf32> to vector<32x16xf32>
    %13 = vector.extract_strided_slice %10 {offsets = [0, 64], sizes = [32, 16], strides = [1, 1]} : vector<32x96xf32> to vector<32x16xf32>
    %14 = vector.extract_strided_slice %11 {offsets = [0, 0], sizes = [8, 16], strides = [1, 1]} : vector<32x16xf32> to vector<8x16xf32>
    %15 = vector.extract_strided_slice %11 {offsets = [8, 0], sizes = [8, 16], strides = [1, 1]} : vector<32x16xf32> to vector<8x16xf32>
    %16 = vector.extract_strided_slice %11 {offsets = [16, 0], sizes = [8, 16], strides = [1, 1]} : vector<32x16xf32> to vector<8x16xf32>
    %17 = vector.extract_strided_slice %11 {offsets = [24, 0], sizes = [8, 16], strides = [1, 1]} : vector<32x16xf32> to vector<8x16xf32>
    %18 = vector.extract_strided_slice %12 {offsets = [0, 0], sizes = [8, 16], strides = [1, 1]} : vector<32x16xf32> to vector<8x16xf32>
    %19 = vector.extract_strided_slice %12 {offsets = [8, 0], sizes = [8, 16], strides = [1, 1]} : vector<32x16xf32> to vector<8x16xf32>
    %20 = vector.extract_strided_slice %12 {offsets = [16, 0], sizes = [8, 16], strides = [1, 1]} : vector<32x16xf32> to vector<8x16xf32>
    %21 = vector.extract_strided_slice %12 {offsets = [24, 0], sizes = [8, 16], strides = [1, 1]} : vector<32x16xf32> to vector<8x16xf32>
    %22 = vector.extract_strided_slice %13 {offsets = [0, 0], sizes = [8, 16], strides = [1, 1]} : vector<32x16xf32> to vector<8x16xf32>
    %23 = vector.extract_strided_slice %13 {offsets = [8, 0], sizes = [8, 16], strides = [1, 1]} : vector<32x16xf32> to vector<8x16xf32>
    %24 = vector.extract_strided_slice %13 {offsets = [16, 0], sizes = [8, 16], strides = [1, 1]} : vector<32x16xf32> to vector<8x16xf32>
    %25 = vector.extract_strided_slice %13 {offsets = [24, 0], sizes = [8, 16], strides = [1, 1]} : vector<32x16xf32> to vector<8x16xf32>
    %26 = arith.mulf %14, %18 : vector<8x16xf32>
    %cst_10 = arith.constant dense<0.000000e+00> : vector<8xf32>
    %27 = vector.multi_reduction <add>, %26, %cst_10 [1] : vector<8x16xf32> to vector<8xf32>
    %28 = vector.shape_cast %27 : vector<8xf32> to vector<8x1xf32>
    %29 = vector.extract_strided_slice %5 {offsets = [0, 0], sizes = [8, 1], strides = [1, 1]} : vector<8x4xf32> to vector<8x1xf32>
    %30 = arith.addf %28, %29 : vector<8x1xf32>
    %31 = arith.mulf %14, %19 : vector<8x16xf32>
    %cst_11 = arith.constant dense<0.000000e+00> : vector<8xf32>
    %32 = vector.multi_reduction <add>, %31, %cst_11 [1] : vector<8x16xf32> to vector<8xf32>
    %33 = vector.shape_cast %32 : vector<8xf32> to vector<8x1xf32>
    %34 = vector.extract_strided_slice %5 {offsets = [0, 1], sizes = [8, 1], strides = [1, 1]} : vector<8x4xf32> to vector<8x1xf32>
    %35 = arith.addf %33, %34 : vector<8x1xf32>
    %36 = arith.mulf %14, %20 : vector<8x16xf32>
    %cst_12 = arith.constant dense<0.000000e+00> : vector<8xf32>
    %37 = vector.multi_reduction <add>, %36, %cst_12 [1] : vector<8x16xf32> to vector<8xf32>
    %38 = vector.shape_cast %37 : vector<8xf32> to vector<8x1xf32>
    %39 = vector.extract_strided_slice %5 {offsets = [0, 2], sizes = [8, 1], strides = [1, 1]} : vector<8x4xf32> to vector<8x1xf32>
    %40 = arith.addf %38, %39 : vector<8x1xf32>
    %41 = arith.mulf %14, %21 : vector<8x16xf32>
    %cst_13 = arith.constant dense<0.000000e+00> : vector<8xf32>
    %42 = vector.multi_reduction <add>, %41, %cst_13 [1] : vector<8x16xf32> to vector<8xf32>
    %43 = vector.shape_cast %42 : vector<8xf32> to vector<8x1xf32>
    %44 = vector.extract_strided_slice %5 {offsets = [0, 3], sizes = [8, 1], strides = [1, 1]} : vector<8x4xf32> to vector<8x1xf32>
    %45 = arith.addf %43, %44 : vector<8x1xf32>
    %46 = arith.maximumf %30, %35 : vector<8x1xf32>
    %47 = arith.maximumf %46, %40 : vector<8x1xf32>
    %48 = arith.maximumf %47, %45 : vector<8x1xf32>
    %49 = arith.subf %30, %48 : vector<8x1xf32>
    %50 = math.exp %49 : vector<8x1xf32>
    %51 = arith.subf %35, %48 : vector<8x1xf32>
    %52 = math.exp %51 : vector<8x1xf32>
    %53 = arith.subf %40, %48 : vector<8x1xf32>
    %54 = math.exp %53 : vector<8x1xf32>
    %55 = arith.subf %45, %48 : vector<8x1xf32>
    %56 = math.exp %55 : vector<8x1xf32>
    %57 = arith.addf %50, %52 : vector<8x1xf32>
    %58 = arith.addf %57, %54 : vector<8x1xf32>
    %59 = arith.addf %58, %56 : vector<8x1xf32>
    %60 = tpu.reciprocal %59 {approx = true} : vector<8x1xf32> -> vector<8x1xf32>
    %61 = arith.mulf %50, %60 : vector<8x1xf32>
    %62 = vector.broadcast %61 : vector<8x1xf32> to vector<8x16xf32>
    %63 = arith.mulf %62, %22 : vector<8x16xf32>
    %64 = arith.mulf %52, %60 : vector<8x1xf32>
    %65 = vector.broadcast %64 : vector<8x1xf32> to vector<8x16xf32>
    %66 = arith.mulf %65, %23 : vector<8x16xf32>
    %67 = arith.addf %63, %66 : vector<8x16xf32>
    %68 = arith.mulf %54, %60 : vector<8x1xf32>
    %69 = vector.broadcast %68 : vector<8x1xf32> to vector<8x16xf32>
    %70 = arith.mulf %69, %24 : vector<8x16xf32>
    %71 = arith.addf %67, %70 : vector<8x16xf32>
    %72 = arith.mulf %56, %60 : vector<8x1xf32>
    %73 = vector.broadcast %72 : vector<8x1xf32> to vector<8x16xf32>
    %74 = arith.mulf %73, %25 : vector<8x16xf32>
    %75 = arith.addf %71, %74 : vector<8x16xf32>
    %76 = arith.mulf %15, %18 : vector<8x16xf32>
    %cst_14 = arith.constant dense<0.000000e+00> : vector<8xf32>
    %77 = vector.multi_reduction <add>, %76, %cst_14 [1] : vector<8x16xf32> to vector<8xf32>
    %78 = vector.shape_cast %77 : vector<8xf32> to vector<8x1xf32>
    %79 = vector.extract_strided_slice %5 {offsets = [0, 0], sizes = [8, 1], strides = [1, 1]} : vector<8x4xf32> to vector<8x1xf32>
    %80 = arith.addf %78, %79 : vector<8x1xf32>
    %81 = arith.mulf %15, %19 : vector<8x16xf32>
    %cst_15 = arith.constant dense<0.000000e+00> : vector<8xf32>
    %82 = vector.multi_reduction <add>, %81, %cst_15 [1] : vector<8x16xf32> to vector<8xf32>
    %83 = vector.shape_cast %82 : vector<8xf32> to vector<8x1xf32>
    %84 = vector.extract_strided_slice %5 {offsets = [0, 1], sizes = [8, 1], strides = [1, 1]} : vector<8x4xf32> to vector<8x1xf32>
    %85 = arith.addf %83, %84 : vector<8x1xf32>
    %86 = arith.mulf %15, %20 : vector<8x16xf32>
    %cst_16 = arith.constant dense<0.000000e+00> : vector<8xf32>
    %87 = vector.multi_reduction <add>, %86, %cst_16 [1] : vector<8x16xf32> to vector<8xf32>
    %88 = vector.shape_cast %87 : vector<8xf32> to vector<8x1xf32>
    %89 = vector.extract_strided_slice %5 {offsets = [0, 2], sizes = [8, 1], strides = [1, 1]} : vector<8x4xf32> to vector<8x1xf32>
    %90 = arith.addf %88, %89 : vector<8x1xf32>
    %91 = arith.mulf %15, %21 : vector<8x16xf32>
    %cst_17 = arith.constant dense<0.000000e+00> : vector<8xf32>
    %92 = vector.multi_reduction <add>, %91, %cst_17 [1] : vector<8x16xf32> to vector<8xf32>
    %93 = vector.shape_cast %92 : vector<8xf32> to vector<8x1xf32>
    %94 = vector.extract_strided_slice %5 {offsets = [0, 3], sizes = [8, 1], strides = [1, 1]} : vector<8x4xf32> to vector<8x1xf32>
    %95 = arith.addf %93, %94 : vector<8x1xf32>
    %96 = arith.maximumf %80, %85 : vector<8x1xf32>
    %97 = arith.maximumf %96, %90 : vector<8x1xf32>
    %98 = arith.maximumf %97, %95 : vector<8x1xf32>
    %99 = arith.subf %80, %98 : vector<8x1xf32>
    %100 = math.exp %99 : vector<8x1xf32>
    %101 = arith.subf %85, %98 : vector<8x1xf32>
    %102 = math.exp %101 : vector<8x1xf32>
    %103 = arith.subf %90, %98 : vector<8x1xf32>
    %104 = math.exp %103 : vector<8x1xf32>
    %105 = arith.subf %95, %98 : vector<8x1xf32>
    %106 = math.exp %105 : vector<8x1xf32>
    %107 = arith.addf %100, %102 : vector<8x1xf32>
    %108 = arith.addf %107, %104 : vector<8x1xf32>
    %109 = arith.addf %108, %106 : vector<8x1xf32>
    %110 = tpu.reciprocal %109 {approx = true} : vector<8x1xf32> -> vector<8x1xf32>
    %111 = arith.mulf %100, %110 : vector<8x1xf32>
    %112 = vector.broadcast %111 : vector<8x1xf32> to vector<8x16xf32>
    %113 = arith.mulf %112, %22 : vector<8x16xf32>
    %114 = arith.mulf %102, %110 : vector<8x1xf32>
    %115 = vector.broadcast %114 : vector<8x1xf32> to vector<8x16xf32>
    %116 = arith.mulf %115, %23 : vector<8x16xf32>
    %117 = arith.addf %113, %116 : vector<8x16xf32>
    %118 = arith.mulf %104, %110 : vector<8x1xf32>
    %119 = vector.broadcast %118 : vector<8x1xf32> to vector<8x16xf32>
    %120 = arith.mulf %119, %24 : vector<8x16xf32>
    %121 = arith.addf %117, %120 : vector<8x16xf32>
    %122 = arith.mulf %106, %110 : vector<8x1xf32>
    %123 = vector.broadcast %122 : vector<8x1xf32> to vector<8x16xf32>
    %124 = arith.mulf %123, %25 : vector<8x16xf32>
    %125 = arith.addf %121, %124 : vector<8x16xf32>
    %126 = arith.mulf %16, %18 : vector<8x16xf32>
    %cst_18 = arith.constant dense<0.000000e+00> : vector<8xf32>
    %127 = vector.multi_reduction <add>, %126, %cst_18 [1] : vector<8x16xf32> to vector<8xf32>
    %128 = vector.shape_cast %127 : vector<8xf32> to vector<8x1xf32>
    %129 = vector.extract_strided_slice %5 {offsets = [0, 0], sizes = [8, 1], strides = [1, 1]} : vector<8x4xf32> to vector<8x1xf32>
    %130 = arith.addf %128, %129 : vector<8x1xf32>
    %131 = arith.mulf %16, %19 : vector<8x16xf32>
    %cst_19 = arith.constant dense<0.000000e+00> : vector<8xf32>
    %132 = vector.multi_reduction <add>, %131, %cst_19 [1] : vector<8x16xf32> to vector<8xf32>
    %133 = vector.shape_cast %132 : vector<8xf32> to vector<8x1xf32>
    %134 = vector.extract_strided_slice %5 {offsets = [0, 1], sizes = [8, 1], strides = [1, 1]} : vector<8x4xf32> to vector<8x1xf32>
    %135 = arith.addf %133, %134 : vector<8x1xf32>
    %136 = arith.mulf %16, %20 : vector<8x16xf32>
    %cst_20 = arith.constant dense<0.000000e+00> : vector<8xf32>
    %137 = vector.multi_reduction <add>, %136, %cst_20 [1] : vector<8x16xf32> to vector<8xf32>
    %138 = vector.shape_cast %137 : vector<8xf32> to vector<8x1xf32>
    %139 = vector.extract_strided_slice %5 {offsets = [0, 2], sizes = [8, 1], strides = [1, 1]} : vector<8x4xf32> to vector<8x1xf32>
    %140 = arith.addf %138, %139 : vector<8x1xf32>
    %141 = arith.mulf %16, %21 : vector<8x16xf32>
    %cst_21 = arith.constant dense<0.000000e+00> : vector<8xf32>
    %142 = vector.multi_reduction <add>, %141, %cst_21 [1] : vector<8x16xf32> to vector<8xf32>
    %143 = vector.shape_cast %142 : vector<8xf32> to vector<8x1xf32>
    %144 = vector.extract_strided_slice %5 {offsets = [0, 3], sizes = [8, 1], strides = [1, 1]} : vector<8x4xf32> to vector<8x1xf32>
    %145 = arith.addf %143, %144 : vector<8x1xf32>
    %146 = arith.maximumf %130, %135 : vector<8x1xf32>
    %147 = arith.maximumf %146, %140 : vector<8x1xf32>
    %148 = arith.maximumf %147, %145 : vector<8x1xf32>
    %149 = arith.subf %130, %148 : vector<8x1xf32>
    %150 = math.exp %149 : vector<8x1xf32>
    %151 = arith.subf %135, %148 : vector<8x1xf32>
    %152 = math.exp %151 : vector<8x1xf32>
    %153 = arith.subf %140, %148 : vector<8x1xf32>
    %154 = math.exp %153 : vector<8x1xf32>
    %155 = arith.subf %145, %148 : vector<8x1xf32>
    %156 = math.exp %155 : vector<8x1xf32>
    %157 = arith.addf %150, %152 : vector<8x1xf32>
    %158 = arith.addf %157, %154 : vector<8x1xf32>
    %159 = arith.addf %158, %156 : vector<8x1xf32>
    %160 = tpu.reciprocal %159 {approx = true} : vector<8x1xf32> -> vector<8x1xf32>
    %161 = arith.mulf %150, %160 : vector<8x1xf32>
    %162 = vector.broadcast %161 : vector<8x1xf32> to vector<8x16xf32>
    %163 = arith.mulf %162, %22 : vector<8x16xf32>
    %164 = arith.mulf %152, %160 : vector<8x1xf32>
    %165 = vector.broadcast %164 : vector<8x1xf32> to vector<8x16xf32>
    %166 = arith.mulf %165, %23 : vector<8x16xf32>
    %167 = arith.addf %163, %166 : vector<8x16xf32>
    %168 = arith.mulf %154, %160 : vector<8x1xf32>
    %169 = vector.broadcast %168 : vector<8x1xf32> to vector<8x16xf32>
    %170 = arith.mulf %169, %24 : vector<8x16xf32>
    %171 = arith.addf %167, %170 : vector<8x16xf32>
    %172 = arith.mulf %156, %160 : vector<8x1xf32>
    %173 = vector.broadcast %172 : vector<8x1xf32> to vector<8x16xf32>
    %174 = arith.mulf %173, %25 : vector<8x16xf32>
    %175 = arith.addf %171, %174 : vector<8x16xf32>
    %176 = arith.mulf %17, %18 : vector<8x16xf32>
    %cst_22 = arith.constant dense<0.000000e+00> : vector<8xf32>
    %177 = vector.multi_reduction <add>, %176, %cst_22 [1] : vector<8x16xf32> to vector<8xf32>
    %178 = vector.shape_cast %177 : vector<8xf32> to vector<8x1xf32>
    %179 = vector.extract_strided_slice %5 {offsets = [0, 0], sizes = [8, 1], strides = [1, 1]} : vector<8x4xf32> to vector<8x1xf32>
    %180 = arith.addf %178, %179 : vector<8x1xf32>
    %181 = arith.mulf %17, %19 : vector<8x16xf32>
    %cst_23 = arith.constant dense<0.000000e+00> : vector<8xf32>
    %182 = vector.multi_reduction <add>, %181, %cst_23 [1] : vector<8x16xf32> to vector<8xf32>
    %183 = vector.shape_cast %182 : vector<8xf32> to vector<8x1xf32>
    %184 = vector.extract_strided_slice %5 {offsets = [0, 1], sizes = [8, 1], strides = [1, 1]} : vector<8x4xf32> to vector<8x1xf32>
    %185 = arith.addf %183, %184 : vector<8x1xf32>
    %186 = arith.mulf %17, %20 : vector<8x16xf32>
    %cst_24 = arith.constant dense<0.000000e+00> : vector<8xf32>
    %187 = vector.multi_reduction <add>, %186, %cst_24 [1] : vector<8x16xf32> to vector<8xf32>
    %188 = vector.shape_cast %187 : vector<8xf32> to vector<8x1xf32>
    %189 = vector.extract_strided_slice %5 {offsets = [0, 2], sizes = [8, 1], strides = [1, 1]} : vector<8x4xf32> to vector<8x1xf32>
    %190 = arith.addf %188, %189 : vector<8x1xf32>
    %191 = arith.mulf %17, %21 : vector<8x16xf32>
    %cst_25 = arith.constant dense<0.000000e+00> : vector<8xf32>
    %192 = vector.multi_reduction <add>, %191, %cst_25 [1] : vector<8x16xf32> to vector<8xf32>
    %193 = vector.shape_cast %192 : vector<8xf32> to vector<8x1xf32>
    %194 = vector.extract_strided_slice %5 {offsets = [0, 3], sizes = [8, 1], strides = [1, 1]} : vector<8x4xf32> to vector<8x1xf32>
    %195 = arith.addf %193, %194 : vector<8x1xf32>
    %196 = arith.maximumf %180, %185 : vector<8x1xf32>
    %197 = arith.maximumf %196, %190 : vector<8x1xf32>
    %198 = arith.maximumf %197, %195 : vector<8x1xf32>
    %199 = arith.subf %180, %198 : vector<8x1xf32>
    %200 = math.exp %199 : vector<8x1xf32>
    %201 = arith.subf %185, %198 : vector<8x1xf32>
    %202 = math.exp %201 : vector<8x1xf32>
    %203 = arith.subf %190, %198 : vector<8x1xf32>
    %204 = math.exp %203 : vector<8x1xf32>
    %205 = arith.subf %195, %198 : vector<8x1xf32>
    %206 = math.exp %205 : vector<8x1xf32>
    %207 = arith.addf %200, %202 : vector<8x1xf32>
    %208 = arith.addf %207, %204 : vector<8x1xf32>
    %209 = arith.addf %208, %206 : vector<8x1xf32>
    %210 = tpu.reciprocal %209 {approx = true} : vector<8x1xf32> -> vector<8x1xf32>
    %211 = arith.mulf %200, %210 : vector<8x1xf32>
    %212 = vector.broadcast %211 : vector<8x1xf32> to vector<8x16xf32>
    %213 = arith.mulf %212, %22 : vector<8x16xf32>
    %214 = arith.mulf %202, %210 : vector<8x1xf32>
    %215 = vector.broadcast %214 : vector<8x1xf32> to vector<8x16xf32>
    %216 = arith.mulf %215, %23 : vector<8x16xf32>
    %217 = arith.addf %213, %216 : vector<8x16xf32>
    %218 = arith.mulf %204, %210 : vector<8x1xf32>
    %219 = vector.broadcast %218 : vector<8x1xf32> to vector<8x16xf32>
    %220 = arith.mulf %219, %24 : vector<8x16xf32>
    %221 = arith.addf %217, %220 : vector<8x16xf32>
    %222 = arith.mulf %206, %210 : vector<8x1xf32>
    %223 = vector.broadcast %222 : vector<8x1xf32> to vector<8x16xf32>
    %224 = arith.mulf %223, %25 : vector<8x16xf32>
    %225 = arith.addf %221, %224 : vector<8x16xf32>
    %226 = tpu.concatenate %75, %125, %175, %225 in 0 : vector<8x16xf32>, vector<8x16xf32>, vector<8x16xf32>, vector<8x16xf32> -> vector<32x16xf32>
    %227 = vector.extract_strided_slice %10 {offsets = [0, 16], sizes = [32, 16], strides = [1, 1]} : vector<32x96xf32> to vector<32x16xf32>
    %228 = vector.extract_strided_slice %10 {offsets = [0, 48], sizes = [32, 16], strides = [1, 1]} : vector<32x96xf32> to vector<32x16xf32>
    %229 = vector.extract_strided_slice %10 {offsets = [0, 80], sizes = [32, 16], strides = [1, 1]} : vector<32x96xf32> to vector<32x16xf32>
    %230 = vector.extract_strided_slice %227 {offsets = [0, 0], sizes = [8, 16], strides = [1, 1]} : vector<32x16xf32> to vector<8x16xf32>
    %231 = vector.extract_strided_slice %227 {offsets = [8, 0], sizes = [8, 16], strides = [1, 1]} : vector<32x16xf32> to vector<8x16xf32>
    %232 = vector.extract_strided_slice %227 {offsets = [16, 0], sizes = [8, 16], strides = [1, 1]} : vector<32x16xf32> to vector<8x16xf32>
    %233 = vector.extract_strided_slice %227 {offsets = [24, 0], sizes = [8, 16], strides = [1, 1]} : vector<32x16xf32> to vector<8x16xf32>
    %234 = vector.extract_strided_slice %228 {offsets = [0, 0], sizes = [8, 16], strides = [1, 1]} : vector<32x16xf32> to vector<8x16xf32>
    %235 = vector.extract_strided_slice %228 {offsets = [8, 0], sizes = [8, 16], strides = [1, 1]} : vector<32x16xf32> to vector<8x16xf32>
    %236 = vector.extract_strided_slice %228 {offsets = [16, 0], sizes = [8, 16], strides = [1, 1]} : vector<32x16xf32> to vector<8x16xf32>
    %237 = vector.extract_strided_slice %228 {offsets = [24, 0], sizes = [8, 16], strides = [1, 1]} : vector<32x16xf32> to vector<8x16xf32>
    %238 = vector.extract_strided_slice %229 {offsets = [0, 0], sizes = [8, 16], strides = [1, 1]} : vector<32x16xf32> to vector<8x16xf32>
    %239 = vector.extract_strided_slice %229 {offsets = [8, 0], sizes = [8, 16], strides = [1, 1]} : vector<32x16xf32> to vector<8x16xf32>
    %240 = vector.extract_strided_slice %229 {offsets = [16, 0], sizes = [8, 16], strides = [1, 1]} : vector<32x16xf32> to vector<8x16xf32>
    %241 = vector.extract_strided_slice %229 {offsets = [24, 0], sizes = [8, 16], strides = [1, 1]} : vector<32x16xf32> to vector<8x16xf32>
    %242 = arith.mulf %230, %234 : vector<8x16xf32>
    %cst_26 = arith.constant dense<0.000000e+00> : vector<8xf32>
    %243 = vector.multi_reduction <add>, %242, %cst_26 [1] : vector<8x16xf32> to vector<8xf32>
    %244 = vector.shape_cast %243 : vector<8xf32> to vector<8x1xf32>
    %245 = vector.extract_strided_slice %5 {offsets = [0, 0], sizes = [8, 1], strides = [1, 1]} : vector<8x4xf32> to vector<8x1xf32>
    %246 = arith.addf %244, %245 : vector<8x1xf32>
    %247 = arith.mulf %230, %235 : vector<8x16xf32>
    %cst_27 = arith.constant dense<0.000000e+00> : vector<8xf32>
    %248 = vector.multi_reduction <add>, %247, %cst_27 [1] : vector<8x16xf32> to vector<8xf32>
    %249 = vector.shape_cast %248 : vector<8xf32> to vector<8x1xf32>
    %250 = vector.extract_strided_slice %5 {offsets = [0, 1], sizes = [8, 1], strides = [1, 1]} : vector<8x4xf32> to vector<8x1xf32>
    %251 = arith.addf %249, %250 : vector<8x1xf32>
    %252 = arith.mulf %230, %236 : vector<8x16xf32>
    %cst_28 = arith.constant dense<0.000000e+00> : vector<8xf32>
    %253 = vector.multi_reduction <add>, %252, %cst_28 [1] : vector<8x16xf32> to vector<8xf32>
    %254 = vector.shape_cast %253 : vector<8xf32> to vector<8x1xf32>
    %255 = vector.extract_strided_slice %5 {offsets = [0, 2], sizes = [8, 1], strides = [1, 1]} : vector<8x4xf32> to vector<8x1xf32>
    %256 = arith.addf %254, %255 : vector<8x1xf32>
    %257 = arith.mulf %230, %237 : vector<8x16xf32>
    %cst_29 = arith.constant dense<0.000000e+00> : vector<8xf32>
    %258 = vector.multi_reduction <add>, %257, %cst_29 [1] : vector<8x16xf32> to vector<8xf32>
    %259 = vector.shape_cast %258 : vector<8xf32> to vector<8x1xf32>
    %260 = vector.extract_strided_slice %5 {offsets = [0, 3], sizes = [8, 1], strides = [1, 1]} : vector<8x4xf32> to vector<8x1xf32>
    %261 = arith.addf %259, %260 : vector<8x1xf32>
    %262 = arith.maximumf %246, %251 : vector<8x1xf32>
    %263 = arith.maximumf %262, %256 : vector<8x1xf32>
    %264 = arith.maximumf %263, %261 : vector<8x1xf32>
    %265 = arith.subf %246, %264 : vector<8x1xf32>
    %266 = math.exp %265 : vector<8x1xf32>
    %267 = arith.subf %251, %264 : vector<8x1xf32>
    %268 = math.exp %267 : vector<8x1xf32>
    %269 = arith.subf %256, %264 : vector<8x1xf32>
    %270 = math.exp %269 : vector<8x1xf32>
    %271 = arith.subf %261, %264 : vector<8x1xf32>
    %272 = math.exp %271 : vector<8x1xf32>
    %273 = arith.addf %266, %268 : vector<8x1xf32>
    %274 = arith.addf %273, %270 : vector<8x1xf32>
    %275 = arith.addf %274, %272 : vector<8x1xf32>
    %276 = tpu.reciprocal %275 {approx = true} : vector<8x1xf32> -> vector<8x1xf32>
    %277 = arith.mulf %266, %276 : vector<8x1xf32>
    %278 = vector.broadcast %277 : vector<8x1xf32> to vector<8x16xf32>
    %279 = arith.mulf %278, %238 : vector<8x16xf32>
    %280 = arith.mulf %268, %276 : vector<8x1xf32>
    %281 = vector.broadcast %280 : vector<8x1xf32> to vector<8x16xf32>
    %282 = arith.mulf %281, %239 : vector<8x16xf32>
    %283 = arith.addf %279, %282 : vector<8x16xf32>
    %284 = arith.mulf %270, %276 : vector<8x1xf32>
    %285 = vector.broadcast %284 : vector<8x1xf32> to vector<8x16xf32>
    %286 = arith.mulf %285, %240 : vector<8x16xf32>
    %287 = arith.addf %283, %286 : vector<8x16xf32>
    %288 = arith.mulf %272, %276 : vector<8x1xf32>
    %289 = vector.broadcast %288 : vector<8x1xf32> to vector<8x16xf32>
    %290 = arith.mulf %289, %241 : vector<8x16xf32>
    %291 = arith.addf %287, %290 : vector<8x16xf32>
    %292 = arith.mulf %231, %234 : vector<8x16xf32>
    %cst_30 = arith.constant dense<0.000000e+00> : vector<8xf32>
    %293 = vector.multi_reduction <add>, %292, %cst_30 [1] : vector<8x16xf32> to vector<8xf32>
    %294 = vector.shape_cast %293 : vector<8xf32> to vector<8x1xf32>
    %295 = vector.extract_strided_slice %5 {offsets = [0, 0], sizes = [8, 1], strides = [1, 1]} : vector<8x4xf32> to vector<8x1xf32>
    %296 = arith.addf %294, %295 : vector<8x1xf32>
    %297 = arith.mulf %231, %235 : vector<8x16xf32>
    %cst_31 = arith.constant dense<0.000000e+00> : vector<8xf32>
    %298 = vector.multi_reduction <add>, %297, %cst_31 [1] : vector<8x16xf32> to vector<8xf32>
    %299 = vector.shape_cast %298 : vector<8xf32> to vector<8x1xf32>
    %300 = vector.extract_strided_slice %5 {offsets = [0, 1], sizes = [8, 1], strides = [1, 1]} : vector<8x4xf32> to vector<8x1xf32>
    %301 = arith.addf %299, %300 : vector<8x1xf32>
    %302 = arith.mulf %231, %236 : vector<8x16xf32>
    %cst_32 = arith.constant dense<0.000000e+00> : vector<8xf32>
    %303 = vector.multi_reduction <add>, %302, %cst_32 [1] : vector<8x16xf32> to vector<8xf32>
    %304 = vector.shape_cast %303 : vector<8xf32> to vector<8x1xf32>
    %305 = vector.extract_strided_slice %5 {offsets = [0, 2], sizes = [8, 1], strides = [1, 1]} : vector<8x4xf32> to vector<8x1xf32>
    %306 = arith.addf %304, %305 : vector<8x1xf32>
    %307 = arith.mulf %231, %237 : vector<8x16xf32>
    %cst_33 = arith.constant dense<0.000000e+00> : vector<8xf32>
    %308 = vector.multi_reduction <add>, %307, %cst_33 [1] : vector<8x16xf32> to vector<8xf32>
    %309 = vector.shape_cast %308 : vector<8xf32> to vector<8x1xf32>
    %310 = vector.extract_strided_slice %5 {offsets = [0, 3], sizes = [8, 1], strides = [1, 1]} : vector<8x4xf32> to vector<8x1xf32>
    %311 = arith.addf %309, %310 : vector<8x1xf32>
    %312 = arith.maximumf %296, %301 : vector<8x1xf32>
    %313 = arith.maximumf %312, %306 : vector<8x1xf32>
    %314 = arith.maximumf %313, %311 : vector<8x1xf32>
    %315 = arith.subf %296, %314 : vector<8x1xf32>
    %316 = math.exp %315 : vector<8x1xf32>
    %317 = arith.subf %301, %314 : vector<8x1xf32>
    %318 = math.exp %317 : vector<8x1xf32>
    %319 = arith.subf %306, %314 : vector<8x1xf32>
    %320 = math.exp %319 : vector<8x1xf32>
    %321 = arith.subf %311, %314 : vector<8x1xf32>
    %322 = math.exp %321 : vector<8x1xf32>
    %323 = arith.addf %316, %318 : vector<8x1xf32>
    %324 = arith.addf %323, %320 : vector<8x1xf32>
    %325 = arith.addf %324, %322 : vector<8x1xf32>
    %326 = tpu.reciprocal %325 {approx = true} : vector<8x1xf32> -> vector<8x1xf32>
    %327 = arith.mulf %316, %326 : vector<8x1xf32>
    %328 = vector.broadcast %327 : vector<8x1xf32> to vector<8x16xf32>
    %329 = arith.mulf %328, %238 : vector<8x16xf32>
    %330 = arith.mulf %318, %326 : vector<8x1xf32>
    %331 = vector.broadcast %330 : vector<8x1xf32> to vector<8x16xf32>
    %332 = arith.mulf %331, %239 : vector<8x16xf32>
    %333 = arith.addf %329, %332 : vector<8x16xf32>
    %334 = arith.mulf %320, %326 : vector<8x1xf32>
    %335 = vector.broadcast %334 : vector<8x1xf32> to vector<8x16xf32>
    %336 = arith.mulf %335, %240 : vector<8x16xf32>
    %337 = arith.addf %333, %336 : vector<8x16xf32>
    %338 = arith.mulf %322, %326 : vector<8x1xf32>
    %339 = vector.broadcast %338 : vector<8x1xf32> to vector<8x16xf32>
    %340 = arith.mulf %339, %241 : vector<8x16xf32>
    %341 = arith.addf %337, %340 : vector<8x16xf32>
    %342 = arith.mulf %232, %234 : vector<8x16xf32>
    %cst_34 = arith.constant dense<0.000000e+00> : vector<8xf32>
    %343 = vector.multi_reduction <add>, %342, %cst_34 [1] : vector<8x16xf32> to vector<8xf32>
    %344 = vector.shape_cast %343 : vector<8xf32> to vector<8x1xf32>
    %345 = vector.extract_strided_slice %5 {offsets = [0, 0], sizes = [8, 1], strides = [1, 1]} : vector<8x4xf32> to vector<8x1xf32>
    %346 = arith.addf %344, %345 : vector<8x1xf32>
    %347 = arith.mulf %232, %235 : vector<8x16xf32>
    %cst_35 = arith.constant dense<0.000000e+00> : vector<8xf32>
    %348 = vector.multi_reduction <add>, %347, %cst_35 [1] : vector<8x16xf32> to vector<8xf32>
    %349 = vector.shape_cast %348 : vector<8xf32> to vector<8x1xf32>
    %350 = vector.extract_strided_slice %5 {offsets = [0, 1], sizes = [8, 1], strides = [1, 1]} : vector<8x4xf32> to vector<8x1xf32>
    %351 = arith.addf %349, %350 : vector<8x1xf32>
    %352 = arith.mulf %232, %236 : vector<8x16xf32>
    %cst_36 = arith.constant dense<0.000000e+00> : vector<8xf32>
    %353 = vector.multi_reduction <add>, %352, %cst_36 [1] : vector<8x16xf32> to vector<8xf32>
    %354 = vector.shape_cast %353 : vector<8xf32> to vector<8x1xf32>
    %355 = vector.extract_strided_slice %5 {offsets = [0, 2], sizes = [8, 1], strides = [1, 1]} : vector<8x4xf32> to vector<8x1xf32>
    %356 = arith.addf %354, %355 : vector<8x1xf32>
    %357 = arith.mulf %232, %237 : vector<8x16xf32>
    %cst_37 = arith.constant dense<0.000000e+00> : vector<8xf32>
    %358 = vector.multi_reduction <add>, %357, %cst_37 [1] : vector<8x16xf32> to vector<8xf32>
    %359 = vector.shape_cast %358 : vector<8xf32> to vector<8x1xf32>
    %360 = vector.extract_strided_slice %5 {offsets = [0, 3], sizes = [8, 1], strides = [1, 1]} : vector<8x4xf32> to vector<8x1xf32>
    %361 = arith.addf %359, %360 : vector<8x1xf32>
    %362 = arith.maximumf %346, %351 : vector<8x1xf32>
    %363 = arith.maximumf %362, %356 : vector<8x1xf32>
    %364 = arith.maximumf %363, %361 : vector<8x1xf32>
    %365 = arith.subf %346, %364 : vector<8x1xf32>
    %366 = math.exp %365 : vector<8x1xf32>
    %367 = arith.subf %351, %364 : vector<8x1xf32>
    %368 = math.exp %367 : vector<8x1xf32>
    %369 = arith.subf %356, %364 : vector<8x1xf32>
    %370 = math.exp %369 : vector<8x1xf32>
    %371 = arith.subf %361, %364 : vector<8x1xf32>
    %372 = math.exp %371 : vector<8x1xf32>
    %373 = arith.addf %366, %368 : vector<8x1xf32>
    %374 = arith.addf %373, %370 : vector<8x1xf32>
    %375 = arith.addf %374, %372 : vector<8x1xf32>
    %376 = tpu.reciprocal %375 {approx = true} : vector<8x1xf32> -> vector<8x1xf32>
    %377 = arith.mulf %366, %376 : vector<8x1xf32>
    %378 = vector.broadcast %377 : vector<8x1xf32> to vector<8x16xf32>
    %379 = arith.mulf %378, %238 : vector<8x16xf32>
    %380 = arith.mulf %368, %376 : vector<8x1xf32>
    %381 = vector.broadcast %380 : vector<8x1xf32> to vector<8x16xf32>
    %382 = arith.mulf %381, %239 : vector<8x16xf32>
    %383 = arith.addf %379, %382 : vector<8x16xf32>
    %384 = arith.mulf %370, %376 : vector<8x1xf32>
    %385 = vector.broadcast %384 : vector<8x1xf32> to vector<8x16xf32>
    %386 = arith.mulf %385, %240 : vector<8x16xf32>
    %387 = arith.addf %383, %386 : vector<8x16xf32>
    %388 = arith.mulf %372, %376 : vector<8x1xf32>
    %389 = vector.broadcast %388 : vector<8x1xf32> to vector<8x16xf32>
    %390 = arith.mulf %389, %241 : vector<8x16xf32>
    %391 = arith.addf %387, %390 : vector<8x16xf32>
    %392 = arith.mulf %233, %234 : vector<8x16xf32>
    %cst_38 = arith.constant dense<0.000000e+00> : vector<8xf32>
    %393 = vector.multi_reduction <add>, %392, %cst_38 [1] : vector<8x16xf32> to vector<8xf32>
    %394 = vector.shape_cast %393 : vector<8xf32> to vector<8x1xf32>
    %395 = vector.extract_strided_slice %5 {offsets = [0, 0], sizes = [8, 1], strides = [1, 1]} : vector<8x4xf32> to vector<8x1xf32>
    %396 = arith.addf %394, %395 : vector<8x1xf32>
    %397 = arith.mulf %233, %235 : vector<8x16xf32>
    %cst_39 = arith.constant dense<0.000000e+00> : vector<8xf32>
    %398 = vector.multi_reduction <add>, %397, %cst_39 [1] : vector<8x16xf32> to vector<8xf32>
    %399 = vector.shape_cast %398 : vector<8xf32> to vector<8x1xf32>
    %400 = vector.extract_strided_slice %5 {offsets = [0, 1], sizes = [8, 1], strides = [1, 1]} : vector<8x4xf32> to vector<8x1xf32>
    %401 = arith.addf %399, %400 : vector<8x1xf32>
    %402 = arith.mulf %233, %236 : vector<8x16xf32>
    %cst_40 = arith.constant dense<0.000000e+00> : vector<8xf32>
    %403 = vector.multi_reduction <add>, %402, %cst_40 [1] : vector<8x16xf32> to vector<8xf32>
    %404 = vector.shape_cast %403 : vector<8xf32> to vector<8x1xf32>
    %405 = vector.extract_strided_slice %5 {offsets = [0, 2], sizes = [8, 1], strides = [1, 1]} : vector<8x4xf32> to vector<8x1xf32>
    %406 = arith.addf %404, %405 : vector<8x1xf32>
    %407 = arith.mulf %233, %237 : vector<8x16xf32>
    %cst_41 = arith.constant dense<0.000000e+00> : vector<8xf32>
    %408 = vector.multi_reduction <add>, %407, %cst_41 [1] : vector<8x16xf32> to vector<8xf32>
    %409 = vector.shape_cast %408 : vector<8xf32> to vector<8x1xf32>
    %410 = vector.extract_strided_slice %5 {offsets = [0, 3], sizes = [8, 1], strides = [1, 1]} : vector<8x4xf32> to vector<8x1xf32>
    %411 = arith.addf %409, %410 : vector<8x1xf32>
    %412 = arith.maximumf %396, %401 : vector<8x1xf32>
    %413 = arith.maximumf %412, %406 : vector<8x1xf32>
    %414 = arith.maximumf %413, %411 : vector<8x1xf32>
    %415 = arith.subf %396, %414 : vector<8x1xf32>
    %416 = math.exp %415 : vector<8x1xf32>
    %417 = arith.subf %401, %414 : vector<8x1xf32>
    %418 = math.exp %417 : vector<8x1xf32>
    %419 = arith.subf %406, %414 : vector<8x1xf32>
    %420 = math.exp %419 : vector<8x1xf32>
    %421 = arith.subf %411, %414 : vector<8x1xf32>
    %422 = math.exp %421 : vector<8x1xf32>
    %423 = arith.addf %416, %418 : vector<8x1xf32>
    %424 = arith.addf %423, %420 : vector<8x1xf32>
    %425 = arith.addf %424, %422 : vector<8x1xf32>
    %426 = tpu.reciprocal %425 {approx = true} : vector<8x1xf32> -> vector<8x1xf32>
    %427 = arith.mulf %416, %426 : vector<8x1xf32>
    %428 = vector.broadcast %427 : vector<8x1xf32> to vector<8x16xf32>
    %429 = arith.mulf %428, %238 : vector<8x16xf32>
    %430 = arith.mulf %418, %426 : vector<8x1xf32>
    %431 = vector.broadcast %430 : vector<8x1xf32> to vector<8x16xf32>
    %432 = arith.mulf %431, %239 : vector<8x16xf32>
    %433 = arith.addf %429, %432 : vector<8x16xf32>
    %434 = arith.mulf %420, %426 : vector<8x1xf32>
    %435 = vector.broadcast %434 : vector<8x1xf32> to vector<8x16xf32>
    %436 = arith.mulf %435, %240 : vector<8x16xf32>
    %437 = arith.addf %433, %436 : vector<8x16xf32>
    %438 = arith.mulf %422, %426 : vector<8x1xf32>
    %439 = vector.broadcast %438 : vector<8x1xf32> to vector<8x16xf32>
    %440 = arith.mulf %439, %241 : vector<8x16xf32>
    %441 = arith.addf %437, %440 : vector<8x16xf32>
    %442 = tpu.concatenate %291, %341, %391, %441 in 0 : vector<8x16xf32>, vector<8x16xf32>, vector<8x16xf32>, vector<8x16xf32> -> vector<32x16xf32>
    %443 = tpu.concatenate %226, %442 in 1 : vector<32x16xf32>, vector<32x16xf32> -> vector<32x32xf32>
    %444 = arith.truncf %443 : vector<32x32xf32> to vector<32x32xbf16>
    %c0_42 = arith.constant 0 : index
    %c0_43 = arith.constant 0 : index
    %445 = vector.load %arg6[%c0_42, %c0_43] : memref<32x32xbf16, #tpu.memory_space<vmem>>, vector<32x32xbf16>
    %cst_44 = arith.constant dense<0.000000e+00> : vector<32x32xf32>
    %446 = tpu.matmul %444, %445, %cst_44 {dimension_numbers = #tpu.dot_dimension_numbers<[1], [0], [0], [1], [0, 0, 1, 1], [], []>} : vector<32x32xbf16>, vector<32x32xbf16>, vector<32x32xf32> -> vector<32x32xf32>
    %c0_45 = arith.constant 0 : index
    %c0_46 = arith.constant 0 : index
    %447 = vector.load %arg7[%c0_45, %c0_46] : memref<1x32xf32, #tpu.memory_space<vmem>>, vector<1x32xf32>
    %448 = vector.broadcast %447 : vector<1x32xf32> to vector<32x32xf32>
    %449 = arith.addf %446, %448 : vector<32x32xf32>
    %450 = arith.addf %449, %3 : vector<32x32xf32>
    %c0_47 = arith.constant 0 : index
    %c0_48 = arith.constant 0 : index
    %451 = vector.load %arg8[%c0_47, %c0_48] : memref<1x32xf32, #tpu.memory_space<vmem>>, vector<1x32xf32>
    %c0_49 = arith.constant 0 : index
    %c0_50 = arith.constant 0 : index
    %452 = vector.load %arg9[%c0_49, %c0_50] : memref<1x32xf32, #tpu.memory_space<vmem>>, vector<1x32xf32>
    %cst_51 = arith.constant dense<0.000000e+00> : vector<32xf32>
    %453 = vector.multi_reduction <add>, %450, %cst_51 [1] : vector<32x32xf32> to vector<32xf32>
    %454 = vector.shape_cast %453 : vector<32xf32> to vector<32x1xf32>
    %cst_52 = arith.constant 3.200000e+01 : f32
    %455 = vector.broadcast %cst_52 : f32 to vector<32x1xf32>
    %456 = arith.divf %454, %455 : vector<32x1xf32>
    %457 = vector.broadcast %456 : vector<32x1xf32> to vector<32x32xf32>
    %458 = arith.subf %450, %457 : vector<32x32xf32>
    %459 = arith.mulf %458, %458 : vector<32x32xf32>
    %cst_53 = arith.constant dense<0.000000e+00> : vector<32xf32>
    %460 = vector.multi_reduction <add>, %459, %cst_53 [1] : vector<32x32xf32> to vector<32xf32>
    %461 = vector.shape_cast %460 : vector<32xf32> to vector<32x1xf32>
    %cst_54 = arith.constant 3.200000e+01 : f32
    %462 = vector.broadcast %cst_54 : f32 to vector<32x1xf32>
    %463 = arith.divf %461, %462 : vector<32x1xf32>
    %464 = vector.broadcast %456 : vector<32x1xf32> to vector<32x32xf32>
    %465 = arith.subf %450, %464 : vector<32x32xf32>
    %cst_55 = arith.constant 9.99999996E-13 : f32
    %466 = vector.broadcast %cst_55 : f32 to vector<32x1xf32>
    %467 = arith.addf %463, %466 : vector<32x1xf32>
    %468 = math.rsqrt %467 : vector<32x1xf32>
    %469 = vector.broadcast %468 : vector<32x1xf32> to vector<32x32xf32>
    %470 = arith.mulf %465, %469 : vector<32x32xf32>
    %471 = vector.broadcast %451 : vector<1x32xf32> to vector<32x32xf32>
    %472 = arith.mulf %470, %471 : vector<32x32xf32>
    %473 = vector.broadcast %452 : vector<1x32xf32> to vector<32x32xf32>
    %474 = arith.addf %472, %473 : vector<32x32xf32>
    %475 = arith.truncf %474 : vector<32x32xf32> to vector<32x32xbf16>
    %c0_56 = arith.constant 0 : index
    %c0_57 = arith.constant 0 : index
    %476 = vector.load %arg10[%c0_56, %c0_57] : memref<32x128xbf16, #tpu.memory_space<vmem>>, vector<32x128xbf16>
    %cst_58 = arith.constant dense<0.000000e+00> : vector<32x128xf32>
    %477 = tpu.matmul %475, %476, %cst_58 {dimension_numbers = #tpu.dot_dimension_numbers<[1], [0], [0], [1], [0, 0, 1, 1], [], []>} : vector<32x32xbf16>, vector<32x128xbf16>, vector<32x128xf32> -> vector<32x128xf32>
    %c0_59 = arith.constant 0 : index
    %c0_60 = arith.constant 0 : index
    %478 = vector.load %arg11[%c0_59, %c0_60] : memref<1x128xf32, #tpu.memory_space<vmem>>, vector<1x128xf32>
    %479 = vector.broadcast %478 : vector<1x128xf32> to vector<32x128xf32>
    %480 = arith.addf %477, %479 : vector<32x128xf32>
    %481 = arith.truncf %480 : vector<32x128xf32> to vector<32x128xbf16>
    %cst_61 = arith.constant 5.000000e-01 : bf16
    %482 = vector.broadcast %cst_61 : bf16 to vector<32x128xbf16>
    %483 = arith.mulf %482, %481 : vector<32x128xbf16>
    %cst_62 = arith.constant 4.467770e-02 : bf16
    %484 = vector.broadcast %cst_62 : bf16 to vector<32x128xbf16>
    %485 = arith.mulf %484, %481 : vector<32x128xbf16>
    %486 = arith.mulf %485, %481 : vector<32x128xbf16>
    %487 = arith.mulf %486, %481 : vector<32x128xbf16>
    %488 = arith.addf %481, %487 : vector<32x128xbf16>
    %cst_63 = arith.constant 7.968750e-01 : bf16
    %489 = vector.broadcast %cst_63 : bf16 to vector<32x128xbf16>
    %490 = arith.mulf %489, %488 : vector<32x128xbf16>
    %491 = math.tanh %490 : vector<32x128xbf16>
    %cst_64 = arith.constant 1.000000e+00 : bf16
    %492 = vector.broadcast %cst_64 : bf16 to vector<32x128xbf16>
    %493 = arith.addf %492, %491 : vector<32x128xbf16>
    %494 = arith.mulf %483, %493 : vector<32x128xbf16>
    %c0_65 = arith.constant 0 : index
    %c0_66 = arith.constant 0 : index
    %495 = vector.load %arg12[%c0_65, %c0_66] : memref<128x32xbf16, #tpu.memory_space<vmem>>, vector<128x32xbf16>
    %cst_67 = arith.constant dense<0.000000e+00> : vector<32x32xf32>
    %496 = tpu.matmul %494, %495, %cst_67 {dimension_numbers = #tpu.dot_dimension_numbers<[1], [0], [0], [1], [0, 0, 1, 1], [], []>} : vector<32x128xbf16>, vector<128x32xbf16>, vector<32x32xf32> -> vector<32x32xf32>
    %c0_68 = arith.constant 0 : index
    %c0_69 = arith.constant 0 : index
    %497 = vector.load %arg13[%c0_68, %c0_69] : memref<1x32xf32, #tpu.memory_space<vmem>>, vector<1x32xf32>
    %498 = vector.broadcast %497 : vector<1x32xf32> to vector<32x32xf32>
    %499 = arith.addf %496, %498 : vector<32x32xf32>
    %500 = arith.addf %499, %474 : vector<32x32xf32>
    %c0_70 = arith.constant 0 : index
    %c0_71 = arith.constant 0 : index
    %501 = vector.load %arg14[%c0_70, %c0_71] : memref<1x32xf32, #tpu.memory_space<vmem>>, vector<1x32xf32>
    %c0_72 = arith.constant 0 : index
    %c0_73 = arith.constant 0 : index
    %502 = vector.load %arg15[%c0_72, %c0_73] : memref<1x32xf32, #tpu.memory_space<vmem>>, vector<1x32xf32>
    %cst_74 = arith.constant dense<0.000000e+00> : vector<32xf32>
    %503 = vector.multi_reduction <add>, %500, %cst_74 [1] : vector<32x32xf32> to vector<32xf32>
    %504 = vector.shape_cast %503 : vector<32xf32> to vector<32x1xf32>
    %cst_75 = arith.constant 3.200000e+01 : f32
    %505 = vector.broadcast %cst_75 : f32 to vector<32x1xf32>
    %506 = arith.divf %504, %505 : vector<32x1xf32>
    %507 = vector.broadcast %506 : vector<32x1xf32> to vector<32x32xf32>
    %508 = arith.subf %500, %507 : vector<32x32xf32>
    %509 = arith.mulf %508, %508 : vector<32x32xf32>
    %cst_76 = arith.constant dense<0.000000e+00> : vector<32xf32>
    %510 = vector.multi_reduction <add>, %509, %cst_76 [1] : vector<32x32xf32> to vector<32xf32>
    %511 = vector.shape_cast %510 : vector<32xf32> to vector<32x1xf32>
    %cst_77 = arith.constant 3.200000e+01 : f32
    %512 = vector.broadcast %cst_77 : f32 to vector<32x1xf32>
    %513 = arith.divf %511, %512 : vector<32x1xf32>
    %514 = vector.broadcast %506 : vector<32x1xf32> to vector<32x32xf32>
    %515 = arith.subf %500, %514 : vector<32x32xf32>
    %cst_78 = arith.constant 9.99999996E-13 : f32
    %516 = vector.broadcast %cst_78 : f32 to vector<32x1xf32>
    %517 = arith.addf %513, %516 : vector<32x1xf32>
    %518 = math.rsqrt %517 : vector<32x1xf32>
    %519 = vector.broadcast %518 : vector<32x1xf32> to vector<32x32xf32>
    %520 = arith.mulf %515, %519 : vector<32x32xf32>
    %521 = vector.broadcast %501 : vector<1x32xf32> to vector<32x32xf32>
    %522 = arith.mulf %520, %521 : vector<32x32xf32>
    %523 = vector.broadcast %502 : vector<1x32xf32> to vector<32x32xf32>
    %524 = arith.addf %522, %523 : vector<32x32xf32>
    %525 = arith.truncf %524 : vector<32x32xf32> to vector<32x32xbf16>
    %526 = vector.shape_cast %525 : vector<32x32xbf16> to vector<4x8x32xbf16>
    %c0_79 = arith.constant 0 : index
    %c0_80 = arith.constant 0 : index
    %c0_81 = arith.constant 0 : index
    %c0_82 = arith.constant 0 : index
    %527 = vector.load %arg16[%c0_79, %c0_80, %c0_81, %c0_82] : memref<1x4x8x32xbf16, #tpu.memory_space<vmem>>, vector<1x4x8x32xbf16>
    %528 = vector.shape_cast %527 : vector<1x4x8x32xbf16> to vector<4x8x32xbf16>
    %529 = vector.shape_cast %526 : vector<4x8x32xbf16> to vector<1x4x8x32xbf16>
    tpu.vector_store %arg16[%c0_79, %c0_80, %c0_81, %c0_82], %529 {strides = array<i32>} : memref<1x4x8x32xbf16, #tpu.memory_space<vmem>>, vector<1x4x8x32xbf16>,
    return
  }
  func.func @transform_0(%arg0: i32, %arg1: i32) -> (i32, i32, i32, i32) {
    %c0_i32 = arith.constant 0 : i32
    %c0_i32_0 = arith.constant 0 : i32
    %c0_i32_1 = arith.constant 0 : i32
    return %arg0, %c0_i32, %arg1, %c0_i32_0 : i32, i32, i32, i32
  }
  func.func @transform_1(%arg0: i32, %arg1: i32) -> (i32, i32, i32) {
    %c0_i32 = arith.constant 0 : i32
    %c0_i32_0 = arith.constant 0 : i32
    return %arg0, %arg1, %c0_i32 : i32, i32, i32
  }
  func.func @transform_2(%arg0: i32, %arg1: i32) -> (i32, i32) {
    %c0_i32 = arith.constant 0 : i32
    %c0_i32_0 = arith.constant 0 : i32
    %c0_i32_1 = arith.constant 0 : i32
    return %c0_i32, %c0_i32_0 : i32, i32
  }
  func.func @transform_3(%arg0: i32, %arg1: i32) -> (i32, i32) {
    %c0_i32 = arith.constant 0 : i32
    %c0_i32_0 = arith.constant 0 : i32
    %c0_i32_1 = arith.constant 0 : i32
    return %c0_i32, %c0_i32_0 : i32, i32
  }
  func.func @transform_4(%arg0: i32, %arg1: i32) -> (i32, i32) {
    %c0_i32 = arith.constant 0 : i32
    %c0_i32_0 = arith.constant 0 : i32
    %c0_i32_1 = arith.constant 0 : i32
    return %c0_i32, %c0_i32_0 : i32, i32
  }
  func.func @transform_5(%arg0: i32, %arg1: i32) -> (i32, i32) {
    %c0_i32 = arith.constant 0 : i32
    %c0_i32_0 = arith.constant 0 : i32
    %c0_i32_1 = arith.constant 0 : i32
    return %c0_i32, %c0_i32_0 : i32, i32
  }
  func.func @transform_6(%arg0: i32, %arg1: i32) -> (i32, i32) {
    %c0_i32 = arith.constant 0 : i32
    %c0_i32_0 = arith.constant 0 : i32
    %c0_i32_1 = arith.constant 0 : i32
    return %c0_i32, %c0_i32_0 : i32, i32
  }
  func.func @transform_7(%arg0: i32, %arg1: i32) -> (i32, i32) {
    %c0_i32 = arith.constant 0 : i32
    %c0_i32_0 = arith.constant 0 : i32
    %c0_i32_1 = arith.constant 0 : i32
    return %c0_i32, %c0_i32_0 : i32, i32
  }
  func.func @transform_8(%arg0: i32, %arg1: i32) -> (i32, i32) {
    %c0_i32 = arith.constant 0 : i32
    %c0_i32_0 = arith.constant 0 : i32
    %c0_i32_1 = arith.constant 0 : i32
    return %c0_i32, %c0_i32_0 : i32, i32
  }
  func.func @transform_9(%arg0: i32, %arg1: i32) -> (i32, i32) {
    %c0_i32 = arith.constant 0 : i32
    %c0_i32_0 = arith.constant 0 : i32
    %c0_i32_1 = arith.constant 0 : i32
    return %c0_i32, %c0_i32_0 : i32, i32
  }
  func.func @transform_10(%arg0: i32, %arg1: i32) -> (i32, i32) {
    %c0_i32 = arith.constant 0 : i32
    %c0_i32_0 = arith.constant 0 : i32
    %c0_i32_1 = arith.constant 0 : i32
    return %c0_i32, %c0_i32_0 : i32, i32
  }
  func.func @transform_11(%arg0: i32, %arg1: i32) -> (i32, i32) {
    %c0_i32 = arith.constant 0 : i32
    %c0_i32_0 = arith.constant 0 : i32
    %c0_i32_1 = arith.constant 0 : i32
    return %c0_i32, %c0_i32_0 : i32, i32
  }
  func.func @transform_12(%arg0: i32, %arg1: i32) -> (i32, i32) {
    %c0_i32 = arith.constant 0 : i32
    %c0_i32_0 = arith.constant 0 : i32
    %c0_i32_1 = arith.constant 0 : i32
    return %c0_i32, %c0_i32_0 : i32, i32
  }
  func.func @transform_13(%arg0: i32, %arg1: i32) -> (i32, i32) {
    %c0_i32 = arith.constant 0 : i32
    %c0_i32_0 = arith.constant 0 : i32
    %c0_i32_1 = arith.constant 0 : i32
    return %c0_i32, %c0_i32_0 : i32, i32
  }
  func.func @transform_14(%arg0: i32, %arg1: i32) -> (i32, i32, i32, i32) {
    %c0_i32 = arith.constant 0 : i32
    %c0_i32_0 = arith.constant 0 : i32
    %c0_i32_1 = arith.constant 0 : i32
    return %arg0, %c0_i32, %arg1, %c0_i32_0 : i32, i32, i32, i32
  }
}

</mosaic_0001>

<bundles_post_ra>
// kernel: tpu_custom_call.1
= control target key start
LH: loop header
LB: loop body
LE: loop exit
PB: predicated region body
PF: predicated region fallthrough
CT: control target
= control target key end

     0   :  { %s3573_s0 = inlined_call_operand.vmem [shape: bf16[2,4,8,32], index: 0, kind: input, shape index: {}]   ;;  %s3574_s1 = inlined_call_operand.vmem [shape: f32[2,8,4], index: 1, kind: input, shape index: {}]   ;;  %s3575_s2 = inlined_call_operand.vmem [shape: bf16[32,96], index: 2, kind: input, shape index: {}]   ;;  %s3576_s3 = inlined_call_operand.vmem [shape: f32[1,96], index: 3, kind: input, shape index: {}]   ;;  %s3577_s4 = inlined_call_operand.vmem [shape: bf16[32,32], index: 4, kind: input, shape index: {}]   ;;  %s3578_s5 = inlined_call_operand.vmem [shape: f32[1,32], index: 5, kind: input, shape index: {}]   ;;  %s3579_s6 = inlined_call_operand.vmem [shape: f32[1,32], index: 6, kind: input, shape index: {}]   ;;  %s3580_s7 = inlined_call_operand.vmem [shape: f32[1,32], index: 7, kind: input, shape index: {}]   ;;  %s3581_s8 = inlined_call_operand.vmem [shape: bf16[32,128], index: 8, kind: input, shape index: {}]   ;;  %s3582_s9 = inlined_call_operand.vmem [shape: f32[1,128], index: 9, kind: input, shape index: {}]   ;;  %s3583_s10 = inlined_call_operand.vmem [shape: bf16[128,32], index: 10, kind: input, shape index: {}]   ;;  %s3584_s11 = inlined_call_operand.vmem [shape: f32[1,32], index: 11, kind: input, shape index: {}]   ;;  %s3585_s12 = inlined_call_operand.vmem [shape: f32[1,32], index: 12, kind: input, shape index: {}]   ;;  %s3586_s13 = inlined_call_operand.vmem [shape: f32[1,32], index: 13, kind: input, shape index: {}]   ;;  %s3587_s14 = inlined_call_operand.hbm [shape: bf16[2,4,8,32], index: 14, kind: output, shape index: {}]  }
   0x1   :  { %3593 = sst [smem:[#allocation8_spill]] %s3573_s0 }
   0x2   :  { %19 = vsyncpa [#allocation3], 0 }
   0x3   :  { %21 = vsyncpa [#allocation3 + $0x1], 0  ;;  %s2740_s29 = smov 0   ;;  %s2742_s30 = smov 0  }
   0x4   :  { %s2744_s15 = smov 0   ;;  %s2746_s16 = smov 0  }
   0x5   :  { %s2748_s17 = smov 0   ;;  %s2750_s18 = smov 0  }
   0x6 LB: > { %3594 = sst [smem:[#allocation5_spill]] %s2644_s17  ;;  %s2221_s19 = sadd.s32 4294967295, %s2648_s18   ;;  %s2648_s18 = sphi %s2750_s18, %s27_s18   ;;  %s2644_s17 = sphi %s2748_s17, %s3607_s17   ;;  %s2640_s16 = sphi %s2746_s16, %s3606_s16   ;;  %s2636_s15 = sphi %s2744_s15, %s3610_s15   ;;  %s2632_s30 = sphi %s2742_s30, %s3609_s30   ;;  %s2628_s29 = sphi %s2740_s29, %s3608_s29  }
   0x7   : > { %s2222_s20 = sadd.s32 4294967294, %s2648_s18   ;;  %s39_s21 = sadd.s32 1, %s2644_s17 }
   0x8   : > { %s356_s22 = sadd.s32 1, %s2636_s15  ;;  %p41_p0 = scmp.ge.s32.totalorder %s39_s21, 2 }
   0x9   : > { %p366_p1 = scmp.ne.s32.totalorder %s2636_s15, %s2632_s30  ;;  %p367_p2 = scmp.eq.s32.totalorder %s2221_s19, 1 }
   0xa   : > { %p372_p3 = scmp.ne.s32.totalorder %s2632_s30, %s2628_s29  ;;  %s3612_s21 = smov (%p41_p0, %s39_s21), 0 }
   0xb   : > { %3595 = sst [smem:[#allocation6_spill]] %s3612_s21  ;;  %p2780_p4 = por %p367_p2, %p366_p1 }
   0xc   : > { %p373_p5 = scmp.eq.s32.totalorder %s2222_s20, 1  ;;  %s351_s24 = ssub.s32 %s2644_s17, %s3612_s21 }
   0xd   : > { %p2225_p6 = scmp.ge.s32.totalorder %s2648_s18, 1  ;;  %p354_p7 = scmp.eq.s32.totalorder %s351_s24, 0 }
   0xe   : > { %p2787_p8 = por %p373_p5, %p372_p3  ;;  %p448_p9 = scmp.lt.s32.totalorder %s2648_s18, 3 }
   0xf   : > { %s2793_s26 = scalar_select %p354_p7, %s2636_s15, %s356_s22  }
  0x10   : > { %p449_p10 = pnand %p2225_p6, %p448_p9 }
  0x11   : > { %3598 = sst [smem:[#allocation7_spill]] %s2793_s26  ;;  %v2450_v0 = vld [vmem:[%s3575_s2] sm:$0xff] (!%p449_p10)   ;;  %p504_p11 = scmp.lt.s32.totalorder (!%p449_p10), %s2640_s16, 1  ;;  %v2451_v1 = vld [vmem:[%s3575_s2 + $0x8] sm:$0xff] (!%p449_p10)   ;;  %vm566_vm0 = vcmask (!%p449_p10), 261120   ;;  %vm627_vm1 = vcmask (!%p449_p10), 130048  }
  0x12   : > { %452 = sbr.rel (%p449_p10) target bundleno = 2897 (0xb51), region = 76  ;;  %2297 = vmatprep.subr.bf16.mxu0 (!%p449_p10), %v2450_v0  ;;  %s3599_s0 = sld [smem:[#allocation8_spill]] (!%p449_p10)  ;;  %v2230_v4 = vld [vmem:[%s3576_s3] ss:$0 sm:$0xff] (!%p449_p10)  ;;  %vm2108_vm2 = vcmask (!%p449_p10), 257024  }
  0x13   : > { %2298 = vmatpush3.bf16.msra.mxu0 (!%p449_p10), %v2450_v0  ;;  %s2650_s17 = smov (!%p449_p10), 96   ;;  %s2651_s21 = smov (!%p449_p10), 112  }
  0x14   : > { %2299 = vmatprep.subr.bf16.mxu0 (!%p449_p10), %v2451_v1  ;;  %s2652_s28 = smov (!%p449_p10), 126   ;;  %s2657_s20 = smov (!%p449_p10), 3  }
  0x17   : > { %2300 = vmatpush3.bf16.msra.mxu0 (!%p449_p10), %v2451_v1 }
  0x19   : > { %s2803_s24 = scalar_select %p504_p11, %s2640_s16, 1 }
  0x1b   : > { %s2269_s22 = sshll.u32 %s2803_s24, 4  ;;  %s2229_s19 = sshll.u32 %s2803_s24, 3 }
  0x1c   : > { %s2809_s26 = scalar_lea.vmem %s3599_s0, %s2269_s22  ;;  %s518_s27 = scalar_lea.vmem %s3574_s1, %s2229_s19 }
  0x1d   : > { %v524_v2 = vld [vmem:[%s2809_s26] sm:$0xff]   ;;  %v526_v3 = vld [vmem:[%s2809_s26 + $0x8] sm:$0xff]   ;;  %s2653_s24 = smov 125   ;;  %s2656_s19 = smov 2  }
  0x1e   : > { %2301 = vmatprep.mubr.msk.bf16.mxu0 %vm566_vm0, %v524_v2  ;;  %s3592_s22 = smov 64  }
  0x1f   : > { %2302 = vmatmul.mubr.msk.bf16.vlgmr.msra.gmra.mrb[0].mxu0 %vm566_vm0, %v526_v3 }
  0xf2   : > { %v2303_v5 = vpop.f32.mrb[0].mxu0 }
  0xf3   : > { %v2818_v6 = vadd.f32 %v2303_v5, %v2230_v4  ;;  %v607_v7 = vpop.f32.mrb[1].mxu0 }
  0xf4   : > { %v2820_v8 = vadd.f32 %v2230_v4, %v607_v7  ;;  %v2304_v9 = vpop.f32.mrb[2].mxu0 }
  0xf5   : > { %642 = vrot.lane.b32.xlu0 %v2818_v6, %s2650_s17  ;;  %v610_v10 = vpop.f32.mrb[3].mxu0  ;;  %v2826_v12 = vadd.f32 %v2304_v9, %v2230_v4 }
  0xf6   : > { %v2823_v11 = vadd.f32 %v2230_v4, %v610_v10  ;;  %623 = vrot.lane.b32.xlu1 %v2820_v8, %s2650_s17 }
  0xf9   : > { %633 = vrot.lane.b32.xlu0 %v2823_v11, %s2650_s17 }
  0xfa   : > { %651 = vrot.lane.b32.xlu1 %v2826_v12, %s2650_s17  ;;  %s2654_s17 = smov 127  }
 0x167   : > { %v643_v13 = vpop.permute.xlu0 %642 }
 0x168   : > { %v763_v14 = vmul.f32 %v643_v13, %v2823_v11  ;;  %v645_v15 = vmul.f32 %v643_v13, %v2820_v8  ;;  %v991_v16 = vmul.f32 %v643_v13, %v2826_v12  ;;  %v877_v17 = vmul.f32 %v643_v13, %v2818_v6  ;;  %v624_v18 = vpop.permute.xlu1 %623 }
 0x169   : > { %v753_v19 = vmul.f32 %v624_v18, %v2823_v11  ;;  %v626_v20 = vmul.f32 %v624_v18, %v2820_v8  ;;  %v867_v21 = vmul.f32 %v624_v18, %v2818_v6  ;;  %v2844_v22 = vmul.f32 %v624_v18, %v2826_v12 }
 0x16a   : > { %1238 = vrot.lane.b32.xlu1 %v763_v14, %s2651_s21  ;;  %1112 = vrot.lane.b32.xlu0 %v645_v15, %s2651_s21  ;;  %v764_v23 = vsel %vm627_vm1, %v763_v14, 0.0  ;;  %v992_v24 = vsel %vm627_vm1, %v991_v16, 0.0  ;;  %v646_v25 = vsel %vm627_vm1, %v645_v15, 0.0  ;;  %v878_v26 = vsel %vm627_vm1, %v877_v17, 0.0 }
 0x16b   : > { %v754_v32 = vsel %vm627_vm1, %v753_v19, 0.0  ;;  %v628_v33 = vsel %vm627_vm1, %v626_v20, 0.0  ;;  %v868_v34 = vsel %vm627_vm1, %v867_v21, 0.0  ;;  %v634_v35 = vpop.permute.xlu0 %633 }
 0x16c   : > { %v652_v27 = vpop.permute.xlu1 %651  ;;  %v636_v36 = vmul.f32 %v634_v35, %v2820_v8  ;;  %v758_v37 = vmul.f32 %v634_v35, %v2823_v11  ;;  %v872_v38 = vmul.f32 %v634_v35, %v2818_v6  ;;  %v986_v39 = vmul.f32 %v634_v35, %v2826_v12 }
 0x16d   : > { %v654_v28 = vmul.f32 %v652_v27, %v2820_v8  ;;  %v768_v29 = vmul.f32 %v652_v27, %v2823_v11  ;;  %v882_v30 = vmul.f32 %v652_v27, %v2818_v6  ;;  %v996_v31 = vmul.f32 %v652_v27, %v2826_v12 }
 0x16e   : > { %1490 = vrot.lane.b32.xlu1 %v991_v16, %s2651_s21  ;;  %1364 = vrot.lane.b32.xlu0 %v877_v17, %s2651_s21  ;;  %v637_v45 = vsel %vm627_vm1, %v636_v36, 0.0  ;;  %v987_v47 = vsel %vm627_vm1, %v986_v39, 0.0  ;;  %v759_v52 = vsel %vm627_vm1, %v758_v37, 0.0  ;;  %v873_v56 = vsel %vm627_vm1, %v872_v38, 0.0 }
 0x16f   : > { %v769_v40 = vsel %vm627_vm1, %v768_v29, 0.0  ;;  %v997_v42 = vsel %vm627_vm1, %v996_v31, 0.0  ;;  %v655_v46 = vsel %vm627_vm1, %v654_v28, 0.0  ;;  %v883_v49 = vsel %vm627_vm1, %v882_v30, 0.0 }
 0x170   : > { %v982_v27 = vsel %vm627_vm1, %v2844_v22, 0.0 }
 0x172   : > { %1222 = vrot.lane.b32.xlu1 %v753_v19, %s2651_s21  ;;  %1096 = vrot.lane.b32.xlu0 %v626_v20, %s2651_s21 }
 0x176   : > { %1348 = vrot.lane.b32.xlu1 %v867_v21, %s2651_s21  ;;  %1474 = vrot.lane.b32.xlu0 %v2844_v22, %s2651_s21 }
 0x195   : > { %765 = vadd.xlane.f32.xlu0 %v764_v23 }
 0x199   : > { %993 = vadd.xlane.f32.xlu0 %v992_v24 }
 0x19a   : > { %647 = vadd.xlane.f32.xlu1 %v646_v25 }
 0x19e   : > { %879 = vadd.xlane.f32.xlu1 %v878_v26 }
 0x1af   : > { %1120 = vrot.lane.b32.xlu0 %v654_v28, %s2651_s21  ;;  %1246 = vrot.lane.b32.xlu1 %v768_v29, %s2651_s21  ;;  %v2907_v28 = vld [vmem:[%s518_s27] sm:$0xff] }
 0x1b3   : > { %1372 = vrot.lane.b32.xlu0 %v882_v30, %s2651_s21  ;;  %1498 = vrot.lane.b32.xlu1 %v996_v31, %s2651_s21 }
 0x1d2   : > { %755 = vadd.xlane.f32.xlu0 %v754_v32 }
 0x1d7   : > { %629 = vadd.xlane.f32.xlu1 %v628_v33 }
 0x1db   : > { %869 = vadd.xlane.f32.xlu1 %v868_v34 }
 0x1dc   : > { %v1113_v41 = vpop.permute.xlu0 %1112  ;;  %v1239_v43 = vpop.permute.xlu1 %1238 }
 0x1dd   : > { %v1241_v51 = vsel %vm627_vm1, %v1239_v43, 0.0  ;;  %v1115_v60 = vsel %vm627_vm1, %v1113_v41, 0.0 }
 0x1e0   : > { %v1365_v44 = vpop.permute.xlu0 %1364  ;;  %v1491_v48 = vpop.permute.xlu1 %1490 }
 0x1e1   : > { %v1493_v55 = vsel %vm627_vm1, %v1491_v48, 0.0  ;;  %v1367_v63 = vsel %vm627_vm1, %v1365_v44, 0.0 }
 0x1e4   : > { %v1097_v50 = vpop.permute.xlu0 %1096  ;;  %v1223_v53 = vpop.permute.xlu1 %1222 }
 0x1e5   : > { %v1225_v58 = vsel %vm627_vm1, %v1223_v53, 0.0  ;;  %v1099_v2 = vsel %vm627_vm1, %v1097_v50, 0.0 }
 0x1e8   : > { %1104 = vrot.lane.b32.xlu0 %v636_v36, %s2651_s21  ;;  %v1475_v54 = vpop.permute.xlu0 %1474  ;;  %v1349_v59 = vpop.permute.xlu1 %1348 }
 0x1e9   : > { %v1351_v23 = vsel %vm627_vm1, %v1349_v59, 0.0  ;;  %v1477_v29 = vsel %vm627_vm1, %v1475_v54, 0.0 }
 0x1ec   : > { %1230 = vrot.lane.b32.xlu1 %v758_v37, %s2651_s21  ;;  %1356 = vrot.lane.b32.xlu0 %v872_v38, %s2651_s21 }
 0x1f0   : > { %1482 = vrot.lane.b32.xlu1 %v986_v39, %s2651_s21  ;;  %s2655_s21 = smov 1  }
 0x20b   : > { %770 = vadd.xlane.f32.xlu0 %v769_v40 }
 0x20f   : > { %998 = vadd.xlane.f32.xlu0 %v997_v42 }
 0x213   : > { %638 = vadd.xlane.f32.xlu0 %v637_v45 }
 0x214   : > { %656 = vadd.xlane.f32.xlu1 %v655_v46 }
 0x217   : > { %988 = vadd.xlane.f32.xlu0 %v987_v47 }
 0x218   : > { %884 = vadd.xlane.f32.xlu1 %v883_v49 }
 0x21b   : > { %1242 = vadd.xlane.f32.xlu0 %v1241_v51 }
 0x21c   : > { %760 = vadd.xlane.f32.xlu1 %v759_v52 }
 0x21f   : > { %1494 = vadd.xlane.f32.xlu0 %v1493_v55 }
 0x220   : > { %874 = vadd.xlane.f32.xlu1 %v873_v56 }
 0x222   : > { %v766_v57 = vpop.xlane.xlu0 %765 }
 0x223   : > { %1226 = vadd.xlane.f32.xlu0 %v1225_v58  ;;  %v2911_v30 = vadd.f32 %v766_v57, %v2907_v28 }
 0x224   : > { %1116 = vadd.xlane.f32.xlu1 %v1115_v60 }
 0x226   : > { %v994_v61 = vpop.xlane.xlu0 %993 }
 0x227   : > { %v648_v62 = vpop.xlane.xlu1 %647  ;;  %v2916_v31 = vadd.f32 %v994_v61, %v2907_v28 }
 0x228   : > { %1368 = vadd.xlane.f32.xlu1 %v1367_v63  ;;  %v2921_v22 = vadd.f32 %v648_v62, %v2907_v28 }
 0x22a   : > { %v1121_v0 = vpop.permute.xlu0 %1120 }
 0x22b   : > { %v880_v1 = vpop.xlane.xlu1 %879  ;;  %v1123_v4 = vsel %vm627_vm1, %v1121_v0, 0.0 }
 0x22c   : > { %1100 = vadd.xlane.f32.xlu1 %v1099_v2  ;;  %v2926_v32 = vadd.f32 %v880_v1, %v2907_v28 }
 0x22e   : > { %v1373_v5 = vpop.permute.xlu0 %1372 }
 0x22f   : > { %v1247_v3 = vpop.permute.xlu1 %1246  ;;  %v1375_v10 = vsel %vm627_vm1, %v1373_v5, 0.0 }
 0x230   : > { %1124 = vadd.xlane.f32.xlu1 %v1123_v4  ;;  %v1249_v7 = vsel %vm627_vm1, %v1247_v3, 0.0 }
 0x231   : > { %1250 = vadd.xlane.f32.xlu0 %v1249_v7 }
 0x233   : > { %v1499_v9 = vpop.permute.xlu1 %1498 }
 0x234   : > { %1376 = vadd.xlane.f32.xlu1 %v1375_v10  ;;  %v1501_v13 = vsel %vm627_vm1, %v1499_v9, 0.0 }
 0x235   : > { %1502 = vadd.xlane.f32.xlu0 %v1501_v13 }
 0x25f   : > { %v2890_v14 = vpop.xlane.xlu0 %755 }
 0x263   : > { %v1105_v15 = vpop.permute.xlu0 %1104 }
 0x264   : > { %v2892_v16 = vpop.xlane.xlu1 %629  ;;  %v1107_v17 = vsel %vm627_vm1, %v1105_v15, 0.0 }
 0x265   : > { %1108 = vadd.xlane.f32.xlu0 %v1107_v17 }
 0x267   : > { %v1357_v18 = vpop.permute.xlu0 %1356 }
 0x268   : > { %v2895_v19 = vpop.xlane.xlu1 %869  ;;  %v1359_v20 = vsel %vm627_vm1, %v1357_v18, 0.0 }
 0x269   : > { %1360 = vadd.xlane.f32.xlu1 %v1359_v20 }
 0x26c   : > { %v1231_v21 = vpop.permute.xlu1 %1230 }
 0x26d   : > { %1352 = vadd.xlane.f32.xlu1 %v1351_v23  ;;  %v1233_v24 = vsel %vm627_vm1, %v1231_v21, 0.0 }
 0x26e   : > { %1234 = vadd.xlane.f32.xlu0 %v1233_v24 }
 0x270   : > { %v1483_v25 = vpop.permute.xlu1 %1482 }
 0x271   : > { %v1485_v26 = vsel %vm627_vm1, %v1483_v25, 0.0 }
 0x272   : > { %1486 = vadd.xlane.f32.xlu0 %v1485_v26 }
 0x276   : > { %983 = vadd.xlane.f32.xlu0 %v982_v27 }
 0x27a   : > { %1478 = vadd.xlane.f32.xlu0 %v1477_v29  ;;  %v3040_v29 = vadd.f32 %v2892_v16, %v2907_v28  ;;  %v3055_v16 = vadd.f32 %v2890_v14, %v2907_v28 }
 0x27e   : > { %779 = vrot.lane.b32.xlu1 %v2911_v30, %s2652_s28 }
 0x282   : > { %1007 = vrot.lane.b32.xlu1 %v2916_v31, %s2652_s28 }
 0x290   : > { %665 = vrot.lane.b32.xlu0 %v2921_v22, %s2652_s28 }
 0x294   : > { %893 = vrot.lane.b32.xlu0 %v2926_v32, %s2652_s28 }
 0x298   : > { %v771_v33 = vpop.xlane.xlu0 %770 }
 0x299   : > { %v2931_v34 = vadd.f32 %v771_v33, %v2907_v28 }
 0x29b   : > { %784 = vrot.lane.b32.xlu1 %v2931_v34, %s2653_s24 }
 0x29c   : > { %v999_v35 = vpop.xlane.xlu0 %998 }
 0x29d   : > { %v2936_v36 = vadd.f32 %v999_v35, %v2907_v28 }
 0x29f   : > { %1012 = vrot.lane.b32.xlu1 %v2936_v36, %s2653_s24 }
 0x2a0   : > { %v639_v37 = vpop.xlane.xlu0 %638 }
 0x2a1   : > { %v2941_v38 = vadd.f32 %v639_v37, %v2907_v28  ;;  %v657_v39 = vpop.xlane.xlu1 %656 }
 0x2a2   : > { %v2944_v40 = vadd.f32 %v657_v39, %v2907_v28 }
 0x2a3   : > { %660 = vrot.lane.b32.xlu1 %v2941_v38, %s2654_s17 }
 0x2a4   : > { %670 = vrot.lane.b32.xlu0 %v2944_v40, %s2653_s24  ;;  %v989_v41 = vpop.xlane.xlu0 %988 }
 0x2a5   : > { %v2951_v42 = vadd.f32 %v989_v41, %v2907_v28  ;;  %v885_v43 = vpop.xlane.xlu1 %884 }
 0x2a6   : > { %v2954_v44 = vadd.f32 %v885_v43, %v2907_v28 }
 0x2a7   : > { %1002 = vrot.lane.b32.xlu1 %v2951_v42, %s2654_s17 }
 0x2a8   : > { %898 = vrot.lane.b32.xlu0 %v2954_v44, %s2653_s24  ;;  %v1243_v45 = vpop.xlane.xlu0 %1242 }
 0x2a9   : > { %v2961_v46 = vadd.f32 %v1243_v45, %v2907_v28  ;;  %v761_v47 = vpop.xlane.xlu1 %760 }
 0x2aa   : > { %v2964_v48 = vadd.f32 %v761_v47, %v2907_v28 }
 0x2ab   : > { %1259 = vrot.lane.b32.xlu1 %v2961_v46, %s2652_s28 }
 0x2ac   : > { %774 = vrot.lane.b32.xlu0 %v2964_v48, %s2654_s17  ;;  %v1495_v49 = vpop.xlane.xlu0 %1494 }
 0x2ad   : > { %v2971_v50 = vadd.f32 %v1495_v49, %v2907_v28  ;;  %v875_v51 = vpop.xlane.xlu1 %874 }
 0x2ae   : > { %v2974_v52 = vadd.f32 %v875_v51, %v2907_v28 }
 0x2af   : > { %1511 = vrot.lane.b32.xlu1 %v2971_v50, %s2652_s28 }
 0x2b0   : > { %888 = vrot.lane.b32.xlu0 %v2974_v52, %s2654_s17  ;;  %v2992_v58 = vpop.xlane.xlu0 %1226 }
 0x2b1   : > { %v1117_v53 = vpop.xlane.xlu1 %1116 }
 0x2b2   : > { %v2981_v54 = vadd.f32 %v1117_v53, %v2907_v28 }
 0x2b4   : > { %1133 = vrot.lane.b32.xlu0 %v2981_v54, %s2652_s28 }
 0x2b5   : > { %v1369_v55 = vpop.xlane.xlu1 %1368 }
 0x2b6   : > { %v2986_v56 = vadd.f32 %v1369_v55, %v2907_v28 }
 0x2b8   : > { %1385 = vrot.lane.b32.xlu0 %v2986_v56, %s2652_s28 }
 0x2b9   : > { %v2990_v57 = vpop.xlane.xlu1 %1100 }
 0x2bd   : > { %v1125_v59 = vpop.xlane.xlu1 %1124 }
 0x2be   : > { %v2995_v60 = vadd.f32 %v1125_v59, %v2907_v28  ;;  %v1251_v61 = vpop.xlane.xlu0 %1250 }
 0x2bf   : > { %v2998_v62 = vadd.f32 %v1251_v61, %v2907_v28 }
 0x2c0   : > { %1138 = vrot.lane.b32.xlu0 %v2995_v60, %s2653_s24 }
 0x2c1   : > { %1264 = vrot.lane.b32.xlu1 %v2998_v62, %s2653_s24  ;;  %v1377_v0 = vpop.xlane.xlu1 %1376 }
 0x2c2   : > { %v1503_v63 = vpop.xlane.xlu0 %1502  ;;  %v3015_v5 = vadd.f32 %v1377_v0, %v2907_v28  ;;  %v3064_v0 = vadd.f32 %v2895_v19, %v2907_v28 }
 0x2c3   : > { %v3032_v20 = vadd.f32 %v1503_v63, %v2907_v28 }
 0x2f2   : > { %v1109_v1 = vpop.xlane.xlu0 %1108 }
 0x2f3   : > { %v3005_v2 = vadd.f32 %v1109_v1, %v2907_v28 }
 0x2f5   : > { %1128 = vrot.lane.b32.xlu1 %v3005_v2, %s2654_s17 }
 0x2f6   : > { %v1361_v3 = vpop.xlane.xlu1 %1360 }
 0x2f7   : > { %v3010_v4 = vadd.f32 %v1361_v3, %v2907_v28 }
 0x2f9   : > { %1380 = vrot.lane.b32.xlu0 %v3010_v4, %s2654_s17 }
 0x2fa   : > { %v3020_v10 = vpop.xlane.xlu1 %1352 }
 0x2fb   : > { %v1235_v7 = vpop.xlane.xlu0 %1234 }
 0x2fc   : > { %v3018_v9 = vadd.f32 %v1235_v7, %v2907_v28 }
 0x2fd   : > { %1390 = vrot.lane.b32.xlu0 %v3015_v5, %s2653_s24 }
 0x2fe   : > { %1254 = vrot.lane.b32.xlu1 %v3018_v9, %s2654_s17  ;;  %v780_v17 = vpop.permute.xlu1 %779 }
 0x2ff   : > { %v1487_v13 = vpop.xlane.xlu0 %1486 }
 0x300   : > { %v3027_v15 = vadd.f32 %v1487_v13, %v2907_v28 }
 0x302   : > { %1506 = vrot.lane.b32.xlu1 %v3027_v15, %s2654_s17  ;;  %v1008_v23 = vpop.permute.xlu1 %1007 }
 0x303   : > { %v984_v18 = vpop.xlane.xlu0 %983 }
 0x304   : > { %v3044_v39 = vadd.f32 %v984_v18, %v2907_v28 }
 0x306   : > { %1516 = vrot.lane.b32.xlu1 %v3032_v20, %s2653_s24 }
 0x307   : > { %v3036_v21 = vpop.xlane.xlu0 %1478 }
 0x30b   : > { %v666_v24 = vpop.permute.xlu0 %665 }
 0x30d   : > { %v785_v25 = vpop.permute.xlu1 %784 }
 0x30f   : > { %v894_v27 = vpop.permute.xlu0 %893 }
 0x311   : > { %v1013_v26 = vpop.permute.xlu1 %1012 }
 0x315   : > { %v661_v33 = vpop.permute.xlu1 %660 }
 0x316   : > { %v663_v35 = vmax.f32 %v3040_v29, %v661_v33  ;;  %v671_v37 = vpop.permute.xlu0 %670  ;;  %v3099_v33 = vadd.f32 %v2990_v57, %v2907_v28 }
 0x318   : > { %v668_v41 = vmax.f32 %v663_v35, %v666_v24 }
 0x319   : > { %v1003_v43 = vpop.permute.xlu1 %1002 }
 0x31a   : > { %v3046_v45 = vmax.f32 %v668_v41, %v671_v37  ;;  %v1005_v47 = vmax.f32 %v3044_v39, %v1003_v43  ;;  %v899_v49 = vpop.permute.xlu0 %898  ;;  %v3104_v43 = vadd.f32 %v3020_v10, %v2907_v28 }
 0x31c   : > { %v674_v51 = vsub.f32 %v3040_v29, %v3046_v45  ;;  %v1010_v53 = vmax.f32 %v1005_v47, %v1008_v23  ;;  %678 = vrot.lane.b32.xlu0 %v3046_v45, %s2655_s21 }
 0x31e   : > { %v3057_v55 = vmax.f32 %v1010_v53, %v1013_v26  ;;  %v775_v59 = vpop.permute.xlu0 %774 }
 0x31f   : > { %v777_v61 = vmax.f32 %v3055_v16, %v775_v59 }
 0x320   : > { %v1016_v63 = vsub.f32 %v3044_v39, %v3057_v55 }
 0x321   : > { %v782_v1 = vmax.f32 %v777_v61, %v780_v17  ;;  %v1260_v17 = vpop.permute.xlu1 %1259 }
 0x322   : > { %v889_v3 = vpop.permute.xlu0 %888 }
 0x323   : > { %v3066_v7 = vmax.f32 %v782_v1, %v785_v25  ;;  %v891_v13 = vmax.f32 %v3064_v0, %v889_v3  ;;  %v3115_v1 = vadd.f32 %v2992_v58, %v2907_v28 }
 0x325   : > { %v896_v14 = vmax.f32 %v891_v13, %v894_v27  ;;  %792 = vrot.lane.b32.xlu1 %v3066_v7, %s2655_s21  ;;  %v788_v18 = vsub.f32 %v3055_v16, %v3066_v7  ;;  %v1512_v25 = vpop.permute.xlu1 %1511 }
 0x326   : > { %v1134_v24 = vpop.permute.xlu0 %1133 }
 0x327   : > { %v3073_v23 = vmax.f32 %v896_v14, %v899_v49 }
 0x329   : > { %1020 = vrot.lane.b32.xlu1 %v3057_v55, %s2655_s21  ;;  %906 = vrot.lane.b32.xlu0 %v3073_v23, %s2655_s21  ;;  %v902_v19 = vsub.f32 %v3064_v0, %v3073_v23 }
 0x32a   : > { %v1386_v26 = vpop.permute.xlu0 %1385 }
 0x32d   : > { %798 = vrot.lane.b32.xlu1 %v3066_v7, %s2656_s19  ;;  %684 = vrot.lane.b32.xlu0 %v3046_v45, %s2656_s19 }
 0x331   : > { %1026 = vrot.lane.b32.xlu1 %v3057_v55, %s2656_s19  ;;  %912 = vrot.lane.b32.xlu0 %v3073_v23, %s2656_s19 }
 0x332   : > { %v1139_v35 = vpop.permute.xlu0 %1138 }
 0x333   : > { %v1265_v27 = vpop.permute.xlu1 %1264 }
 0x335   : > { %804 = vrot.lane.b32.xlu1 %v3066_v7, %s2657_s20  ;;  %690 = vrot.lane.b32.xlu0 %v3046_v45, %s2657_s20 }
 0x339   : > { %1032 = vrot.lane.b32.xlu1 %v3057_v55, %s2657_s20  ;;  %918 = vrot.lane.b32.xlu0 %v3073_v23, %s2657_s20 }
 0x367   : > { %v1129_v37 = vpop.permute.xlu1 %1128 }
 0x368   : > { %v1131_v41 = vmax.f32 %v3099_v33, %v1129_v37 }
 0x36a   : > { %v1136_v47 = vmax.f32 %v1131_v41, %v1134_v24 }
 0x36b   : > { %v1381_v49 = vpop.permute.xlu0 %1380 }
 0x36c   : > { %v3106_v53 = vmax.f32 %v1136_v47, %v1139_v35  ;;  %v1383_v59 = vmax.f32 %v3104_v43, %v1381_v49 }
 0x36e   : > { %1146 = vrot.lane.b32.xlu0 %v3106_v53, %s2655_s21  ;;  %v1388_v61 = vmax.f32 %v1383_v59, %v1386_v26  ;;  %v1142_v57 = vsub.f32 %v3099_v33, %v3106_v53  ;;  %v3126_v26 = vadd.f32 %v3036_v21, %v2907_v28 }
 0x36f   : > { %v1391_v3 = vpop.permute.xlu0 %1390 }
 0x370   : > { %v3117_v10 = vmax.f32 %v1388_v61, %v1391_v3  ;;  %v1255_v13 = vpop.permute.xlu1 %1254 }
 0x371   : > { %v1257_v14 = vmax.f32 %v3115_v1, %v1255_v13 }
 0x372   : > { %1398 = vrot.lane.b32.xlu0 %v3117_v10, %s2655_s21 }
 0x373   : > { %v1262_v35 = vmax.f32 %v1257_v14, %v1260_v17 }
 0x374   : > { %v1507_v37 = vpop.permute.xlu1 %1506 }
 0x375   : > { %v3128_v58 = vmax.f32 %v1262_v35, %v1265_v27  ;;  %v1509_v41 = vmax.f32 %v3126_v26, %v1507_v37 }
 0x376   : > { %1152 = vrot.lane.b32.xlu0 %v3106_v53, %s2656_s19 }
 0x377   : > { %1272 = vrot.lane.b32.xlu1 %v3128_v58, %s2655_s21  ;;  %v1514_v47 = vmax.f32 %v1509_v41, %v1512_v25 }
 0x378   : > { %v1517_v59 = vpop.permute.xlu1 %1516 }
 0x379   : > { %v3137_v61 = vmax.f32 %v1514_v47, %v1517_v59 }
 0x37a   : > { %1404 = vrot.lane.b32.xlu0 %v3117_v10, %s2656_s19 }
 0x37b   : > { %1524 = vrot.lane.b32.xlu1 %v3137_v61, %s2655_s21 }
 0x37e   : > { %1158 = vrot.lane.b32.xlu0 %v3106_v53, %s2657_s20 }
 0x37f   : > { %1278 = vrot.lane.b32.xlu1 %v3128_v58, %s2656_s19 }
 0x382   : > { %1410 = vrot.lane.b32.xlu0 %v3117_v10, %s2657_s20 }
 0x383   : > { %1530 = vrot.lane.b32.xlu1 %v3137_v61, %s2656_s19 }
 0x387   : > { %1284 = vrot.lane.b32.xlu1 %v3128_v58, %s2657_s20 }
 0x38b   : > { %1536 = vrot.lane.b32.xlu1 %v3137_v61, %s2657_s20 }
 0x38e   : > { %v679_v21 = vpop.permute.xlu0 %678 }
 0x38f   : > { %v681_v17 = vsub.f32 %v2941_v38, %v679_v21 }
 0x391   : > { %v682_v25 = vmul.f32 1.442695, %v681_v17 }
 0x393   : > { %2468 = vpow2.f32 %v682_v25 }
 0x397   : > { %v793_v27 = vpop.permute.xlu1 %792 }
 0x398   : > { %v795_v3 = vsub.f32 %v2964_v48, %v793_v27 }
 0x39a   : > { %v796_v13 = vmul.f32 1.442695, %v795_v3 }
 0x39b   : > { %v1021_v14 = vpop.permute.xlu1 %1020  ;;  %v907_v35 = vpop.permute.xlu0 %906 }
 0x39c   : > { %2470 = vpow2.f32 %v796_v13  ;;  %v1023_v37 = vsub.f32 %v2951_v42, %v1021_v14  ;;  %v909_v41 = vsub.f32 %v2974_v52, %v907_v35 }
 0x39d   : > { %v3161_v47 = vpop.eup %2468 }
 0x39e   : > { %v1024_v59 = vmul.f32 1.442695, %v1023_v37  ;;  %v910_v28 = vmul.f32 1.442695, %v909_v41  ;;  %697 = vrot.lane.b32.xlu0 %v3161_v47, %s2654_s17 }
 0x39f   : > { %v799_v38 = vpop.permute.xlu1 %798  ;;  %v685_v21 = vpop.permute.xlu0 %684 }
 0x3a0   : > { %2472 = vpow2.f32 %v1024_v59  ;;  %v801_v48 = vsub.f32 %v2911_v30, %v799_v38  ;;  %v687_v17 = vsub.f32 %v2921_v22, %v685_v21 }
 0x3a1   : > { %2474 = vpow2.f32 %v910_v28 }
 0x3a2   : > { %v802_v25 = vmul.f32 1.442695, %v801_v48  ;;  %v688_v27 = vmul.f32 1.442695, %v687_v17 }
 0x3a3   : > { %v1027_v42 = vpop.permute.xlu1 %1026  ;;  %v913_v3 = vpop.permute.xlu0 %912 }
 0x3a4   : > { %2476 = vpow2.f32 %v802_v25  ;;  %v1029_v52 = vsub.f32 %v2916_v31, %v1027_v42  ;;  %v915_v13 = vsub.f32 %v2926_v32, %v913_v3 }
 0x3a5   : > { %2478 = vpow2.f32 %v688_v27 }
 0x3a6   : > { %v3169_v14 = vpop.eup %2470  ;;  %v1030_v35 = vmul.f32 1.442695, %v1029_v52  ;;  %v916_v37 = vmul.f32 1.442695, %v915_v13 }
 0x3a7   : > { %811 = vrot.lane.b32.xlu1 %v3169_v14, %s2654_s17  ;;  %v805_v30 = vpop.permute.xlu1 %804  ;;  %v691_v22 = vpop.permute.xlu0 %690 }
 0x3a8   : > { %2480 = vpow2.f32 %v1030_v35  ;;  %v807_v28 = vsub.f32 %v2931_v34, %v805_v30  ;;  %v693_v41 = vsub.f32 %v2944_v40, %v691_v22 }
 0x3a9   : > { %2482 = vpow2.f32 %v916_v37  ;;  %v3590_v37 = vmov 0  }
 0x3aa   : > { %v3175_v59 = vpop.eup %2472  ;;  %v808_v31 = vmul.f32 1.442695, %v807_v28  ;;  %v694_v32 = vmul.f32 1.442695, %v693_v41  ;;  %2411 = vset.pattern.permute.xlu1 %v3590_v37  ;;  %2410 = vset.pattern.permute.xlu0 %v3590_v37 }
 0x3ab   : > { %v3177_v38 = vpop.eup %2474  ;;  %1039 = vrot.lane.b32.xlu1 %v3175_v59, %s2654_s17  ;;  %v1033_v21 = vpop.permute.xlu1 %1032 }
 0x3ac   : > { %v919_v48 = vpop.permute.xlu0 %918  ;;  %2484 = vpow2.f32 %v808_v31  ;;  %v1035_v17 = vsub.f32 %v2936_v36, %v1033_v21  ;;  %925 = vrot.lane.b32.xlu0 %v3177_v38, %s2654_s17 }
 0x3ad   : > { %v921_v34 = vsub.f32 %v2954_v44, %v919_v48  ;;  %2486 = vpow2.f32 %v694_v32 }
 0x3ae   : > { %v3185_v40 = vpop.eup %2476  ;;  %v1036_v25 = vmul.f32 1.442695, %v1035_v17 }
 0x3af   : > { %v922_v27 = vmul.f32 1.442695, %v921_v34  ;;  %v3187_v42 = vpop.eup %2478  ;;  %816 = vrot.lane.b32.xlu1 %v3185_v40, %s2652_s28 }
 0x3b0   : > { %2488 = vpow2.f32 %v1036_v25  ;;  %702 = vrot.lane.b32.xlu0 %v3187_v42, %s2652_s28 }
 0x3b1   : > { %2490 = vpow2.f32 %v922_v27 }
 0x3b2   : > { %v3193_v36 = vpop.eup %2480 }
 0x3b3   : > { %v3195_v3 = vpop.eup %2482  ;;  %1044 = vrot.lane.b32.xlu1 %v3193_v36, %s2652_s28 }
 0x3b4   : > { %930 = vrot.lane.b32.xlu0 %v3195_v3, %s2652_s28 }
 0x3b6   : > { %v3201_v44 = vpop.eup %2484 }
 0x3b7   : > { %v3203_v52 = vpop.eup %2486  ;;  %821 = vrot.lane.b32.xlu1 %v3201_v44, %s2653_s24 }
 0x3b8   : > { %707 = vrot.lane.b32.xlu0 %v3203_v52, %s2653_s24 }
 0x3ba   : > { %v3209_v13 = vpop.eup %2488 }
 0x3bb   : > { %v3211_v35 = vpop.eup %2490  ;;  %1049 = vrot.lane.b32.xlu1 %v3209_v13, %s2653_s24 }
 0x3bc   : > { %935 = vrot.lane.b32.xlu0 %v3211_v35, %s2653_s24 }
 0x3e0   : > { %v1147_v30 = vpop.permute.xlu0 %1146 }
 0x3e1   : > { %v1149_v22 = vsub.f32 %v3005_v2, %v1147_v30 }
 0x3e3   : > { %v1150_v28 = vmul.f32 1.442695, %v1149_v22 }
 0x3e4   : > { %v1399_v41 = vpop.permute.xlu0 %1398 }
 0x3e5   : > { %2492 = vpow2.f32 %v1150_v28  ;;  %v1401_v31 = vsub.f32 %v3010_v4, %v1399_v41 }
 0x3e7   : > { %v1402_v32 = vmul.f32 1.442695, %v1401_v31 }
 0x3e8   : > { %v1153_v21 = vpop.permute.xlu0 %1152 }
 0x3e9   : > { %2494 = vpow2.f32 %v1402_v32  ;;  %v1155_v48 = vsub.f32 %v2981_v54, %v1153_v21  ;;  %v1273_v17 = vpop.permute.xlu1 %1272 }
 0x3ea   : > { %v1275_v34 = vsub.f32 %v3018_v9, %v1273_v17 }
 0x3eb   : > { %v1156_v25 = vmul.f32 1.442695, %v1155_v48 }
 0x3ec   : > { %v1276_v27 = vmul.f32 1.442695, %v1275_v34  ;;  %v1405_v49 = vpop.permute.xlu0 %1404 }
 0x3ed   : > { %2496 = vpow2.f32 %v1156_v25  ;;  %v1407_v37 = vsub.f32 %v2986_v56, %v1405_v49  ;;  %v1525_v2 = vpop.permute.xlu1 %1524 }
 0x3ee   : > { %2498 = vpow2.f32 %v1276_v27  ;;  %v1527_v30 = vsub.f32 %v3027_v15, %v1525_v2 }
 0x3ef   : > { %v3225_v22 = vpop.eup %2492  ;;  %v1408_v4 = vmul.f32 1.442695, %v1407_v37 }
 0x3f0   : > { %v1528_v28 = vmul.f32 1.442695, %v1527_v30  ;;  %1165 = vrot.lane.b32.xlu0 %v3225_v22, %s2654_s17  ;;  %v1159_v54 = vpop.permute.xlu0 %1158 }
 0x3f1   : > { %2500 = vpow2.f32 %v1408_v4  ;;  %v1161_v9 = vsub.f32 %v2995_v60, %v1159_v54  ;;  %v1279_v41 = vpop.permute.xlu1 %1278 }
 0x3f2   : > { %2502 = vpow2.f32 %v1528_v28  ;;  %v1281_v31 = vsub.f32 %v2961_v46, %v1279_v41 }
 0x3f3   : > { %v3231_v56 = vpop.eup %2494  ;;  %v1162_v49 = vmul.f32 1.442695, %v1161_v9 }
 0x3f4   : > { %v1282_v32 = vmul.f32 1.442695, %v1281_v31  ;;  %1417 = vrot.lane.b32.xlu0 %v3231_v56, %s2654_s17  ;;  %v1411_v15 = vpop.permute.xlu0 %1410 }
 0x3f5   : > { %2504 = vpow2.f32 %v1162_v49  ;;  %v1413_v37 = vsub.f32 %v3015_v5, %v1411_v15  ;;  %v1531_v21 = vpop.permute.xlu1 %1530  ;;  %v789_v49 = vmul.f32 1.442695, %v788_v18 }
 0x3f6   : > { %2506 = vpow2.f32 %v1282_v32  ;;  %v1533_v48 = vsub.f32 %v2971_v50, %v1531_v21  ;;  %v675_v32 = vmul.f32 1.442695, %v674_v51  ;;  %v1017_v21 = vmul.f32 1.442695, %v1016_v63 }
 0x3f7   : > { %v3237_v60 = vpop.eup %2496  ;;  %v1414_v17 = vmul.f32 1.442695, %v1413_v37 }
 0x3f8   : > { %v3239_v34 = vpop.eup %2498  ;;  %v1534_v46 = vmul.f32 1.442695, %v1533_v48  ;;  %1170 = vrot.lane.b32.xlu0 %v3237_v60, %s2652_s28  ;;  %v903_v48 = vmul.f32 1.442695, %v902_v19 }
 0x3f9   : > { %2508 = vpow2.f32 %v1414_v17  ;;  %1291 = vrot.lane.b32.xlu1 %v3239_v34, %s2654_s17  ;;  %v1285_v25 = vpop.permute.xlu1 %1284 }
 0x3fa   : > { %2510 = vpow2.f32 %v1534_v46  ;;  %v1287_v5 = vsub.f32 %v2998_v62, %v1285_v25 }
 0x3fb   : > { %v3246_v27 = vpop.eup %2500 }
 0x3fc   : > { %v3248_v50 = vpop.eup %2502  ;;  %v1288_v2 = vmul.f32 1.442695, %v1287_v5  ;;  %1422 = vrot.lane.b32.xlu0 %v3246_v27, %s2652_s28 }
 0x3fd   : > { %1543 = vrot.lane.b32.xlu1 %v3248_v50, %s2654_s17  ;;  %v1537_v30 = vpop.permute.xlu1 %1536 }
 0x3fe   : > { %2512 = vpow2.f32 %v1288_v2  ;;  %v1539_v4 = vsub.f32 %v3032_v20, %v1537_v30 }
 0x3ff   : > { %v3255_v28 = vpop.eup %2504 }
 0x400   : > { %v3257_v54 = vpop.eup %2506  ;;  %v1540_v62 = vmul.f32 1.442695, %v1539_v4  ;;  %1175 = vrot.lane.b32.xlu0 %v3255_v28, %s2653_s24 }
 0x401   : > { %1296 = vrot.lane.b32.xlu1 %v3257_v54, %s2652_s28 }
 0x402   : > { %2514 = vpow2.f32 %v1540_v62 }
 0x403   : > { %v3263_v9 = vpop.eup %2508  ;;  %2516 = vpow2.f32 %v789_v49 }
 0x404   : > { %v3265_v41 = vpop.eup %2510  ;;  %1427 = vrot.lane.b32.xlu0 %v3263_v9, %s2653_s24  ;;  %2518 = vpow2.f32 %v675_v32 }
 0x405   : > { %1548 = vrot.lane.b32.xlu1 %v3265_v41, %s2652_s28  ;;  %2520 = vpow2.f32 %v1017_v21  ;;  %s2274_s28 = sshll.u32 %s2640_s16, 8 }
 0x406   : > { %2522 = vpow2.f32 %v903_v48 }
 0x408   : > { %v3271_v20 = vpop.eup %2512 }
 0x409   : > { %1301 = vrot.lane.b32.xlu1 %v3271_v20, %s2653_s24 }
 0x40c   : > { %v3275_v31 = vpop.eup %2514 }
 0x40d   : > { %1553 = vrot.lane.b32.xlu1 %v3275_v31, %s2653_s24  ;;  %v2517_v29 = vpop.eup %2516 }
 0x40e   : > { %v2519_v51 = vpop.eup %2518 }
 0x40f   : > { %v2521_v39 = vpop.eup %2520 }
 0x410   : > { %v698_v37 = vpop.permute.xlu0 %697  ;;  %v2523_v30 = vpop.eup %2522 }
 0x411   : > { %v700_v5 = vadd.f32 %v2519_v51, %v698_v37 }
 0x419   : > { %v812_v15 = vpop.permute.xlu1 %811 }
 0x41a   : > { %v814_v18 = vadd.f32 %v2517_v29, %v812_v15 }
 0x41d   : > { %v1040_v17 = vpop.permute.xlu1 %1039 }
 0x41e   : > { %v926_v46 = vpop.permute.xlu0 %925  ;;  %v1042_v4 = vadd.f32 %v2521_v39, %v1040_v17 }
 0x41f   : > { %v928_v19 = vadd.f32 %v2523_v30, %v926_v46 }
 0x421   : > { %v817_v16 = vpop.permute.xlu1 %816 }
 0x422   : > { %v703_v7 = vpop.permute.xlu0 %702  ;;  %v819_v2 = vadd.f32 %v817_v16, %v814_v18  ;;  %v2659_v18 = vmov 1  }
 0x423   : > { %v705_v55 = vadd.f32 %v703_v7, %v700_v5  ;;  %v1143_v5 = vmul.f32 1.442695, %v1142_v57 }
 0x425   : > { %v1045_v45 = vpop.permute.xlu1 %1044 }
 0x426   : > { %v931_v25 = vpop.permute.xlu0 %930  ;;  %v1047_v49 = vadd.f32 %v1045_v45, %v1042_v4 }
 0x427   : > { %v933_v32 = vadd.f32 %v931_v25, %v928_v19 }
 0x429   : > { %v822_v63 = vpop.permute.xlu1 %821 }
 0x42a   : > { %v824_v0 = vadd.f32 %v822_v63, %v819_v2  ;;  %v708_v23 = vpop.permute.xlu0 %707  ;;  %v3601_v63 = vsub.f32 %v3115_v1, %v3128_v58 }
 0x42b   : > { %v710_v62 = vadd.f32 %v708_v23, %v705_v55 }
 0x42c   : > { %2524 = vrcp.f32 %v824_v0  ;;  %v3602_v0 = vsub.f32 %v3126_v26, %v3137_v61 }
 0x42d   : > { %2526 = vrcp.f32 %v710_v62  ;;  %v1050_v21 = vpop.permute.xlu1 %1049 }
 0x42e   : > { %v1052_v48 = vadd.f32 %v1050_v21, %v1047_v49  ;;  %v936_v24 = vpop.permute.xlu0 %935  ;;  %v1521_v23 = vmul.f32 1.442695, %v3602_v0 }
 0x42f   : > { %v938_v15 = vadd.f32 %v936_v24, %v933_v32 }
 0x430   : > { %2528 = vrcp.f32 %v1052_v48 }
 0x431   : > { %2530 = vrcp.f32 %v938_v15 }
 0x432   : > { %2532 = vpow2.f32 %v1143_v5 }
 0x436   : > { %v2525_v37 = vpop.eup %2524 }
 0x437   : > { %v2527_v16 = vpop.eup %2526  ;;  %834 = vrot.lane.b32.xlu1 %v2525_v37, %s2655_s21  ;;  %v826_v24 = vmul.f32 %v2525_v37, %v2517_v29  ;;  %v3600_v29 = vsub.f32 %v3104_v43, %v3117_v10 }
 0x438   : > { %720 = vrot.lane.b32.xlu0 %v2527_v16, %s2655_s21  ;;  %v712_v46 = vmul.f32 %v2527_v16, %v2519_v51 }
 0x439   : > { %v1395_v51 = vmul.f32 1.442695, %v3600_v29 }
 0x43a   : > { %v2529_v17 = vpop.eup %2528 }
 0x43b   : > { %v2531_v7 = vpop.eup %2530  ;;  %1062 = vrot.lane.b32.xlu1 %v2529_v17, %s2655_s21  ;;  %v1054_v25 = vmul.f32 %v2529_v17, %v2521_v39  ;;  %2534 = vpow2.f32 %v1395_v51 }
 0x43c   : > { %948 = vrot.lane.b32.xlu0 %v2531_v7, %s2655_s21  ;;  %v940_v45 = vmul.f32 %v2531_v7, %v2523_v30  ;;  %v1269_v30 = vmul.f32 1.442695, %v3601_v63  ;;  %v2533_v33 = vpop.eup %2532 }
 0x43e   : > { %2536 = vpow2.f32 %v1269_v30 }
 0x43f   : > { %845 = vrot.lane.b32.xlu1 %v2525_v37, %s2656_s19  ;;  %2538 = vpow2.f32 %v1521_v23 }
 0x440   : > { %731 = vrot.lane.b32.xlu0 %v2527_v16, %s2656_s19 }
 0x443   : > { %1073 = vrot.lane.b32.xlu1 %v2529_v17, %s2656_s19 }
 0x444   : > { %959 = vrot.lane.b32.xlu0 %v2531_v7, %s2656_s19 }
 0x445   : > { %v2535_v10 = vpop.eup %2534 }
 0x447   : > { %856 = vrot.lane.b32.xlu1 %v2525_v37, %s2657_s20 }
 0x448   : > { %742 = vrot.lane.b32.xlu0 %v2527_v16, %s2657_s20  ;;  %v2537_v48 = vpop.eup %2536 }
 0x449   : > { %v2539_v16 = vpop.eup %2538 }
 0x44b   : > { %1084 = vrot.lane.b32.xlu1 %v2529_v17, %s2657_s20 }
 0x44c   : > { %970 = vrot.lane.b32.xlu0 %v2531_v7, %s2657_s20 }
 0x44f   : > { %829 = vperm.xlu1 %2411, %v826_v24  }
 0x450   : > { %715 = vperm.xlu0 %2410, %v712_v46  }
 0x453   : > { %943 = vperm.xlu1 %2411, %v940_v45  }
 0x454   : > { %2413 = vset.pattern.permute.xlu0 %v2659_v18 }
 0x457   : > { %1057 = vperm.xlu1 %2411, %v1054_v25  }
 0x45b   : > { %2412 = vset.pattern.permute.xlu1 %v2659_v18 }
 0x462   : > { %v1166_v2 = vpop.permute.xlu0 %1165 }
 0x463   : > { %v1168_v57 = vadd.f32 %v2533_v33, %v1166_v2 }
 0x466   : > { %v1418_v55 = vpop.permute.xlu0 %1417 }
 0x467   : > { %v1420_v49 = vadd.f32 %v2535_v10, %v1418_v55 }
 0x46a   : > { %v1171_v39 = vpop.permute.xlu0 %1170 }
 0x46b   : > { %v1292_v4 = vpop.permute.xlu1 %1291  ;;  %v1173_v43 = vadd.f32 %v1171_v39, %v1168_v57 }
 0x46c   : > { %v1294_v26 = vadd.f32 %v2537_v48, %v1292_v4 }
 0x46e   : > { %v1423_v53 = vpop.permute.xlu0 %1422 }
 0x46f   : > { %v1544_v19 = vpop.permute.xlu1 %1543  ;;  %v1425_v1 = vadd.f32 %v1423_v53, %v1420_v49 }
 0x470   : > { %v1546_v7 = vadd.f32 %v2539_v16, %v1544_v19  ;;  %v3603_v19 = vmov 0  }
 0x472   : > { %v1176_v62 = vpop.permute.xlu0 %1175 }
 0x473   : > { %v1178_v32 = vadd.f32 %v1176_v62, %v1173_v43  ;;  %v1297_v21 = vpop.permute.xlu1 %1296 }
 0x474   : > { %v1299_v61 = vadd.f32 %v1297_v21, %v1294_v26 }
 0x475   : > { %2540 = vrcp.f32 %v1178_v32 }
 0x476   : > { %v1428_v58 = vpop.permute.xlu0 %1427 }
 0x477   : > { %v1430_v15 = vadd.f32 %v1428_v58, %v1425_v1  ;;  %v1549_v37 = vpop.permute.xlu1 %1548 }
 0x478   : > { %v1551_v46 = vadd.f32 %v1549_v37, %v1546_v7  ;;  %v2661_v37 = vmov 3  }
 0x479   : > { %2542 = vrcp.f32 %v1430_v15 }
 0x47b   : > { %v1302_v17 = vpop.permute.xlu1 %1301 }
 0x47c   : > { %v1304_v24 = vadd.f32 %v1302_v17, %v1299_v61 }
 0x47e   : > { %2544 = vrcp.f32 %v1304_v24 }
 0x47f   : > { %v2541_v45 = vpop.eup %2540  ;;  %v1554_v25 = vpop.permute.xlu1 %1553 }
 0x480   : > { %v1556_v5 = vadd.f32 %v1554_v25, %v1551_v46  ;;  %1188 = vrot.lane.b32.xlu0 %v2541_v45, %s2655_s21  ;;  %v1180_v2 = vmul.f32 %v2541_v45, %v2533_v33 }
 0x482   : > { %2546 = vrcp.f32 %v1556_v5 }
 0x483   : > { %v2543_v29 = vpop.eup %2542 }
 0x484   : > { %1440 = vrot.lane.b32.xlu0 %v2543_v29, %s2655_s21  ;;  %v1432_v51 = vmul.f32 %v2543_v29, %v2535_v10 }
 0x488   : > { %v2545_v55 = vpop.eup %2544  ;;  %1199 = vrot.lane.b32.xlu0 %v2541_v45, %s2656_s19 }
 0x489   : > { %1314 = vrot.lane.b32.xlu1 %v2545_v55, %s2655_s21  ;;  %v1306_v63 = vmul.f32 %v2545_v55, %v2537_v48 }
 0x48c   : > { %v2547_v30 = vpop.eup %2546  ;;  %1451 = vrot.lane.b32.xlu0 %v2543_v29, %s2656_s19 }
 0x48d   : > { %1566 = vrot.lane.b32.xlu1 %v2547_v30, %s2655_s21  ;;  %v1558_v39 = vmul.f32 %v2547_v30, %v2539_v16  ;;  %s501_s21 = sand.u32 1, %s2632_s30  }
 0x48e   : > { %s3525_s16 = scalar_lea.sflag [#allocation3], %s501_s21 }
 0x490   : > { %1210 = vrot.lane.b32.xlu0 %v2541_v45, %s2657_s20 }
 0x491   : > { %1325 = vrot.lane.b32.xlu1 %v2545_v55, %s2656_s19 }
 0x494   : > { %1462 = vrot.lane.b32.xlu0 %v2543_v29, %s2657_s20 }
 0x495   : > { %1577 = vrot.lane.b32.xlu1 %v2547_v30, %s2656_s19 }
 0x499   : > { %1336 = vrot.lane.b32.xlu1 %v2545_v55, %s2657_s20 }
 0x49d   : > { %1588 = vrot.lane.b32.xlu1 %v2547_v30, %s2657_s20  ;;  %s2226_s20 = sshll.u32 %s501_s21, 4 }
 0x49e   : > { %s503_s27 = scalar_lea.vmem [#allocation2], %s2226_s20 }
 0x49f   : > { %s2128_s24 = sshll.u32 %s503_s27, 4  ;;  %s3520_s24 = int_to_ptr.vmem [resolvable:$true] %s2128_s24 }
 0x4a0   : > { %s2570_s20 = scalar_lea.vmem %s3520_s24, 256 }
 0x4a1   : > { %p2571_p12 = scmp.ne.s32.totalorder %s3520_s24, %s2570_s20 }
 0x4a3   : > { %p2572_p13 = pnand %p2571_p12, %p2780_p4 }
 0x4a5   : > { %p2573_p0 = pneg %p2572_p13 }
 0x4a9   : > { %v835_v4 = vpop.permute.xlu1 %834 }
 0x4aa   : > { %v837_v0 = vmul.f32 %v3169_v14, %v835_v4  ;;  %v721_v23 = vpop.permute.xlu0 %720 }
 0x4ab   : > { %v723_v33 = vmul.f32 %v3161_v47, %v721_v23 }
 0x4ac   : > { %840 = vperm.xlu0 %2413, %v837_v0  }
 0x4ad   : > { %726 = vperm.xlu1 %2412, %v723_v33   ;;  %v1063_v53 = vpop.permute.xlu1 %1062 }
 0x4ae   : > { %v949_v57 = vpop.permute.xlu0 %948  ;;  %v1065_v49 = vmul.f32 %v3175_v59, %v1063_v53  ;;  %v2660_v59 = vmov 2  }
 0x4af   : > { %v951_v10 = vmul.f32 %v3177_v38, %v949_v57 }
 0x4b0   : > { %2415 = vset.pattern.permute.xlu0 %v3603_v19 }
 0x4b1   : > { %2414 = vset.pattern.permute.xlu1 %v3603_v19  ;;  %1309 = vperm.xlu0 %2415, %v1306_v63   ;;  %v846_v62 = vpop.permute.xlu1 %845 }
 0x4b2   : > { %1183 = vperm.xlu1 %2414, %v1180_v2   ;;  %v732_v43 = vpop.permute.xlu0 %731  ;;  %v848_v58 = vmul.f32 %v3185_v40, %v846_v62 }
 0x4b3   : > { %v734_v21 = vmul.f32 %v3187_v42, %v732_v43 }
 0x4b5   : > { %2416 = vset.pattern.permute.xlu0 %v2659_v18  ;;  %v1074_v14 = vpop.permute.xlu1 %1073 }
 0x4b6   : > { %2417 = vset.pattern.permute.xlu1 %v2659_v18  ;;  %954 = vperm.xlu0 %2416, %v951_v10   ;;  %v960_v47 = vpop.permute.xlu0 %959  ;;  %v1076_v32 = vmul.f32 %v3193_v36, %v1074_v14 }
 0x4b7   : > { %1068 = vperm.xlu1 %2417, %v1065_v49   ;;  %v962_v36 = vmul.f32 %v3195_v3, %v960_v47 }
 0x4b9   : > { %v857_v1 = vpop.permute.xlu1 %856 }
 0x4ba   : > { %2418 = vset.pattern.permute.xlu0 %v3603_v19  ;;  %v743_v38 = vpop.permute.xlu0 %742  ;;  %v859_v48 = vmul.f32 %v3201_v44, %v857_v1 }
 0x4bb   : > { %2419 = vset.pattern.permute.xlu1 %v3603_v19  ;;  %1435 = vperm.xlu0 %2418, %v1432_v51   ;;  %v745_v42 = vmul.f32 %v3203_v52, %v743_v38 }
 0x4bc   : > { %1561 = vperm.xlu1 %2419, %v1558_v39  }
 0x4bd   : > { %v1085_v61 = vpop.permute.xlu1 %1084 }
 0x4be   : > { %v971_v15 = vpop.permute.xlu0 %970  ;;  %v1087_v40 = vmul.f32 %v3209_v13, %v1085_v61 }
 0x4bf   : > { %2421 = vset.pattern.permute.xlu0 %v2660_v59  ;;  %v973_v26 = vmul.f32 %v3211_v35, %v971_v15 }
 0x4c0   : > { %2420 = vset.pattern.permute.xlu1 %v2660_v59  ;;  %1079 = vperm.xlu0 %2421, %v1076_v32  }
 0x4c1   : > { %737 = vperm.xlu1 %2420, %v734_v21  }
 0x4c4   : > { %2423 = vset.pattern.permute.xlu0 %v2661_v37 }
 0x4c5   : > { %851 = vperm.xlu1 %2420, %v848_v58   ;;  %862 = vperm.xlu0 %2423, %v859_v48  }
 0x4c9   : > { %965 = vperm.xlu1 %2420, %v962_v36   ;;  %976 = vperm.xlu0 %2423, %v973_v26  }
 0x4cd   : > { %2422 = vset.pattern.permute.xlu1 %v2661_v37  ;;  %2425 = vset.pattern.permute.xlu0 %v2659_v18 }
 0x4ce   : > { %748 = vperm.xlu1 %2422, %v745_v42   ;;  %v830_v44 = vpop.permute.xlu1 %829 }
 0x4cf   : > { %v716_v16 = vpop.permute.xlu0 %715  ;;  %v832_v62 = vmul.f32 %v830_v44, %v2820_v8 }
 0x4d0   : > { %v718_v14 = vmul.f32 %v716_v16, %v2820_v8 }
 0x4d2   : > { %1090 = vperm.xlu1 %2422, %v1087_v40   ;;  %v3349_v17 = vpop.permute.xlu1 %943 }
 0x4d6   : > { %2424 = vset.pattern.permute.xlu1 %v2659_v18  ;;  %v3352_v52 = vpop.permute.xlu1 %1057 }
 0x4d7   : > { %v1060_v36 = vmul.f32 %v3352_v52, %v2820_v8 }
 0x4f2   : > { %v1189_v3 = vpop.permute.xlu0 %1188 }
 0x4f3   : > { %v1191_v35 = vmul.f32 %v3225_v22, %v1189_v3 }
 0x4f5   : > { %1194 = vperm.xlu1 %2424, %v1191_v35  }
 0x4f6   : > { %v1441_v7 = vpop.permute.xlu0 %1440 }
 0x4f7   : > { %v1443_v18 = vmul.f32 %v3231_v56, %v1441_v7 }
 0x4fa   : > { %v1200_v24 = vpop.permute.xlu0 %1199 }
 0x4fb   : > { %v1315_v46 = vpop.permute.xlu1 %1314  ;;  %v1202_v29 = vmul.f32 %v3237_v60, %v1200_v24 }
 0x4fc   : > { %v1317_v45 = vmul.f32 %v3239_v34, %v1315_v46 }
 0x4fe   : > { %1320 = vperm.xlu1 %2424, %v1317_v45   ;;  %v1452_v13 = vpop.permute.xlu0 %1451 }
 0x4ff   : > { %v1567_v25 = vpop.permute.xlu1 %1566  ;;  %v1454_v63 = vmul.f32 %v3246_v27, %v1452_v13 }
 0x500   : > { %v1569_v5 = vmul.f32 %v3248_v50, %v1567_v25 }
 0x502   : > { %1572 = vperm.xlu0 %2425, %v1569_v5   ;;  %1446 = vperm.xlu1 %2424, %v1443_v18   ;;  %v1211_v51 = vpop.permute.xlu0 %1210 }
 0x503   : > { %v1326_v2 = vpop.permute.xlu1 %1325  ;;  %v1213_v30 = vmul.f32 %v3255_v28, %v1211_v51 }
 0x504   : > { %v1328_v22 = vmul.f32 %v3257_v54, %v1326_v2 }
 0x506   : > { %2426 = vset.pattern.permute.xlu0 %v2660_v59  ;;  %2427 = vset.pattern.permute.xlu1 %v2660_v59  ;;  %v1463_v56 = vpop.permute.xlu0 %1462  ;;  %v946_v59 = vmul.f32 %v3349_v17, %v2820_v8 }
 0x507   : > { %v1578_v55 = vpop.permute.xlu1 %1577  ;;  %1331 = vperm.xlu1 %2427, %v1328_v22   ;;  %1205 = vperm.xlu0 %2426, %v1202_v29   ;;  %v1465_v54 = vmul.f32 %v3263_v9, %v1463_v56 }
 0x508   : > { %v1580_v34 = vmul.f32 %v3265_v41, %v1578_v55 }
 0x50b   : > { %1583 = vperm.xlu0 %2426, %v1580_v34   ;;  %1457 = vperm.xlu1 %2427, %v1454_v63   ;;  %v1337_v50 = vpop.permute.xlu1 %1336 }
 0x50c   : > { %v1339_v60 = vmul.f32 %v3271_v20, %v1337_v50 }
 0x50f   : > { %2429 = vset.pattern.permute.xlu0 %v2661_v37  ;;  %2428 = vset.pattern.permute.xlu1 %v2661_v37  ;;  %v1589_v39 = vpop.permute.xlu1 %1588 }
 0x510   : > { %1216 = vperm.xlu1 %2428, %v1213_v30   ;;  %1468 = vperm.xlu0 %2429, %v1465_v54   ;;  %v1591_v41 = vmul.f32 %v3275_v31, %v1589_v39  ;;  %v2454_v30 = vld [vmem:[%s3577_s4] sm:$0xff]  }
 0x511   : > { %2305 = vmatprep.subr.bf16.mxu0 %v2454_v30 }
 0x512   : > { %2306 = vmatpush3.bf16.msra.mxu0 %v2454_v30 }
 0x514   : > { %1342 = vperm.xlu1 %2428, %v1339_v60  }
 0x518   : > { %1594 = vperm.xlu1 %2428, %v1591_v41  }
 0x52b   : > { %v841_v27 = vpop.permute.xlu0 %840 }
 0x52c   : > { %v727_v4 = vpop.permute.xlu1 %726  ;;  %v843_v20 = vmul.f32 %v841_v27, %v2823_v11 }
 0x52d   : > { %v729_v31 = vmul.f32 %v727_v4, %v2823_v11 }
 0x52e   : > { %v844_v32 = vadd.f32 %v843_v20, %v832_v62 }
 0x52f   : > { %v730_v58 = vadd.f32 %v729_v31, %v718_v14 }
 0x530   : > { %v1310_v0 = vpop.permute.xlu0 %1309 }
 0x531   : > { %v1184_v23 = vpop.permute.xlu1 %1183  ;;  %v1312_v60 = vmul.f32 %v1310_v0, %v2820_v8 }
 0x532   : > { %v1186_v27 = vmul.f32 %v1184_v23, %v2820_v8 }
 0x535   : > { %v955_v33 = vpop.permute.xlu0 %954 }
 0x536   : > { %v1069_v53 = vpop.permute.xlu1 %1068  ;;  %v957_v38 = vmul.f32 %v955_v33, %v2823_v11 }
 0x537   : > { %v1071_v1 = vmul.f32 %v1069_v53, %v2823_v11 }
 0x538   : > { %v958_v61 = vadd.f32 %v957_v38, %v946_v59 }
 0x539   : > { %v1072_v17 = vadd.f32 %v1071_v1, %v1060_v36 }
 0x53a   : > { %v3367_v9 = vpop.permute.xlu0 %1435 }
 0x53b   : > { %v3365_v28 = vpop.permute.xlu1 %1561  ;;  %v1438_v23 = vmul.f32 %v3367_v9, %v2820_v8 }
 0x53c   : > { %v1564_v20 = vmul.f32 %v3365_v28, %v2820_v8 }
 0x53f   : > { %v1080_v19 = vpop.permute.xlu0 %1079 }
 0x540   : > { %v738_v57 = vpop.permute.xlu1 %737  ;;  %v1082_v44 = vmul.f32 %v1080_v19, %v2818_v6 }
 0x541   : > { %v740_v21 = vmul.f32 %v738_v57, %v2818_v6  ;;  %v2455_v57 = vld [vmem:[%s3577_s4 + $0x8] sm:$0xff]  }
 0x542   : > { %v1083_v45 = vadd.f32 %v1082_v44, %v1072_v17  ;;  %2307 = vmatprep.subr.bf16.mxu0 %v2455_v57 }
 0x543   : > { %v741_v40 = vadd.f32 %v740_v21, %v730_v58  ;;  %2308 = vmatpush3.bf16.msra.mxu0 %v2455_v57 }
 0x544   : > { %v852_v43 = vpop.permute.xlu1 %851  ;;  %v863_v10 = vpop.permute.xlu0 %862 }
 0x545   : > { %v854_v49 = vmul.f32 %v852_v43, %v2818_v6  ;;  %v865_v15 = vmul.f32 %v863_v10, %v2826_v12 }
 0x547   : > { %v855_v48 = vadd.f32 %v854_v49, %v844_v32 }
 0x548   : > { %v966_v47 = vpop.permute.xlu1 %965  ;;  %v977_v26 = vpop.permute.xlu0 %976 }
 0x549   : > { %v968_v37 = vmul.f32 %v966_v47, %v2818_v6  ;;  %v866_v3 = vadd.f32 %v865_v15, %v855_v48  ;;  %v979_v7 = vmul.f32 %v977_v26, %v2826_v12 }
 0x54b   : > { %v969_v35 = vadd.f32 %v968_v37, %v958_v61 }
 0x54d   : > { %v749_v42 = vpop.permute.xlu1 %748  ;;  %v980_v52 = vadd.f32 %v979_v7, %v969_v35 }
 0x54e   : > { %v751_v16 = vmul.f32 %v749_v42, %v2826_v12 }
 0x550   : > { %v752_v24 = vadd.f32 %v751_v16, %v741_v40 }
 0x551   : > { %v1091_v46 = vpop.permute.xlu1 %1090 }
 0x552   : > { %v2430_v13 = vpack.i.bf16 %v866_v3, %v752_v24  ;;  %v1093_v25 = vmul.f32 %v1091_v46, %v2826_v12 }
 0x554   : > { %v1094_v18 = vadd.f32 %v1093_v25, %v1083_v45  ;;  %2431 = vrot.lane.b32.xlu0 %v2430_v13, %s3592_s22 }
 0x556   : > { %v2435_v5 = vpack.i.bf16 %v1094_v18, %v980_v52  ;;  %v2237_v18 = vld [vmem:[%s3578_s5] ss:$0 sm:$0xff] }
 0x558   : > { %2436 = vrot.lane.b32.xlu0 %v2435_v5, %s3592_s22  ;;  %v2568_v5 = vld [vmem:[%s2809_s26] sm:$0xff]  }
 0x574   : > { %v1195_v2 = vpop.permute.xlu1 %1194 }
 0x575   : > { %v1197_v54 = vmul.f32 %v1195_v2, %v2823_v11  ;;  %v528_v2 = vunpack.c.l.bf16 %v2568_v5 }
 0x577   : > { %v1198_v19 = vadd.f32 %v1197_v54, %v1186_v27 }
 0x57d   : > { %v1321_v22 = vpop.permute.xlu1 %1320 }
 0x57e   : > { %v1323_v56 = vmul.f32 %v1321_v22, %v2823_v11 }
 0x580   : > { %v1324_v33 = vadd.f32 %v1323_v56, %v1312_v60 }
 0x581   : > { %v1447_v29 = vpop.permute.xlu1 %1446  ;;  %v1573_v51 = vpop.permute.xlu0 %1572 }
 0x582   : > { %v1449_v53 = vmul.f32 %v1447_v29, %v2823_v11  ;;  %v1575_v43 = vmul.f32 %v1573_v51, %v2823_v11  ;;  %v529_v51 = vunpack.c.h.bf16 %v2568_v5 }
 0x584   : > { %v1450_v11 = vadd.f32 %v1449_v53, %v1438_v23  ;;  %v1576_v38 = vadd.f32 %v1575_v43, %v1564_v20 }
 0x586   : > { %v1332_v55 = vpop.permute.xlu1 %1331  ;;  %v1206_v34 = vpop.permute.xlu0 %1205 }
 0x587   : > { %v1334_v39 = vmul.f32 %v1332_v55, %v2818_v6  ;;  %v1208_v4 = vmul.f32 %v1206_v34, %v2818_v6  ;;  %v2569_v55 = vld [vmem:[%s2809_s26 + $0x8] sm:$0xff]   ;;  %s3517_s26 = scalar_lea.hbm %s3587_s14, %s2274_s28  ;;  %s2663_s28 = smov [#allocation2]  }
 0x588   : > { %v530_v34 = vunpack.c.l.bf16 %v2569_v55  ;;  %s2574_s17 = sshll.u32 %s2663_s28, 4  ;;  %s2575_s17 = int_to_ptr.vmem [resolvable:$false] %s2574_s17 }
 0x589   : > { %v1335_v10 = vadd.f32 %v1334_v39, %v1324_v33  ;;  %v1209_v49 = vadd.f32 %v1208_v4, %v1198_v19  ;;  %v531_v39 = vunpack.c.h.bf16 %v2569_v55  ;;  %s2576_s19 = scalar_lea.vmem %s2575_s17, 512  ;;  %p2577_p1 = scmp.lt.s32.totalorder %s3520_s24, %s2575_s17 }
 0x58a   : > { %v1458_v63 = vpop.permute.xlu1 %1457  ;;  %v1584_v50 = vpop.permute.xlu0 %1583  ;;  %p2578_p2 = scmp.lt.s32.totalorder %s2576_s19, %s2570_s20 }
 0x58b   : > { %v1460_v47 = vmul.f32 %v1458_v63, %v2818_v6  ;;  %v1586_v14 = vmul.f32 %v1584_v50, %v2818_v6 }
 0x58c   : > { %p2579_p3 = por %p2578_p2, %p2577_p1 }
 0x58d   : > { %v1461_v8 = vadd.f32 %v1460_v47, %v1450_v11  ;;  %v1587_v9 = vadd.f32 %v1586_v14, %v1576_v38 }
 0x58e   : > { %p2580_p5 = pnand %p2579_p3, %p2573_p0 }
 0x58f   : > { %v1217_v41 = vpop.permute.xlu1 %1216  ;;  %v1469_v62 = vpop.permute.xlu0 %1468 }
 0x590   : > { %v1219_v0 = vmul.f32 %v1217_v41, %v2826_v12  ;;  %v1471_v28 = vmul.f32 %v1469_v62, %v2826_v12 }
 0x592   : > { %v1220_v21 = vadd.f32 %v1219_v0, %v1209_v49  ;;  %v1472_v15 = vadd.f32 %v1471_v28, %v1461_v8 }
 0x593   : > { %v1343_v31 = vpop.permute.xlu1 %1342 }
 0x594   : > { %v1345_v32 = vmul.f32 %v1343_v31, %v2826_v12 }
 0x596   : > { %v1346_v59 = vadd.f32 %v1345_v32, %v1335_v10 }
 0x597   : > { %v1595_v1 = vpop.permute.xlu1 %1594 }
 0x598   : > { %v2440_v58 = vpack.i.bf16 %v1346_v59, %v1220_v21  ;;  %v1597_v48 = vmul.f32 %v1595_v1, %v2826_v12 }
 0x59a   : > { %v1598_v37 = vadd.f32 %v1597_v48, %v1587_v9  ;;  %2441 = vrot.lane.b32.xlu1 %v2440_v58, %s3592_s22 }
 0x59c   : > { %v2445_v6 = vpack.i.bf16 %v1598_v37, %v1472_v15  ;;  %v2456_v15 = vld [vmem:[%s3581_s8] sm:$0xff]   ;;  %v2457_v37 = vld [vmem:[%s3581_s8 + $0x8] sm:$0xff]  }
 0x59d   : > { %2313 = vmatprep.subr.bf16.mxu0 %v2456_v15 }
 0x59e   : > { %2446 = vrot.lane.b32.xlu1 %v2445_v6, %s3592_s22 }
 0x5c6   : > { %v2432_v36 = vpop.permute.xlu0 %2431 }
 0x5c7   : > { %v2434_v42 = vunpack.i.h.bf16 %v2432_v36  ;;  %v2433_v61 = vunpack.i.l.bf16 %v2432_v36 }
 0x5ca   : > { %v2437_v16 = vpop.permute.xlu0 %2436 }
 0x5cb   : > { %v2439_v7 = vunpack.i.h.bf16 %v2437_v16  ;;  %v2438_v24 = vunpack.i.l.bf16 %v2437_v16 }
 0x60c   : > { %v2442_v26 = vpop.permute.xlu1 %2441 }
 0x60d   : > { %v2444_v40 = vunpack.i.h.bf16 %v2442_v26  ;;  %v2443_v44 = vunpack.i.l.bf16 %v2442_v26 }
 0x60f   : > { %v1631_v17 = vsel %vm627_vm1, %v2433_v61, %v2443_v44  ;;  %v1632_v3 = vsel %vm627_vm1, %v2434_v42, %v2444_v40 }
 0x610   : > { %v1635_v12 = vpack.c.bf16 %v1632_v3, %v1631_v17  ;;  %v2447_v35 = vpop.permute.xlu1 %2446 }
 0x611   : > { %v2449_v46 = vunpack.i.h.bf16 %v2447_v35  ;;  %v2448_v45 = vunpack.i.l.bf16 %v2447_v35 }
 0x612   : > { %2309 = vmatprep.mubr.msk.bf16.mxu0 %vm566_vm0, %v1635_v12 }
 0x613   : > { %v1633_v13 = vsel %vm627_vm1, %v2438_v24, %v2448_v45  ;;  %v1634_v25 = vsel %vm627_vm1, %v2439_v7, %v2449_v46  ;;  %v2242_v24 = vld [vmem:[%s3579_s6] ss:$0 sm:$0xff] }
 0x614   : > { %v1636_v52 = vpack.c.bf16 %v1634_v25, %v1633_v13 }
 0x616   : > { %2310 = vmatmul.mubr.msk.bf16.vlgmr.msra.gmra.mrb[4].mxu0 %vm566_vm0, %v1636_v52 }
 0x617   : > { %2314 = vmatpush3.bf16.msra.mxu0 %v2456_v15 }
 0x618   : > { %2315 = vmatprep.subr.bf16.mxu0 %v2457_v37 }
 0x61b   : > { %2316 = vmatpush3.bf16.msra.mxu0 %v2457_v37 }
 0x6e9   : > { %v2311_v22 = vpop.f32.mrb[4].mxu0 }
 0x6ea   : > { %v1700_v29 = vpop.f32.mrb[5].mxu0  ;;  %v1709_v63 = vadd.f32 %v2311_v22, %v2237_v18 }
 0x6eb   : > { %v1701_v56 = vadd.f32 %v2237_v18, %v1700_v29  ;;  %v2312_v50 = vpop.f32.mrb[6].mxu0 }
 0x6ec   : > { %v1703_v30 = vpop.f32.mrb[7].mxu0  ;;  %v1717_v41 = vadd.f32 %v1709_v63, %v530_v34  ;;  %v1712_v27 = vadd.f32 %v2312_v50, %v2237_v18 }
 0x6ed   : > { %v1715_v54 = vadd.f32 %v1701_v56, %v528_v2  ;;  %v1704_v60 = vadd.f32 %v2237_v18, %v1703_v30  ;;  %v2243_v18 = vld [vmem:[%s3580_s7] ss:$0 sm:$0xff] }
 0x6ee   : > { %v1718_v57 = vadd.f32 %v1712_v27, %v531_v39  ;;  %v1727_v19 = vsel %vm566_vm0, %v1717_v41, 0.0  ;;  %v2459_v39 = vld [vmem:[%s3583_s10 + $0x8] sm:$0xff]   ;;  %v2461_v27 = vld [vmem:[%s3583_s10 + $0x18] sm:$0xff]  }
 0x6ef   : > { %v1716_v4 = vadd.f32 %v1704_v60, %v529_v51  ;;  %v1721_v33 = vsel %vm566_vm0, %v1715_v54, 0.0  ;;  %v2458_v60 = vld [vmem:[%s3583_s10] sm:$0xff]  }
 0x6f0   : > { %1722 = vadd.xlane.f32.xlu0 %v1721_v33  ;;  %v1730_v43 = vsel %vm566_vm0, %v1718_v57, 0.0  ;;  %2321 = vmatprep.subr.bf16.mxu1 %v2458_v60  ;;  %v2463_v33 = vld [vmem:[%s3583_s10 + $0x28] sm:$0xff]  }
 0x6f1   : > { %v1724_v53 = vsel %vm566_vm0, %v1716_v4, 0.0  ;;  %2322 = vmatpush3.bf16.msra.mxu1 %v2458_v60 }
 0x6f2   : > { %1725 = vadd.xlane.f32.xlu1 %v1724_v53  ;;  %2323 = vmatprep.subr.bf16.mxu1 %v2459_v39  ;;  %v2464_v53 = vld [vmem:[%s3583_s10 + $0x30] sm:$0xff]  }
 0x6f4   : > { %1728 = vadd.xlane.f32.xlu0 %v1727_v19 }
 0x6f5   : > { %2324 = vmatpush3.bf16.msra.mxu1 %v2459_v39 }
 0x6f8   : > { %1731 = vadd.xlane.f32.xlu0 %v1730_v43  ;;  %v2244_v43 = vld [vmem:[%s3582_s9] ss:$0 sm:$0xff] }
 0x77d   : > { %v1723_v0 = vpop.xlane.xlu0 %1722 }
 0x77e   : > { %v1734_v20 = vmul.f32 0.03125, %v1723_v0 }
 0x77f   : > { %v1726_v23 = vpop.xlane.xlu1 %1725 }
 0x780   : > { %v1738_v10 = vsub.f32 %v1715_v54, %v1734_v20  ;;  %v1735_v62 = vmul.f32 0.03125, %v1726_v23 }
 0x781   : > { %v1729_v31 = vpop.xlane.xlu0 %1728 }
 0x782   : > { %v1739_v49 = vsub.f32 %v1716_v4, %v1735_v62  ;;  %v1736_v47 = vmul.f32 0.03125, %v1729_v31  ;;  %v1742_v14 = vmul.f32 %v1738_v10, %v1738_v10  ;;  %v2462_v4 = vld [vmem:[%s3583_s10 + $0x20] sm:$0xff]  }
 0x784   : > { %v1740_v32 = vsub.f32 %v1717_v41, %v1736_v47  ;;  %v1746_v11 = vsel %vm566_vm0, %v1742_v14, 0.0  ;;  %v1743_v38 = vmul.f32 %v1739_v49, %v1739_v49  ;;  %v2460_v41 = vld [vmem:[%s3583_s10 + $0x10] sm:$0xff]  }
 0x785   : > { %1747 = vadd.xlane.f32.xlu1 %v1746_v11  ;;  %v1732_v21 = vpop.xlane.xlu0 %1731  ;;  %2325 = vmatprep.subr.bf16.mxu1 %v2460_v41 }
 0x786   : > { %v1737_v28 = vmul.f32 0.03125, %v1732_v21  ;;  %v1749_v59 = vsel %vm566_vm0, %v1743_v38, 0.0  ;;  %v1744_v1 = vmul.f32 %v1740_v32, %v1740_v32  ;;  %2326 = vmatpush3.bf16.msra.mxu1 %v2460_v41 }
 0x787   : > { %1750 = vadd.xlane.f32.xlu0 %v1749_v59  ;;  %2327 = vmatprep.subr.bf16.mxu1 %v2461_v27 }
 0x788   : > { %v1741_v8 = vsub.f32 %v1718_v57, %v1737_v28  ;;  %v1752_v9 = vsel %vm566_vm0, %v1744_v1, 0.0  ;;  %v2465_v57 = vld [vmem:[%s3583_s10 + $0x38] sm:$0xff]  }
 0x789   : > { %1753 = vadd.xlane.f32.xlu1 %v1752_v9 }
 0x78a   : > { %v1745_v58 = vmul.f32 %v1741_v8, %v1741_v8  ;;  %2328 = vmatpush3.bf16.msra.mxu1 %v2461_v27 }
 0x78b   : > { %2329 = vmatprep.subr.bf16.mxu1 %v2462_v4 }
 0x78c   : > { %v1755_v48 = vsel %vm566_vm0, %v1745_v58, 0.0 }
 0x78d   : > { %1756 = vadd.xlane.f32.xlu0 %v1755_v48 }
 0x78e   : > { %2330 = vmatpush3.bf16.msra.mxu1 %v2462_v4 }
 0x78f   : > { %2331 = vmatprep.subr.bf16.mxu1 %v2463_v33 }
 0x792   : > { %2332 = vmatpush3.bf16.msra.mxu1 %v2463_v33 }
 0x793   : > { %2333 = vmatprep.subr.bf16.mxu1 %v2464_v53 }
 0x796   : > { %2334 = vmatpush3.bf16.msra.mxu1 %v2464_v53 }
 0x797   : > { %2335 = vmatprep.subr.bf16.mxu1 %v2465_v57 }
 0x79a   : > { %2336 = vmatpush3.bf16.msra.mxu1 %v2465_v57 }
 0x812   : > { %v1748_v6 = vpop.xlane.xlu1 %1747 }
 0x813   : > { %v1758_v36 = vmul.f32 0.03125, %v1748_v6 }
 0x814   : > { %v1751_v26 = vpop.xlane.xlu0 %1750 }
 0x815   : > { %v1762_v42 = vadd.f32 1e-12, %v1758_v36  ;;  %v1759_v61 = vmul.f32 0.03125, %v1751_v26 }
 0x816   : > { %v1754_v40 = vpop.xlane.xlu1 %1753 }
 0x817   : > { %2548 = vrsqrt.f32 %v1762_v42  ;;  %v1763_v44 = vadd.f32 1e-12, %v1759_v61  ;;  %v1760_v16 = vmul.f32 0.03125, %v1754_v40  ;;  %v2249_v40 = vld [vmem:[%s3584_s11] ss:$0 sm:$0xff] }
 0x819   : > { %2550 = vrsqrt.f32 %v1763_v44  ;;  %v1764_v17 = vadd.f32 1e-12, %v1760_v16 }
 0x81a   : > { %v1757_v3 = vpop.xlane.xlu0 %1756 }
 0x81b   : > { %2552 = vrsqrt.f32 %v1764_v17  ;;  %v1761_v12 = vmul.f32 0.03125, %v1757_v3 }
 0x81d   : > { %v1765_v35 = vadd.f32 1e-12, %v1761_v12 }
 0x81f   : > { %2554 = vrsqrt.f32 %v1765_v35 }
 0x821   : > { %v2549_v7 = vpop.eup %2548 }
 0x822   : > { %v1770_v46 = vmul.f32 %v2549_v7, %v1738_v10 }
 0x823   : > { %v2551_v45 = vpop.eup %2550 }
 0x824   : > { %v1771_v13 = vmul.f32 %v2551_v45, %v1739_v49  ;;  %v1780_v25 = vmul.f32 %v2242_v24, %v1770_v46 }
 0x825   : > { %v2553_v52 = vpop.eup %2552 }
 0x826   : > { %v1772_v5 = vmul.f32 %v2553_v52, %v1740_v32  ;;  %v1781_v2 = vmul.f32 %v2242_v24, %v1771_v13  ;;  %v3446_v22 = vadd.f32 %v2243_v18, %v1780_v25 }
 0x828   : > { %v3448_v29 = vadd.f32 %v2243_v18, %v1781_v2  ;;  %v1782_v55 = vmul.f32 %v2242_v24, %v1772_v5 }
 0x829   : > { %v2555_v51 = vpop.eup %2554 }
 0x82a   : > { %v1773_v34 = vmul.f32 %v2555_v51, %v1741_v8  ;;  %v1794_v63 = vpack.c.bf16 %v3448_v29, %v3446_v22  ;;  %v3453_v50 = vadd.f32 %v2243_v18, %v1782_v55 }
 0x82c   : > { %v1783_v56 = vmul.f32 %v2242_v24, %v1773_v34  ;;  %2317 = vmatprep.mubr.msk.bf16.mxu0 %vm566_vm0, %v1794_v63 }
 0x82e   : > { %v3455_v30 = vadd.f32 %v2243_v18, %v1783_v56 }
 0x830   : > { %v1795_v54 = vpack.c.bf16 %v3455_v30, %v3453_v50 }
 0x832   : > { %2318 = vmatmul.mubr.msk.bf16.vlgmr.msra.gmra.mrb[8].mxu0 %vm566_vm0, %v1795_v54 }
 0x905   : > { %v2319_v19 = vpop.f32.mrb[8].mxu0 }
 0x906   : > { %v1859_v0 = vpop.f32.mrb[9].mxu0  ;;  %v1868_v23 = vadd.f32 %v2319_v19, %v2244_v43 }
 0x907   : > { %v2320_v20 = vpop.f32.mrb[10].mxu0  ;;  %v1860_v31 = vadd.f32 %v2244_v43, %v1859_v0 }
 0x908   : > { %v1871_v10 = vadd.f32 %v2320_v20, %v2244_v43  ;;  %v1862_v62 = vpop.f32.mrb[11].mxu0 }
 0x909   : > { %v1863_v49 = vadd.f32 %v2244_v43, %v1862_v62 }
 0x90a   : > { %v1875_v47 = vpack.c.bf16 %v1871_v10, %v1868_v23 }
 0x90b   : > { %v1874_v14 = vpack.c.bf16 %v1863_v49, %v1860_v31 }
 0x90c   : > { %v1879_v32 = vmul.bf16 1027030327, %v1875_v47  ;;  %v1877_v26 = vmul.bf16 1056980736, %v1875_v47 }
 0x90d   : > { %v1878_v11 = vmul.bf16 1027030327, %v1874_v14  ;;  %v1876_v6 = vmul.bf16 1056980736, %v1874_v14 }
 0x90e   : > { %v1881_v38 = vmul.bf16 %v1879_v32, %v1875_v47 }
 0x90f   : > { %v1880_v21 = vmul.bf16 %v1878_v11, %v1874_v14 }
 0x910   : > { %v1883_v28 = vmul.bf16 %v1881_v38, %v1875_v47 }
 0x911   : > { %v1882_v59 = vmul.bf16 %v1880_v21, %v1874_v14 }
 0x912   : > { %v1885_v1 = vadd.bf16 %v1883_v28, %v1875_v47  ;;  %v2258_v28 = vld [vmem:[%s3585_s12] ss:$0 sm:$0xff] }
 0x913   : > { %v1884_v8 = vadd.bf16 %v1882_v59, %v1874_v14 }
 0x914   : > { %v1887_v9 = vmul.bf16 1061961548, %v1885_v1 }
 0x915   : > { %v1886_v58 = vmul.bf16 1061961548, %v1884_v8  ;;  %v2259_v8 = vld [vmem:[%s3586_s13] ss:$0 sm:$0xff] }
 0x916   : > { %2556 = vtanh.bf16 %v1887_v9 }
 0x917   : > { %2558 = vtanh.bf16 %v1886_v58 }
 0x921   : > { %v2557_v48 = vpop.eup %2556 }
 0x922   : > { %v2559_v15 = vpop.eup %2558  ;;  %v1891_v37 = vadd.bf16 1065369472, %v2557_v48 }
 0x923   : > { %v1890_v36 = vadd.bf16 1065369472, %v2559_v15 }
 0x924   : > { %v1893_v61 = vmul.bf16 %v1891_v37, %v1877_v26 }
 0x925   : > { %v1892_v42 = vmul.bf16 %v1890_v36, %v1876_v6 }
 0x927   : > { %2337 = vmatprep.mubr.bf16.mxu1 %v1892_v42 }
 0x928   : > { %2338 = vmatmul.mubr.bf16.vlgmr.msra.gmra.mrb[0].mxu1 %v1893_v61 }
 0x9fb   : > { %v2339_v44 = vpop.f32.mrb[0].mxu1 }
 0x9fc   : > { %v1999_v16 = vpop.f32.mrb[1].mxu1  ;;  %v2008_v17 = vadd.f32 %v2339_v44, %v2249_v40 }
 0x9fd   : > { %v2000_v3 = vadd.f32 %v2249_v40, %v1999_v16  ;;  %v2340_v12 = vpop.f32.mrb[2].mxu1 }
 0x9fe   : > { %v2002_v35 = vpop.f32.mrb[3].mxu1  ;;  %v2011_v24 = vadd.f32 %v2340_v12, %v2249_v40  ;;  %v2016_v45 = vadd.f32 %v2008_v17, %v3453_v50 }
 0x9ff   : > { %v2014_v7 = vadd.f32 %v2000_v3, %v3446_v22  ;;  %v2003_v46 = vadd.f32 %v2249_v40, %v2002_v35 }
 0xa00   : > { %v2017_v52 = vadd.f32 %v2011_v24, %v3455_v30  ;;  %v2026_v5 = vsel %vm566_vm0, %v2016_v45, 0.0 }
 0xa01   : > { %v2015_v13 = vadd.f32 %v2003_v46, %v3448_v29  ;;  %v2020_v25 = vsel %vm566_vm0, %v2014_v7, 0.0 }
 0xa02   : > { %2021 = vadd.xlane.f32.xlu1 %v2020_v25  ;;  %v2029_v2 = vsel %vm566_vm0, %v2017_v52, 0.0 }
 0xa03   : > { %v2023_v18 = vsel %vm566_vm0, %v2015_v13, 0.0 }
 0xa04   : > { %2024 = vadd.xlane.f32.xlu0 %v2023_v18 }
 0xa06   : > { %2027 = vadd.xlane.f32.xlu1 %v2026_v5 }
 0xa08   : > { %2030 = vadd.xlane.f32.xlu0 %v2029_v2 }
 0xa8f   : > { %v2022_v22 = vpop.xlane.xlu1 %2021 }
 0xa90   : > { %v2032_v51 = vmul.f32 0.03125, %v2022_v22 }
 0xa91   : > { %v2025_v55 = vpop.xlane.xlu0 %2024 }
 0xa92   : > { %v2036_v34 = vsub.f32 %v2014_v7, %v2032_v51  ;;  %v2033_v63 = vmul.f32 0.03125, %v2025_v55 }
 0xa93   : > { %v2028_v29 = vpop.xlane.xlu1 %2027 }
 0xa94   : > { %v2037_v56 = vsub.f32 %v2015_v13, %v2033_v63  ;;  %v2034_v50 = vmul.f32 0.03125, %v2028_v29  ;;  %v2040_v54 = vmul.f32 %v2036_v34, %v2036_v34 }
 0xa95   : > { %v2031_v60 = vpop.xlane.xlu0 %2030 }
 0xa96   : > { %v2038_v30 = vsub.f32 %v2016_v45, %v2034_v50  ;;  %v2035_v39 = vmul.f32 0.03125, %v2031_v60  ;;  %v2044_v41 = vsel %vm566_vm0, %v2040_v54, 0.0  ;;  %v2041_v27 = vmul.f32 %v2037_v56, %v2037_v56 }
 0xa97   : > { %2045 = vadd.xlane.f32.xlu1 %v2044_v41 }
 0xa98   : > { %v2039_v4 = vsub.f32 %v2017_v52, %v2035_v39  ;;  %v2047_v33 = vsel %vm566_vm0, %v2041_v27, 0.0  ;;  %v2042_v53 = vmul.f32 %v2038_v30, %v2038_v30 }
 0xa99   : > { %2048 = vadd.xlane.f32.xlu0 %v2047_v33 }
 0xa9a   : > { %v2050_v57 = vsel %vm566_vm0, %v2042_v53, 0.0  ;;  %v2043_v19 = vmul.f32 %v2039_v4, %v2039_v4 }
 0xa9b   : > { %2051 = vadd.xlane.f32.xlu1 %v2050_v57 }
 0xa9c   : > { %v2053_v43 = vsel %vm566_vm0, %v2043_v19, 0.0 }
 0xa9d   : > { %2054 = vadd.xlane.f32.xlu0 %v2053_v43 }
 0xb24   : > { %v2046_v0 = vpop.xlane.xlu1 %2045 }
 0xb25   : > { %v2056_v20 = vmul.f32 0.03125, %v2046_v0 }
 0xb26   : > { %v2049_v23 = vpop.xlane.xlu0 %2048 }
 0xb27   : > { %v2060_v10 = vadd.f32 1e-12, %v2056_v20  ;;  %v2057_v62 = vmul.f32 0.03125, %v2049_v23 }
 0xb28   : > { %v2052_v31 = vpop.xlane.xlu1 %2051 }
 0xb29   : > { %2560 = vrsqrt.f32 %v2060_v10  ;;  %v2061_v49 = vadd.f32 1e-12, %v2057_v62  ;;  %v2058_v47 = vmul.f32 0.03125, %v2052_v31 }
 0xb2a   : > { %v2055_v14 = vpop.xlane.xlu0 %2054 }
 0xb2b   : > { %2562 = vrsqrt.f32 %v2061_v49  ;;  %v2062_v32 = vadd.f32 1e-12, %v2058_v47  ;;  %v2059_v11 = vmul.f32 0.03125, %v2055_v14 }
 0xb2d   : > { %2564 = vrsqrt.f32 %v2062_v32  ;;  %v2063_v38 = vadd.f32 1e-12, %v2059_v11 }
 0xb2f   : > { %2566 = vrsqrt.f32 %v2063_v38 }
 0xb33   : > { %v2561_v21 = vpop.eup %2560 }
 0xb34   : > { %v2068_v59 = vmul.f32 %v2561_v21, %v2036_v34 }
 0xb35   : > { %v2563_v1 = vpop.eup %2562 }
 0xb36   : > { %v2078_v9 = vmul.f32 %v2258_v28, %v2068_v59  ;;  %v2069_v58 = vmul.f32 %v2563_v1, %v2037_v56 }
 0xb37   : > { %v2565_v48 = vpop.eup %2564 }
 0xb38   : > { %v2088_v15 = vadd.f32 %v2259_v8, %v2078_v9  ;;  %v2079_v37 = vmul.f32 %v2258_v28, %v2069_v58  ;;  %v2070_v6 = vmul.f32 %v2565_v48, %v2038_v30 }
 0xb39   : > { %v2567_v36 = vpop.eup %2566 }
 0xb3a   : > { %v2270_v26 = vpack.c.bf16 %v2088_v15, %v2088_v15  ;;  %v2089_v42 = vadd.f32 %v2259_v8, %v2079_v37  ;;  %v2080_v61 = vmul.f32 %v2258_v28, %v2070_v6  ;;  %v2071_v40 = vmul.f32 %v2567_v36, %v2039_v4 }
 0xb3c   : > { %v2271_v44 = vpack.c.bf16 %v2089_v42, %v2089_v42  ;;  %v2090_v16 = vadd.f32 %v2259_v8, %v2080_v61  ;;  %v2081_v17 = vmul.f32 %v2258_v28, %v2071_v40  ;;  %2109 = vst.msk [vmem:[%s503_s27] sm:$0xf] %vm2108_vm2, %v2270_v26 }
 0xb3e   : > { %v2272_v3 = vpack.c.bf16 %v2090_v16, %v2090_v16  ;;  %v2091_v12 = vadd.f32 %v2259_v8, %v2081_v17  ;;  %2110 = vst.msk [vmem:[%s503_s27 + $0x4] sm:$0xf] %vm2108_vm2, %v2271_v44 }
 0xb40   : > { %v2273_v35 = vpack.c.bf16 %v2091_v12, %v2091_v12  ;;  %2111 = vst.msk [vmem:[%s503_s27 + $0x8] sm:$0xf] %vm2108_vm2, %v2272_v3 }
 0xb42   : > { %2112 = vst.msk [vmem:[%s503_s27 + $0xc] sm:$0xf] %vm2108_vm2, %v2273_v35 }
 0xb43   : > { %2583 = shalt.err (!%p2580_p5)
}
 0xb44   : > { %s2584_s21 = scalar_lea.hbm %s3517_s26, 256  ;;  %s2588_s28 = scalar_lea.hbm %s3587_s14, 512 }
 0xb45   : > { %p2585_p6 = scmp.ne.s32.totalorder %s3517_s26, %s2584_s21  ;;  %p2589_p10 = scmp.lt.u32.totalorder %s3517_s26, %s3587_s14 }
 0xb46   : > { %p2590_p11 = scmp.lt.u32.totalorder %s2588_s28, %s2584_s21  ;;  %p2592_p13 = scmp.lt.u32.totalorder %s2584_s21, %s3517_s26 }
 0xb47   : > { %p2586_p7 = pnand %p2585_p6, %p2780_p4 }
 0xb48   : > { %p2591_p12 = por %p2590_p11, %p2589_p10 }
 0xb49   : > { %p2587_p9 = pneg %p2586_p7 }
 0xb4a   : > { %p2593_p0 = por %p2592_p13, %p2591_p12 }
 0xb4c   : > { %p2594_p1 = pnand %p2593_p0, %p2587_p9 }
 0xb4e   : > { %2597 = shalt.err (!%p2594_p1)
}
 0xb4f   : > { %s2664_s20 = smov 4   ;;  %s3604_s19 = smov 64  }
 0xb50   : > { %2341 = dma.vmem_to_hbm [thread:$0]  (%p2780_p4), %s3520_s24, 256, %s3517_s26, %s3525_s16, %s3604_s19, %s3604_s19, %s2664_s20  }
 0xb51 PF: > { %p2347_p2 = scmp.ge.s32.totalorder %s2648_s18, 2  ;;  %s2143_s0 = sand.u32 1, %s2628_s29  }
 0xb52   : > { %s2144_s22 = scalar_lea.sflag [#allocation3], %s2143_s0 }
 0xb53   : > { %p2344_p3 = pnand %p2347_p2, %p2787_p8 }
 0xb55   : > { %2623 = dma.done.wait (!%p2344_p3), %s2144_s22, 256  }
 0xb56   : > { %2625 = vsyncadd (!%p2344_p3), %s2144_s22, 4294967040  ;;  %s27_s18 = sadd.s32 1, %s2648_s18   ;;  %s3605_s23 = sld [smem:[#allocation7_spill]] }
 0xb57   : > { %p24_p5 = scmp.ge.s32.totalorder %s27_s18, 4   ;;  %s3606_s16 = sld [smem:[#allocation5_spill]] }
 0xb58   : > { %s3607_s17 = sld [smem:[#allocation6_spill]]  ;;  %s3608_s29 = smov %s2632_s30 }
 0xb59   : > { %s3609_s30 = smov %s2636_s15  ;;  %26 = sbr.rel (!%p24_p5) target bundleno = 6 (0x6), region = 114 }
 0xb5c   : > { %s3610_s15 = smov %s3605_s23 }
 0xb60   :  { %2149 = vsyncpa [#allocation3], 1 }
 0xb61   :  { %2151 = vsyncpa [#allocation3 + $0x1], 1 }

// kernel: tpu_custom_call.1
= control target key start
LH: loop header
LB: loop body
LE: loop exit
PB: predicated region body
PF: predicated region fallthrough
CT: control target
= control target key end

     0   :  { %s3573_s0 = inlined_call_operand.vmem [shape: bf16[2,4,8,32], index: 0, kind: input, shape index: {}]   ;;  %s3574_s1 = inlined_call_operand.vmem [shape: f32[2,8,4], index: 1, kind: input, shape index: {}]   ;;  %s3575_s2 = inlined_call_operand.vmem [shape: bf16[32,96], index: 2, kind: input, shape index: {}]   ;;  %s3576_s3 = inlined_call_operand.vmem [shape: f32[1,96], index: 3, kind: input, shape index: {}]   ;;  %s3577_s4 = inlined_call_operand.vmem [shape: bf16[32,32], index: 4, kind: input, shape index: {}]   ;;  %s3578_s5 = inlined_call_operand.vmem [shape: f32[1,32], index: 5, kind: input, shape index: {}]   ;;  %s3579_s6 = inlined_call_operand.vmem [shape: f32[1,32], index: 6, kind: input, shape index: {}]   ;;  %s3580_s7 = inlined_call_operand.vmem [shape: f32[1,32], index: 7, kind: input, shape index: {}]   ;;  %s3581_s8 = inlined_call_operand.vmem [shape: bf16[32,128], index: 8, kind: input, shape index: {}]   ;;  %s3582_s9 = inlined_call_operand.vmem [shape: f32[1,128], index: 9, kind: input, shape index: {}]   ;;  %s3583_s10 = inlined_call_operand.vmem [shape: bf16[128,32], index: 10, kind: input, shape index: {}]   ;;  %s3584_s11 = inlined_call_operand.vmem [shape: f32[1,32], index: 11, kind: input, shape index: {}]   ;;  %s3585_s12 = inlined_call_operand.vmem [shape: f32[1,32], index: 12, kind: input, shape index: {}]   ;;  %s3586_s13 = inlined_call_operand.vmem [shape: f32[1,32], index: 13, kind: input, shape index: {}]   ;;  %s3587_s14 = inlined_call_operand.hbm [shape: bf16[2,4,8,32], index: 14, kind: output, shape index: {}]  }
   0x1   :  { %3593 = sst [smem:[#allocation8_spill]] %s3573_s0 }
   0x2   :  { %19 = vsyncpa [#allocation3], 0 }
   0x3   :  { %21 = vsyncpa [#allocation3 + $0x1], 0  ;;  %s2740_s29 = smov 0   ;;  %s2742_s30 = smov 0  }
   0x4   :  { %s2744_s15 = smov 0   ;;  %s2746_s16 = smov 0  }
   0x5   :  { %s2748_s17 = smov 0   ;;  %s2750_s18 = smov 0  }
   0x6 LB: > { %3594 = sst [smem:[#allocation5_spill]] %s2644_s17  ;;  %s2221_s19 = sadd.s32 4294967295, %s2648_s18   ;;  %s2648_s18 = sphi %s2750_s18, %s27_s18   ;;  %s2644_s17 = sphi %s2748_s17, %s3607_s17   ;;  %s2640_s16 = sphi %s2746_s16, %s3606_s16   ;;  %s2636_s15 = sphi %s2744_s15, %s3610_s15   ;;  %s2632_s30 = sphi %s2742_s30, %s3609_s30   ;;  %s2628_s29 = sphi %s2740_s29, %s3608_s29  }
   0x7   : > { %s2222_s20 = sadd.s32 4294967294, %s2648_s18   ;;  %s39_s21 = sadd.s32 1, %s2644_s17 }
   0x8   : > { %s356_s22 = sadd.s32 1, %s2636_s15  ;;  %p41_p0 = scmp.ge.s32.totalorder %s39_s21, 2 }
   0x9   : > { %p366_p1 = scmp.ne.s32.totalorder %s2636_s15, %s2632_s30  ;;  %p367_p2 = scmp.eq.s32.totalorder %s2221_s19, 1 }
   0xa   : > { %p372_p3 = scmp.ne.s32.totalorder %s2632_s30, %s2628_s29  ;;  %s3612_s21 = smov (%p41_p0, %s39_s21), 0 }
   0xb   : > { %3595 = sst [smem:[#allocation6_spill]] %s3612_s21  ;;  %p2780_p4 = por %p367_p2, %p366_p1 }
   0xc   : > { %p373_p5 = scmp.eq.s32.totalorder %s2222_s20, 1  ;;  %s351_s24 = ssub.s32 %s2644_s17, %s3612_s21 }
   0xd   : > { %p2225_p6 = scmp.ge.s32.totalorder %s2648_s18, 1  ;;  %p354_p7 = scmp.eq.s32.totalorder %s351_s24, 0 }
   0xe   : > { %p2787_p8 = por %p373_p5, %p372_p3  ;;  %p448_p9 = scmp.lt.s32.totalorder %s2648_s18, 3 }
   0xf   : > { %s2793_s26 = scalar_select %p354_p7, %s2636_s15, %s356_s22  }
  0x10   : > { %p449_p10 = pnand %p2225_p6, %p448_p9 }
  0x11   : > { %3598 = sst [smem:[#allocation7_spill]] %s2793_s26  ;;  %v2450_v0 = vld [vmem:[%s3575_s2] sm:$0xff] (!%p449_p10)   ;;  %p504_p11 = scmp.lt.s32.totalorder (!%p449_p10), %s2640_s16, 1  ;;  %v2451_v1 = vld [vmem:[%s3575_s2 + $0x8] sm:$0xff] (!%p449_p10)   ;;  %vm566_vm0 = vcmask (!%p449_p10), 261120   ;;  %vm627_vm1 = vcmask (!%p449_p10), 130048  }
  0x12   : > { %452 = sbr.rel (%p449_p10) target bundleno = 2897 (0xb51), region = 76  ;;  %2297 = vmatprep.subr.bf16.mxu0 (!%p449_p10), %v2450_v0  ;;  %s3599_s0 = sld [smem:[#allocation8_spill]] (!%p449_p10)  ;;  %v2230_v4 = vld [vmem:[%s3576_s3] ss:$0 sm:$0xff] (!%p449_p10)  ;;  %vm2108_vm2 = vcmask (!%p449_p10), 257024  }
  0x13   : > { %2298 = vmatpush3.bf16.msra.mxu0 (!%p449_p10), %v2450_v0  ;;  %s2650_s17 = smov (!%p449_p10), 96   ;;  %s2651_s21 = smov (!%p449_p10), 112  }
  0x14   : > { %2299 = vmatprep.subr.bf16.mxu0 (!%p449_p10), %v2451_v1  ;;  %s2652_s28 = smov (!%p449_p10), 126   ;;  %s2657_s20 = smov (!%p449_p10), 3  }
  0x17   : > { %2300 = vmatpush3.bf16.msra.mxu0 (!%p449_p10), %v2451_v1 }
  0x19   : > { %s2803_s24 = scalar_select %p504_p11, %s2640_s16, 1 }
  0x1b   : > { %s2269_s22 = sshll.u32 %s2803_s24, 4  ;;  %s2229_s19 = sshll.u32 %s2803_s24, 3 }
  0x1c   : > { %s2809_s26 = scalar_lea.vmem %s3599_s0, %s2269_s22  ;;  %s518_s27 = scalar_lea.vmem %s3574_s1, %s2229_s19 }
  0x1d   : > { %v524_v2 = vld [vmem:[%s2809_s26] sm:$0xff]   ;;  %v526_v3 = vld [vmem:[%s2809_s26 + $0x8] sm:$0xff]   ;;  %s2653_s24 = smov 125   ;;  %s2656_s19 = smov 2  }
  0x1e   : > { %2301 = vmatprep.mubr.msk.bf16.mxu0 %vm566_vm0, %v524_v2  ;;  %s3592_s22 = smov 64  }
  0x1f   : > { %2302 = vmatmul.mubr.msk.bf16.vlgmr.msra.gmra.mrb[0].mxu0 %vm566_vm0, %v526_v3 }
  0xf2   : > { %v2303_v5 = vpop.f32.mrb[0].mxu0 }
  0xf3   : > { %v2818_v6 = vadd.f32 %v2303_v5, %v2230_v4  ;;  %v607_v7 = vpop.f32.mrb[1].mxu0 }
  0xf4   : > { %v2820_v8 = vadd.f32 %v2230_v4, %v607_v7  ;;  %v2304_v9 = vpop.f32.mrb[2].mxu0 }
  0xf5   : > { %642 = vrot.lane.b32.xlu0 %v2818_v6, %s2650_s17  ;;  %v610_v10 = vpop.f32.mrb[3].mxu0  ;;  %v2826_v12 = vadd.f32 %v2304_v9, %v2230_v4 }
  0xf6   : > { %v2823_v11 = vadd.f32 %v2230_v4, %v610_v10  ;;  %623 = vrot.lane.b32.xlu1 %v2820_v8, %s2650_s17 }
  0xf9   : > { %633 = vrot.lane.b32.xlu0 %v2823_v11, %s2650_s17 }
  0xfa   : > { %651 = vrot.lane.b32.xlu1 %v2826_v12, %s2650_s17  ;;  %s2654_s17 = smov 127  }
 0x167   : > { %v643_v13 = vpop.permute.xlu0 %642 }
 0x168   : > { %v763_v14 = vmul.f32 %v643_v13, %v2823_v11  ;;  %v645_v15 = vmul.f32 %v643_v13, %v2820_v8  ;;  %v991_v16 = vmul.f32 %v643_v13, %v2826_v12  ;;  %v877_v17 = vmul.f32 %v643_v13, %v2818_v6  ;;  %v624_v18 = vpop.permute.xlu1 %623 }
 0x169   : > { %v753_v19 = vmul.f32 %v624_v18, %v2823_v11  ;;  %v626_v20 = vmul.f32 %v624_v18, %v2820_v8  ;;  %v867_v21 = vmul.f32 %v624_v18, %v2818_v6  ;;  %v2844_v22 = vmul.f32 %v624_v18, %v2826_v12 }
 0x16a   : > { %1238 = vrot.lane.b32.xlu1 %v763_v14, %s2651_s21  ;;  %1112 = vrot.lane.b32.xlu0 %v645_v15, %s2651_s21  ;;  %v764_v23 = vsel %vm627_vm1, %v763_v14, 0.0  ;;  %v992_v24 = vsel %vm627_vm1, %v991_v16, 0.0  ;;  %v646_v25 = vsel %vm627_vm1, %v645_v15, 0.0  ;;  %v878_v26 = vsel %vm627_vm1, %v877_v17, 0.0 }
 0x16b   : > { %v754_v32 = vsel %vm627_vm1, %v753_v19, 0.0  ;;  %v628_v33 = vsel %vm627_vm1, %v626_v20, 0.0  ;;  %v868_v34 = vsel %vm627_vm1, %v867_v21, 0.0  ;;  %v634_v35 = vpop.permute.xlu0 %633 }
 0x16c   : > { %v652_v27 = vpop.permute.xlu1 %651  ;;  %v636_v36 = vmul.f32 %v634_v35, %v2820_v8  ;;  %v758_v37 = vmul.f32 %v634_v35, %v2823_v11  ;;  %v872_v38 = vmul.f32 %v634_v35, %v2818_v6  ;;  %v986_v39 = vmul.f32 %v634_v35, %v2826_v12 }
 0x16d   : > { %v654_v28 = vmul.f32 %v652_v27, %v2820_v8  ;;  %v768_v29 = vmul.f32 %v652_v27, %v2823_v11  ;;  %v882_v30 = vmul.f32 %v652_v27, %v2818_v6  ;;  %v996_v31 = vmul.f32 %v652_v27, %v2826_v12 }
 0x16e   : > { %1490 = vrot.lane.b32.xlu1 %v991_v16, %s2651_s21  ;;  %1364 = vrot.lane.b32.xlu0 %v877_v17, %s2651_s21  ;;  %v637_v45 = vsel %vm627_vm1, %v636_v36, 0.0  ;;  %v987_v47 = vsel %vm627_vm1, %v986_v39, 0.0  ;;  %v759_v52 = vsel %vm627_vm1, %v758_v37, 0.0  ;;  %v873_v56 = vsel %vm627_vm1, %v872_v38, 0.0 }
 0x16f   : > { %v769_v40 = vsel %vm627_vm1, %v768_v29, 0.0  ;;  %v997_v42 = vsel %vm627_vm1, %v996_v31, 0.0  ;;  %v655_v46 = vsel %vm627_vm1, %v654_v28, 0.0  ;;  %v883_v49 = vsel %vm627_vm1, %v882_v30, 0.0 }
 0x170   : > { %v982_v27 = vsel %vm627_vm1, %v2844_v22, 0.0 }
 0x172   : > { %1222 = vrot.lane.b32.xlu1 %v753_v19, %s2651_s21  ;;  %1096 = vrot.lane.b32.xlu0 %v626_v20, %s2651_s21 }
 0x176   : > { %1348 = vrot.lane.b32.xlu1 %v867_v21, %s2651_s21  ;;  %1474 = vrot.lane.b32.xlu0 %v2844_v22, %s2651_s21 }
 0x195   : > { %765 = vadd.xlane.f32.xlu0 %v764_v23 }
 0x199   : > { %993 = vadd.xlane.f32.xlu0 %v992_v24 }
 0x19a   : > { %647 = vadd.xlane.f32.xlu1 %v646_v25 }
 0x19e   : > { %879 = vadd.xlane.f32.xlu1 %v878_v26 }
 0x1af   : > { %1120 = vrot.lane.b32.xlu0 %v654_v28, %s2651_s21  ;;  %1246 = vrot.lane.b32.xlu1 %v768_v29, %s2651_s21  ;;  %v2907_v28 = vld [vmem:[%s518_s27] sm:$0xff] }
 0x1b3   : > { %1372 = vrot.lane.b32.xlu0 %v882_v30, %s2651_s21  ;;  %1498 = vrot.lane.b32.xlu1 %v996_v31, %s2651_s21 }
 0x1d2   : > { %755 = vadd.xlane.f32.xlu0 %v754_v32 }
 0x1d7   : > { %629 = vadd.xlane.f32.xlu1 %v628_v33 }
 0x1db   : > { %869 = vadd.xlane.f32.xlu1 %v868_v34 }
 0x1dc   : > { %v1113_v41 = vpop.permute.xlu0 %1112  ;;  %v1239_v43 = vpop.permute.xlu1 %1238 }
 0x1dd   : > { %v1241_v51 = vsel %vm627_vm1, %v1239_v43, 0.0  ;;  %v1115_v60 = vsel %vm627_vm1, %v1113_v41, 0.0 }
 0x1e0   : > { %v1365_v44 = vpop.permute.xlu0 %1364  ;;  %v1491_v48 = vpop.permute.xlu1 %1490 }
 0x1e1   : > { %v1493_v55 = vsel %vm627_vm1, %v1491_v48, 0.0  ;;  %v1367_v63 = vsel %vm627_vm1, %v1365_v44, 0.0 }
 0x1e4   : > { %v1097_v50 = vpop.permute.xlu0 %1096  ;;  %v1223_v53 = vpop.permute.xlu1 %1222 }
 0x1e5   : > { %v1225_v58 = vsel %vm627_vm1, %v1223_v53, 0.0  ;;  %v1099_v2 = vsel %vm627_vm1, %v1097_v50, 0.0 }
 0x1e8   : > { %1104 = vrot.lane.b32.xlu0 %v636_v36, %s2651_s21  ;;  %v1475_v54 = vpop.permute.xlu0 %1474  ;;  %v1349_v59 = vpop.permute.xlu1 %1348 }
 0x1e9   : > { %v1351_v23 = vsel %vm627_vm1, %v1349_v59, 0.0  ;;  %v1477_v29 = vsel %vm627_vm1, %v1475_v54, 0.0 }
 0x1ec   : > { %1230 = vrot.lane.b32.xlu1 %v758_v37, %s2651_s21  ;;  %1356 = vrot.lane.b32.xlu0 %v872_v38, %s2651_s21 }
 0x1f0   : > { %1482 = vrot.lane.b32.xlu1 %v986_v39, %s2651_s21  ;;  %s2655_s21 = smov 1  }
 0x20b   : > { %770 = vadd.xlane.f32.xlu0 %v769_v40 }
 0x20f   : > { %998 = vadd.xlane.f32.xlu0 %v997_v42 }
 0x213   : > { %638 = vadd.xlane.f32.xlu0 %v637_v45 }
 0x214   : > { %656 = vadd.xlane.f32.xlu1 %v655_v46 }
 0x217   : > { %988 = vadd.xlane.f32.xlu0 %v987_v47 }
 0x218   : > { %884 = vadd.xlane.f32.xlu1 %v883_v49 }
 0x21b   : > { %1242 = vadd.xlane.f32.xlu0 %v1241_v51 }
 0x21c   : > { %760 = vadd.xlane.f32.xlu1 %v759_v52 }
 0x21f   : > { %1494 = vadd.xlane.f32.xlu0 %v1493_v55 }
 0x220   : > { %874 = vadd.xlane.f32.xlu1 %v873_v56 }
 0x222   : > { %v766_v57 = vpop.xlane.xlu0 %765 }
 0x223   : > { %1226 = vadd.xlane.f32.xlu0 %v1225_v58  ;;  %v2911_v30 = vadd.f32 %v766_v57, %v2907_v28 }
 0x224   : > { %1116 = vadd.xlane.f32.xlu1 %v1115_v60 }
 0x226   : > { %v994_v61 = vpop.xlane.xlu0 %993 }
 0x227   : > { %v648_v62 = vpop.xlane.xlu1 %647  ;;  %v2916_v31 = vadd.f32 %v994_v61, %v2907_v28 }
 0x228   : > { %1368 = vadd.xlane.f32.xlu1 %v1367_v63  ;;  %v2921_v22 = vadd.f32 %v648_v62, %v2907_v28 }
 0x22a   : > { %v1121_v0 = vpop.permute.xlu0 %1120 }
 0x22b   : > { %v880_v1 = vpop.xlane.xlu1 %879  ;;  %v1123_v4 = vsel %vm627_vm1, %v1121_v0, 0.0 }
 0x22c   : > { %1100 = vadd.xlane.f32.xlu1 %v1099_v2  ;;  %v2926_v32 = vadd.f32 %v880_v1, %v2907_v28 }
 0x22e   : > { %v1373_v5 = vpop.permute.xlu0 %1372 }
 0x22f   : > { %v1247_v3 = vpop.permute.xlu1 %1246  ;;  %v1375_v10 = vsel %vm627_vm1, %v1373_v5, 0.0 }
 0x230   : > { %1124 = vadd.xlane.f32.xlu1 %v1123_v4  ;;  %v1249_v7 = vsel %vm627_vm1, %v1247_v3, 0.0 }
 0x231   : > { %1250 = vadd.xlane.f32.xlu0 %v1249_v7 }
 0x233   : > { %v1499_v9 = vpop.permute.xlu1 %1498 }
 0x234   : > { %1376 = vadd.xlane.f32.xlu1 %v1375_v10  ;;  %v1501_v13 = vsel %vm627_vm1, %v1499_v9, 0.0 }
 0x235   : > { %1502 = vadd.xlane.f32.xlu0 %v1501_v13 }
 0x25f   : > { %v2890_v14 = vpop.xlane.xlu0 %755 }
 0x263   : > { %v1105_v15 = vpop.permute.xlu0 %1104 }
 0x264   : > { %v2892_v16 = vpop.xlane.xlu1 %629  ;;  %v1107_v17 = vsel %vm627_vm1, %v1105_v15, 0.0 }
 0x265   : > { %1108 = vadd.xlane.f32.xlu0 %v1107_v17 }
 0x267   : > { %v1357_v18 = vpop.permute.xlu0 %1356 }
 0x268   : > { %v2895_v19 = vpop.xlane.xlu1 %869  ;;  %v1359_v20 = vsel %vm627_vm1, %v1357_v18, 0.0 }
 0x269   : > { %1360 = vadd.xlane.f32.xlu1 %v1359_v20 }
 0x26c   : > { %v1231_v21 = vpop.permute.xlu1 %1230 }
 0x26d   : > { %1352 = vadd.xlane.f32.xlu1 %v1351_v23  ;;  %v1233_v24 = vsel %vm627_vm1, %v1231_v21, 0.0 }
 0x26e   : > { %1234 = vadd.xlane.f32.xlu0 %v1233_v24 }
 0x270   : > { %v1483_v25 = vpop.permute.xlu1 %1482 }
 0x271   : > { %v1485_v26 = vsel %vm627_vm1, %v1483_v25, 0.0 }
 0x272   : > { %1486 = vadd.xlane.f32.xlu0 %v1485_v26 }
 0x276   : > { %983 = vadd.xlane.f32.xlu0 %v982_v27 }
 0x27a   : > { %1478 = vadd.xlane.f32.xlu0 %v1477_v29  ;;  %v3040_v29 = vadd.f32 %v2892_v16, %v2907_v28  ;;  %v3055_v16 = vadd.f32 %v2890_v14, %v2907_v28 }
 0x27e   : > { %779 = vrot.lane.b32.xlu1 %v2911_v30, %s2652_s28 }
 0x282   : > { %1007 = vrot.lane.b32.xlu1 %v2916_v31, %s2652_s28 }
 0x290   : > { %665 = vrot.lane.b32.xlu0 %v2921_v22, %s2652_s28 }
 0x294   : > { %893 = vrot.lane.b32.xlu0 %v2926_v32, %s2652_s28 }
 0x298   : > { %v771_v33 = vpop.xlane.xlu0 %770 }
 0x299   : > { %v2931_v34 = vadd.f32 %v771_v33, %v2907_v28 }
 0x29b   : > { %784 = vrot.lane.b32.xlu1 %v2931_v34, %s2653_s24 }
 0x29c   : > { %v999_v35 = vpop.xlane.xlu0 %998 }
 0x29d   : > { %v2936_v36 = vadd.f32 %v999_v35, %v2907_v28 }
 0x29f   : > { %1012 = vrot.lane.b32.xlu1 %v2936_v36, %s2653_s24 }
 0x2a0   : > { %v639_v37 = vpop.xlane.xlu0 %638 }
 0x2a1   : > { %v2941_v38 = vadd.f32 %v639_v37, %v2907_v28  ;;  %v657_v39 = vpop.xlane.xlu1 %656 }
 0x2a2   : > { %v2944_v40 = vadd.f32 %v657_v39, %v2907_v28 }
 0x2a3   : > { %660 = vrot.lane.b32.xlu1 %v2941_v38, %s2654_s17 }
 0x2a4   : > { %670 = vrot.lane.b32.xlu0 %v2944_v40, %s2653_s24  ;;  %v989_v41 = vpop.xlane.xlu0 %988 }
 0x2a5   : > { %v2951_v42 = vadd.f32 %v989_v41, %v2907_v28  ;;  %v885_v43 = vpop.xlane.xlu1 %884 }
 0x2a6   : > { %v2954_v44 = vadd.f32 %v885_v43, %v2907_v28 }
 0x2a7   : > { %1002 = vrot.lane.b32.xlu1 %v2951_v42, %s2654_s17 }
 0x2a8   : > { %898 = vrot.lane.b32.xlu0 %v2954_v44, %s2653_s24  ;;  %v1243_v45 = vpop.xlane.xlu0 %1242 }
 0x2a9   : > { %v2961_v46 = vadd.f32 %v1243_v45, %v2907_v28  ;;  %v761_v47 = vpop.xlane.xlu1 %760 }
 0x2aa   : > { %v2964_v48 = vadd.f32 %v761_v47, %v2907_v28 }
 0x2ab   : > { %1259 = vrot.lane.b32.xlu1 %v2961_v46, %s2652_s28 }
 0x2ac   : > { %774 = vrot.lane.b32.xlu0 %v2964_v48, %s2654_s17  ;;  %v1495_v49 = vpop.xlane.xlu0 %1494 }
 0x2ad   : > { %v2971_v50 = vadd.f32 %v1495_v49, %v2907_v28  ;;  %v875_v51 = vpop.xlane.xlu1 %874 }
 0x2ae   : > { %v2974_v52 = vadd.f32 %v875_v51, %v2907_v28 }
 0x2af   : > { %1511 = vrot.lane.b32.xlu1 %v2971_v50, %s2652_s28 }
 0x2b0   : > { %888 = vrot.lane.b32.xlu0 %v2974_v52, %s2654_s17  ;;  %v2992_v58 = vpop.xlane.xlu0 %1226 }
 0x2b1   : > { %v1117_v53 = vpop.xlane.xlu1 %1116 }
 0x2b2   : > { %v2981_v54 = vadd.f32 %v1117_v53, %v2907_v28 }
 0x2b4   : > { %1133 = vrot.lane.b32.xlu0 %v2981_v54, %s2652_s28 }
 0x2b5   : > { %v1369_v55 = vpop.xlane.xlu1 %1368 }
 0x2b6   : > { %v2986_v56 = vadd.f32 %v1369_v55, %v2907_v28 }
 0x2b8   : > { %1385 = vrot.lane.b32.xlu0 %v2986_v56, %s2652_s28 }
 0x2b9   : > { %v2990_v57 = vpop.xlane.xlu1 %1100 }
 0x2bd   : > { %v1125_v59 = vpop.xlane.xlu1 %1124 }
 0x2be   : > { %v2995_v60 = vadd.f32 %v1125_v59, %v2907_v28  ;;  %v1251_v61 = vpop.xlane.xlu0 %1250 }
 0x2bf   : > { %v2998_v62 = vadd.f32 %v1251_v61, %v2907_v28 }
 0x2c0   : > { %1138 = vrot.lane.b32.xlu0 %v2995_v60, %s2653_s24 }
 0x2c1   : > { %1264 = vrot.lane.b32.xlu1 %v2998_v62, %s2653_s24  ;;  %v1377_v0 = vpop.xlane.xlu1 %1376 }
 0x2c2   : > { %v1503_v63 = vpop.xlane.xlu0 %1502  ;;  %v3015_v5 = vadd.f32 %v1377_v0, %v2907_v28  ;;  %v3064_v0 = vadd.f32 %v2895_v19, %v2907_v28 }
 0x2c3   : > { %v3032_v20 = vadd.f32 %v1503_v63, %v2907_v28 }
 0x2f2   : > { %v1109_v1 = vpop.xlane.xlu0 %1108 }
 0x2f3   : > { %v3005_v2 = vadd.f32 %v1109_v1, %v2907_v28 }
 0x2f5   : > { %1128 = vrot.lane.b32.xlu1 %v3005_v2, %s2654_s17 }
 0x2f6   : > { %v1361_v3 = vpop.xlane.xlu1 %1360 }
 0x2f7   : > { %v3010_v4 = vadd.f32 %v1361_v3, %v2907_v28 }
 0x2f9   : > { %1380 = vrot.lane.b32.xlu0 %v3010_v4, %s2654_s17 }
 0x2fa   : > { %v3020_v10 = vpop.xlane.xlu1 %1352 }
 0x2fb   : > { %v1235_v7 = vpop.xlane.xlu0 %1234 }
 0x2fc   : > { %v3018_v9 = vadd.f32 %v1235_v7, %v2907_v28 }
 0x2fd   : > { %1390 = vrot.lane.b32.xlu0 %v3015_v5, %s2653_s24 }
 0x2fe   : > { %1254 = vrot.lane.b32.xlu1 %v3018_v9, %s2654_s17  ;;  %v780_v17 = vpop.permute.xlu1 %779 }
 0x2ff   : > { %v1487_v13 = vpop.xlane.xlu0 %1486 }
 0x300   : > { %v3027_v15 = vadd.f32 %v1487_v13, %v2907_v28 }
 0x302   : > { %1506 = vrot.lane.b32.xlu1 %v3027_v15, %s2654_s17  ;;  %v1008_v23 = vpop.permute.xlu1 %1007 }
 0x303   : > { %v984_v18 = vpop.xlane.xlu0 %983 }
 0x304   : > { %v3044_v39 = vadd.f32 %v984_v18, %v2907_v28 }
 0x306   : > { %1516 = vrot.lane.b32.xlu1 %v3032_v20, %s2653_s24 }
 0x307   : > { %v3036_v21 = vpop.xlane.xlu0 %1478 }
 0x30b   : > { %v666_v24 = vpop.permute.xlu0 %665 }
 0x30d   : > { %v785_v25 = vpop.permute.xlu1 %784 }
 0x30f   : > { %v894_v27 = vpop.permute.xlu0 %893 }
 0x311   : > { %v1013_v26 = vpop.permute.xlu1 %1012 }
 0x315   : > { %v661_v33 = vpop.permute.xlu1 %660 }
 0x316   : > { %v663_v35 = vmax.f32 %v3040_v29, %v661_v33  ;;  %v671_v37 = vpop.permute.xlu0 %670  ;;  %v3099_v33 = vadd.f32 %v2990_v57, %v2907_v28 }
 0x318   : > { %v668_v41 = vmax.f32 %v663_v35, %v666_v24 }
 0x319   : > { %v1003_v43 = vpop.permute.xlu1 %1002 }
 0x31a   : > { %v3046_v45 = vmax.f32 %v668_v41, %v671_v37  ;;  %v1005_v47 = vmax.f32 %v3044_v39, %v1003_v43  ;;  %v899_v49 = vpop.permute.xlu0 %898  ;;  %v3104_v43 = vadd.f32 %v3020_v10, %v2907_v28 }
 0x31c   : > { %v674_v51 = vsub.f32 %v3040_v29, %v3046_v45  ;;  %v1010_v53 = vmax.f32 %v1005_v47, %v1008_v23  ;;  %678 = vrot.lane.b32.xlu0 %v3046_v45, %s2655_s21 }
 0x31e   : > { %v3057_v55 = vmax.f32 %v1010_v53, %v1013_v26  ;;  %v775_v59 = vpop.permute.xlu0 %774 }
 0x31f   : > { %v777_v61 = vmax.f32 %v3055_v16, %v775_v59 }
 0x320   : > { %v1016_v63 = vsub.f32 %v3044_v39, %v3057_v55 }
 0x321   : > { %v782_v1 = vmax.f32 %v777_v61, %v780_v17  ;;  %v1260_v17 = vpop.permute.xlu1 %1259 }
 0x322   : > { %v889_v3 = vpop.permute.xlu0 %888 }
 0x323   : > { %v3066_v7 = vmax.f32 %v782_v1, %v785_v25  ;;  %v891_v13 = vmax.f32 %v3064_v0, %v889_v3  ;;  %v3115_v1 = vadd.f32 %v2992_v58, %v2907_v28 }
 0x325   : > { %v896_v14 = vmax.f32 %v891_v13, %v894_v27  ;;  %792 = vrot.lane.b32.xlu1 %v3066_v7, %s2655_s21  ;;  %v788_v18 = vsub.f32 %v3055_v16, %v3066_v7  ;;  %v1512_v25 = vpop.permute.xlu1 %1511 }
 0x326   : > { %v1134_v24 = vpop.permute.xlu0 %1133 }
 0x327   : > { %v3073_v23 = vmax.f32 %v896_v14, %v899_v49 }
 0x329   : > { %1020 = vrot.lane.b32.xlu1 %v3057_v55, %s2655_s21  ;;  %906 = vrot.lane.b32.xlu0 %v3073_v23, %s2655_s21  ;;  %v902_v19 = vsub.f32 %v3064_v0, %v3073_v23 }
 0x32a   : > { %v1386_v26 = vpop.permute.xlu0 %1385 }
 0x32d   : > { %798 = vrot.lane.b32.xlu1 %v3066_v7, %s2656_s19  ;;  %684 = vrot.lane.b32.xlu0 %v3046_v45, %s2656_s19 }
 0x331   : > { %1026 = vrot.lane.b32.xlu1 %v3057_v55, %s2656_s19  ;;  %912 = vrot.lane.b32.xlu0 %v3073_v23, %s2656_s19 }
 0x332   : > { %v1139_v35 = vpop.permute.xlu0 %1138 }
 0x333   : > { %v1265_v27 = vpop.permute.xlu1 %1264 }
 0x335   : > { %804 = vrot.lane.b32.xlu1 %v3066_v7, %s2657_s20  ;;  %690 = vrot.lane.b32.xlu0 %v3046_v45, %s2657_s20 }
 0x339   : > { %1032 = vrot.lane.b32.xlu1 %v3057_v55, %s2657_s20  ;;  %918 = vrot.lane.b32.xlu0 %v3073_v23, %s2657_s20 }
 0x367   : > { %v1129_v37 = vpop.permute.xlu1 %1128 }
 0x368   : > { %v1131_v41 = vmax.f32 %v3099_v33, %v1129_v37 }
 0x36a   : > { %v1136_v47 = vmax.f32 %v1131_v41, %v1134_v24 }
 0x36b   : > { %v1381_v49 = vpop.permute.xlu0 %1380 }
 0x36c   : > { %v3106_v53 = vmax.f32 %v1136_v47, %v1139_v35  ;;  %v1383_v59 = vmax.f32 %v3104_v43, %v1381_v49 }
 0x36e   : > { %1146 = vrot.lane.b32.xlu0 %v3106_v53, %s2655_s21  ;;  %v1388_v61 = vmax.f32 %v1383_v59, %v1386_v26  ;;  %v1142_v57 = vsub.f32 %v3099_v33, %v3106_v53  ;;  %v3126_v26 = vadd.f32 %v3036_v21, %v2907_v28 }
 0x36f   : > { %v1391_v3 = vpop.permute.xlu0 %1390 }
 0x370   : > { %v3117_v10 = vmax.f32 %v1388_v61, %v1391_v3  ;;  %v1255_v13 = vpop.permute.xlu1 %1254 }
 0x371   : > { %v1257_v14 = vmax.f32 %v3115_v1, %v1255_v13 }
 0x372   : > { %1398 = vrot.lane.b32.xlu0 %v3117_v10, %s2655_s21 }
 0x373   : > { %v1262_v35 = vmax.f32 %v1257_v14, %v1260_v17 }
 0x374   : > { %v1507_v37 = vpop.permute.xlu1 %1506 }
 0x375   : > { %v3128_v58 = vmax.f32 %v1262_v35, %v1265_v27  ;;  %v1509_v41 = vmax.f32 %v3126_v26, %v1507_v37 }
 0x376   : > { %1152 = vrot.lane.b32.xlu0 %v3106_v53, %s2656_s19 }
 0x377   : > { %1272 = vrot.lane.b32.xlu1 %v3128_v58, %s2655_s21  ;;  %v1514_v47 = vmax.f32 %v1509_v41, %v1512_v25 }
 0x378   : > { %v1517_v59 = vpop.permute.xlu1 %1516 }
 0x379   : > { %v3137_v61 = vmax.f32 %v1514_v47, %v1517_v59 }
 0x37a   : > { %1404 = vrot.lane.b32.xlu0 %v3117_v10, %s2656_s19 }
 0x37b   : > { %1524 = vrot.lane.b32.xlu1 %v3137_v61, %s2655_s21 }
 0x37e   : > { %1158 = vrot.lane.b32.xlu0 %v3106_v53, %s2657_s20 }
 0x37f   : > { %1278 = vrot.lane.b32.xlu1 %v3128_v58, %s2656_s19 }
 0x382   : > { %1410 = vrot.lane.b32.xlu0 %v3117_v10, %s2657_s20 }
 0x383   : > { %1530 = vrot.lane.b32.xlu1 %v3137_v61, %s2656_s19 }
 0x387   : > { %1284 = vrot.lane.b32.xlu1 %v3128_v58, %s2657_s20 }
 0x38b   : > { %1536 = vrot.lane.b32.xlu1 %v3137_v61, %s2657_s20 }
 0x38e   : > { %v679_v21 = vpop.permute.xlu0 %678 }
 0x38f   : > { %v681_v17 = vsub.f32 %v2941_v38, %v679_v21 }
 0x391   : > { %v682_v25 = vmul.f32 1.442695, %v681_v17 }
 0x393   : > { %2468 = vpow2.f32 %v682_v25 }
 0x397   : > { %v793_v27 = vpop.permute.xlu1 %792 }
 0x398   : > { %v795_v3 = vsub.f32 %v2964_v48, %v793_v27 }
 0x39a   : > { %v796_v13 = vmul.f32 1.442695, %v795_v3 }
 0x39b   : > { %v1021_v14 = vpop.permute.xlu1 %1020  ;;  %v907_v35 = vpop.permute.xlu0 %906 }
 0x39c   : > { %2470 = vpow2.f32 %v796_v13  ;;  %v1023_v37 = vsub.f32 %v2951_v42, %v1021_v14  ;;  %v909_v41 = vsub.f32 %v2974_v52, %v907_v35 }
 0x39d   : > { %v3161_v47 = vpop.eup %2468 }
 0x39e   : > { %v1024_v59 = vmul.f32 1.442695, %v1023_v37  ;;  %v910_v28 = vmul.f32 1.442695, %v909_v41  ;;  %697 = vrot.lane.b32.xlu0 %v3161_v47, %s2654_s17 }
 0x39f   : > { %v799_v38 = vpop.permute.xlu1 %798  ;;  %v685_v21 = vpop.permute.xlu0 %684 }
 0x3a0   : > { %2472 = vpow2.f32 %v1024_v59  ;;  %v801_v48 = vsub.f32 %v2911_v30, %v799_v38  ;;  %v687_v17 = vsub.f32 %v2921_v22, %v685_v21 }
 0x3a1   : > { %2474 = vpow2.f32 %v910_v28 }
 0x3a2   : > { %v802_v25 = vmul.f32 1.442695, %v801_v48  ;;  %v688_v27 = vmul.f32 1.442695, %v687_v17 }
 0x3a3   : > { %v1027_v42 = vpop.permute.xlu1 %1026  ;;  %v913_v3 = vpop.permute.xlu0 %912 }
 0x3a4   : > { %2476 = vpow2.f32 %v802_v25  ;;  %v1029_v52 = vsub.f32 %v2916_v31, %v1027_v42  ;;  %v915_v13 = vsub.f32 %v2926_v32, %v913_v3 }
 0x3a5   : > { %2478 = vpow2.f32 %v688_v27 }
 0x3a6   : > { %v3169_v14 = vpop.eup %2470  ;;  %v1030_v35 = vmul.f32 1.442695, %v1029_v52  ;;  %v916_v37 = vmul.f32 1.442695, %v915_v13 }
 0x3a7   : > { %811 = vrot.lane.b32.xlu1 %v3169_v14, %s2654_s17  ;;  %v805_v30 = vpop.permute.xlu1 %804  ;;  %v691_v22 = vpop.permute.xlu0 %690 }
 0x3a8   : > { %2480 = vpow2.f32 %v1030_v35  ;;  %v807_v28 = vsub.f32 %v2931_v34, %v805_v30  ;;  %v693_v41 = vsub.f32 %v2944_v40, %v691_v22 }
 0x3a9   : > { %2482 = vpow2.f32 %v916_v37  ;;  %v3590_v37 = vmov 0  }
 0x3aa   : > { %v3175_v59 = vpop.eup %2472  ;;  %v808_v31 = vmul.f32 1.442695, %v807_v28  ;;  %v694_v32 = vmul.f32 1.442695, %v693_v41  ;;  %2411 = vset.pattern.permute.xlu1 %v3590_v37  ;;  %2410 = vset.pattern.permute.xlu0 %v3590_v37 }
 0x3ab   : > { %v3177_v38 = vpop.eup %2474  ;;  %1039 = vrot.lane.b32.xlu1 %v3175_v59, %s2654_s17  ;;  %v1033_v21 = vpop.permute.xlu1 %1032 }
 0x3ac   : > { %v919_v48 = vpop.permute.xlu0 %918  ;;  %2484 = vpow2.f32 %v808_v31  ;;  %v1035_v17 = vsub.f32 %v2936_v36, %v1033_v21  ;;  %925 = vrot.lane.b32.xlu0 %v3177_v38, %s2654_s17 }
 0x3ad   : > { %v921_v34 = vsub.f32 %v2954_v44, %v919_v48  ;;  %2486 = vpow2.f32 %v694_v32 }
 0x3ae   : > { %v3185_v40 = vpop.eup %2476  ;;  %v1036_v25 = vmul.f32 1.442695, %v1035_v17 }
 0x3af   : > { %v922_v27 = vmul.f32 1.442695, %v921_v34  ;;  %v3187_v42 = vpop.eup %2478  ;;  %816 = vrot.lane.b32.xlu1 %v3185_v40, %s2652_s28 }
 0x3b0   : > { %2488 = vpow2.f32 %v1036_v25  ;;  %702 = vrot.lane.b32.xlu0 %v3187_v42, %s2652_s28 }
 0x3b1   : > { %2490 = vpow2.f32 %v922_v27 }
 0x3b2   : > { %v3193_v36 = vpop.eup %2480 }
 0x3b3   : > { %v3195_v3 = vpop.eup %2482  ;;  %1044 = vrot.lane.b32.xlu1 %v3193_v36, %s2652_s28 }
 0x3b4   : > { %930 = vrot.lane.b32.xlu0 %v3195_v3, %s2652_s28 }
 0x3b6   : > { %v3201_v44 = vpop.eup %2484 }
 0x3b7   : > { %v3203_v52 = vpop.eup %2486  ;;  %821 = vrot.lane.b32.xlu1 %v3201_v44, %s2653_s24 }
 0x3b8   : > { %707 = vrot.lane.b32.xlu0 %v3203_v52, %s2653_s24 }
 0x3ba   : > { %v3209_v13 = vpop.eup %2488 }
 0x3bb   : > { %v3211_v35 = vpop.eup %2490  ;;  %1049 = vrot.lane.b32.xlu1 %v3209_v13, %s2653_s24 }
 0x3bc   : > { %935 = vrot.lane.b32.xlu0 %v3211_v35, %s2653_s24 }
 0x3e0   : > { %v1147_v30 = vpop.permute.xlu0 %1146 }
 0x3e1   : > { %v1149_v22 = vsub.f32 %v3005_v2, %v1147_v30 }
 0x3e3   : > { %v1150_v28 = vmul.f32 1.442695, %v1149_v22 }
 0x3e4   : > { %v1399_v41 = vpop.permute.xlu0 %1398 }
 0x3e5   : > { %2492 = vpow2.f32 %v1150_v28  ;;  %v1401_v31 = vsub.f32 %v3010_v4, %v1399_v41 }
 0x3e7   : > { %v1402_v32 = vmul.f32 1.442695, %v1401_v31 }
 0x3e8   : > { %v1153_v21 = vpop.permute.xlu0 %1152 }
 0x3e9   : > { %2494 = vpow2.f32 %v1402_v32  ;;  %v1155_v48 = vsub.f32 %v2981_v54, %v1153_v21  ;;  %v1273_v17 = vpop.permute.xlu1 %1272 }
 0x3ea   : > { %v1275_v34 = vsub.f32 %v3018_v9, %v1273_v17 }
 0x3eb   : > { %v1156_v25 = vmul.f32 1.442695, %v1155_v48 }
 0x3ec   : > { %v1276_v27 = vmul.f32 1.442695, %v1275_v34  ;;  %v1405_v49 = vpop.permute.xlu0 %1404 }
 0x3ed   : > { %2496 = vpow2.f32 %v1156_v25  ;;  %v1407_v37 = vsub.f32 %v2986_v56, %v1405_v49  ;;  %v1525_v2 = vpop.permute.xlu1 %1524 }
 0x3ee   : > { %2498 = vpow2.f32 %v1276_v27  ;;  %v1527_v30 = vsub.f32 %v3027_v15, %v1525_v2 }
 0x3ef   : > { %v3225_v22 = vpop.eup %2492  ;;  %v1408_v4 = vmul.f32 1.442695, %v1407_v37 }
 0x3f0   : > { %v1528_v28 = vmul.f32 1.442695, %v1527_v30  ;;  %1165 = vrot.lane.b32.xlu0 %v3225_v22, %s2654_s17  ;;  %v1159_v54 = vpop.permute.xlu0 %1158 }
 0x3f1   : > { %2500 = vpow2.f32 %v1408_v4  ;;  %v1161_v9 = vsub.f32 %v2995_v60, %v1159_v54  ;;  %v1279_v41 = vpop.permute.xlu1 %1278 }
 0x3f2   : > { %2502 = vpow2.f32 %v1528_v28  ;;  %v1281_v31 = vsub.f32 %v2961_v46, %v1279_v41 }
 0x3f3   : > { %v3231_v56 = vpop.eup %2494  ;;  %v1162_v49 = vmul.f32 1.442695, %v1161_v9 }
 0x3f4   : > { %v1282_v32 = vmul.f32 1.442695, %v1281_v31  ;;  %1417 = vrot.lane.b32.xlu0 %v3231_v56, %s2654_s17  ;;  %v1411_v15 = vpop.permute.xlu0 %1410 }
 0x3f5   : > { %2504 = vpow2.f32 %v1162_v49  ;;  %v1413_v37 = vsub.f32 %v3015_v5, %v1411_v15  ;;  %v1531_v21 = vpop.permute.xlu1 %1530  ;;  %v789_v49 = vmul.f32 1.442695, %v788_v18 }
 0x3f6   : > { %2506 = vpow2.f32 %v1282_v32  ;;  %v1533_v48 = vsub.f32 %v2971_v50, %v1531_v21  ;;  %v675_v32 = vmul.f32 1.442695, %v674_v51  ;;  %v1017_v21 = vmul.f32 1.442695, %v1016_v63 }
 0x3f7   : > { %v3237_v60 = vpop.eup %2496  ;;  %v1414_v17 = vmul.f32 1.442695, %v1413_v37 }
 0x3f8   : > { %v3239_v34 = vpop.eup %2498  ;;  %v1534_v46 = vmul.f32 1.442695, %v1533_v48  ;;  %1170 = vrot.lane.b32.xlu0 %v3237_v60, %s2652_s28  ;;  %v903_v48 = vmul.f32 1.442695, %v902_v19 }
 0x3f9   : > { %2508 = vpow2.f32 %v1414_v17  ;;  %1291 = vrot.lane.b32.xlu1 %v3239_v34, %s2654_s17  ;;  %v1285_v25 = vpop.permute.xlu1 %1284 }
 0x3fa   : > { %2510 = vpow2.f32 %v1534_v46  ;;  %v1287_v5 = vsub.f32 %v2998_v62, %v1285_v25 }
 0x3fb   : > { %v3246_v27 = vpop.eup %2500 }
 0x3fc   : > { %v3248_v50 = vpop.eup %2502  ;;  %v1288_v2 = vmul.f32 1.442695, %v1287_v5  ;;  %1422 = vrot.lane.b32.xlu0 %v3246_v27, %s2652_s28 }
 0x3fd   : > { %1543 = vrot.lane.b32.xlu1 %v3248_v50, %s2654_s17  ;;  %v1537_v30 = vpop.permute.xlu1 %1536 }
 0x3fe   : > { %2512 = vpow2.f32 %v1288_v2  ;;  %v1539_v4 = vsub.f32 %v3032_v20, %v1537_v30 }
 0x3ff   : > { %v3255_v28 = vpop.eup %2504 }
 0x400   : > { %v3257_v54 = vpop.eup %2506  ;;  %v1540_v62 = vmul.f32 1.442695, %v1539_v4  ;;  %1175 = vrot.lane.b32.xlu0 %v3255_v28, %s2653_s24 }
 0x401   : > { %1296 = vrot.lane.b32.xlu1 %v3257_v54, %s2652_s28 }
 0x402   : > { %2514 = vpow2.f32 %v1540_v62 }
 0x403   : > { %v3263_v9 = vpop.eup %2508  ;;  %2516 = vpow2.f32 %v789_v49 }
 0x404   : > { %v3265_v41 = vpop.eup %2510  ;;  %1427 = vrot.lane.b32.xlu0 %v3263_v9, %s2653_s24  ;;  %2518 = vpow2.f32 %v675_v32 }
 0x405   : > { %1548 = vrot.lane.b32.xlu1 %v3265_v41, %s2652_s28  ;;  %2520 = vpow2.f32 %v1017_v21  ;;  %s2274_s28 = sshll.u32 %s2640_s16, 8 }
 0x406   : > { %2522 = vpow2.f32 %v903_v48 }
 0x408   : > { %v3271_v20 = vpop.eup %2512 }
 0x409   : > { %1301 = vrot.lane.b32.xlu1 %v3271_v20, %s2653_s24 }
 0x40c   : > { %v3275_v31 = vpop.eup %2514 }
 0x40d   : > { %1553 = vrot.lane.b32.xlu1 %v3275_v31, %s2653_s24  ;;  %v2517_v29 = vpop.eup %2516 }
 0x40e   : > { %v2519_v51 = vpop.eup %2518 }
 0x40f   : > { %v2521_v39 = vpop.eup %2520 }
 0x410   : > { %v698_v37 = vpop.permute.xlu0 %697  ;;  %v2523_v30 = vpop.eup %2522 }
 0x411   : > { %v700_v5 = vadd.f32 %v2519_v51, %v698_v37 }
 0x419   : > { %v812_v15 = vpop.permute.xlu1 %811 }
 0x41a   : > { %v814_v18 = vadd.f32 %v2517_v29, %v812_v15 }
 0x41d   : > { %v1040_v17 = vpop.permute.xlu1 %1039 }
 0x41e   : > { %v926_v46 = vpop.permute.xlu0 %925  ;;  %v1042_v4 = vadd.f32 %v2521_v39, %v1040_v17 }
 0x41f   : > { %v928_v19 = vadd.f32 %v2523_v30, %v926_v46 }
 0x421   : > { %v817_v16 = vpop.permute.xlu1 %816 }
 0x422   : > { %v703_v7 = vpop.permute.xlu0 %702  ;;  %v819_v2 = vadd.f32 %v817_v16, %v814_v18  ;;  %v2659_v18 = vmov 1  }
 0x423   : > { %v705_v55 = vadd.f32 %v703_v7, %v700_v5  ;;  %v1143_v5 = vmul.f32 1.442695, %v1142_v57 }
 0x425   : > { %v1045_v45 = vpop.permute.xlu1 %1044 }
 0x426   : > { %v931_v25 = vpop.permute.xlu0 %930  ;;  %v1047_v49 = vadd.f32 %v1045_v45, %v1042_v4 }
 0x427   : > { %v933_v32 = vadd.f32 %v931_v25, %v928_v19 }
 0x429   : > { %v822_v63 = vpop.permute.xlu1 %821 }
 0x42a   : > { %v824_v0 = vadd.f32 %v822_v63, %v819_v2  ;;  %v708_v23 = vpop.permute.xlu0 %707  ;;  %v3601_v63 = vsub.f32 %v3115_v1, %v3128_v58 }
 0x42b   : > { %v710_v62 = vadd.f32 %v708_v23, %v705_v55 }
 0x42c   : > { %2524 = vrcp.f32 %v824_v0  ;;  %v3602_v0 = vsub.f32 %v3126_v26, %v3137_v61 }
 0x42d   : > { %2526 = vrcp.f32 %v710_v62  ;;  %v1050_v21 = vpop.permute.xlu1 %1049 }
 0x42e   : > { %v1052_v48 = vadd.f32 %v1050_v21, %v1047_v49  ;;  %v936_v24 = vpop.permute.xlu0 %935  ;;  %v1521_v23 = vmul.f32 1.442695, %v3602_v0 }
 0x42f   : > { %v938_v15 = vadd.f32 %v936_v24, %v933_v32 }
 0x430   : > { %2528 = vrcp.f32 %v1052_v48 }
 0x431   : > { %2530 = vrcp.f32 %v938_v15 }
 0x432   : > { %2532 = vpow2.f32 %v1143_v5 }
 0x436   : > { %v2525_v37 = vpop.eup %2524 }
 0x437   : > { %v2527_v16 = vpop.eup %2526  ;;  %834 = vrot.lane.b32.xlu1 %v2525_v37, %s2655_s21  ;;  %v826_v24 = vmul.f32 %v2525_v37, %v2517_v29  ;;  %v3600_v29 = vsub.f32 %v3104_v43, %v3117_v10 }
 0x438   : > { %720 = vrot.lane.b32.xlu0 %v2527_v16, %s2655_s21  ;;  %v712_v46 = vmul.f32 %v2527_v16, %v2519_v51 }
 0x439   : > { %v1395_v51 = vmul.f32 1.442695, %v3600_v29 }
 0x43a   : > { %v2529_v17 = vpop.eup %2528 }
 0x43b   : > { %v2531_v7 = vpop.eup %2530  ;;  %1062 = vrot.lane.b32.xlu1 %v2529_v17, %s2655_s21  ;;  %v1054_v25 = vmul.f32 %v2529_v17, %v2521_v39  ;;  %2534 = vpow2.f32 %v1395_v51 }
 0x43c   : > { %948 = vrot.lane.b32.xlu0 %v2531_v7, %s2655_s21  ;;  %v940_v45 = vmul.f32 %v2531_v7, %v2523_v30  ;;  %v1269_v30 = vmul.f32 1.442695, %v3601_v63  ;;  %v2533_v33 = vpop.eup %2532 }
 0x43e   : > { %2536 = vpow2.f32 %v1269_v30 }
 0x43f   : > { %845 = vrot.lane.b32.xlu1 %v2525_v37, %s2656_s19  ;;  %2538 = vpow2.f32 %v1521_v23 }
 0x440   : > { %731 = vrot.lane.b32.xlu0 %v2527_v16, %s2656_s19 }
 0x443   : > { %1073 = vrot.lane.b32.xlu1 %v2529_v17, %s2656_s19 }
 0x444   : > { %959 = vrot.lane.b32.xlu0 %v2531_v7, %s2656_s19 }
 0x445   : > { %v2535_v10 = vpop.eup %2534 }
 0x447   : > { %856 = vrot.lane.b32.xlu1 %v2525_v37, %s2657_s20 }
 0x448   : > { %742 = vrot.lane.b32.xlu0 %v2527_v16, %s2657_s20  ;;  %v2537_v48 = vpop.eup %2536 }
 0x449   : > { %v2539_v16 = vpop.eup %2538 }
 0x44b   : > { %1084 = vrot.lane.b32.xlu1 %v2529_v17, %s2657_s20 }
 0x44c   : > { %970 = vrot.lane.b32.xlu0 %v2531_v7, %s2657_s20 }
 0x44f   : > { %829 = vperm.xlu1 %2411, %v826_v24  }
 0x450   : > { %715 = vperm.xlu0 %2410, %v712_v46  }
 0x453   : > { %943 = vperm.xlu1 %2411, %v940_v45  }
 0x454   : > { %2413 = vset.pattern.permute.xlu0 %v2659_v18 }
 0x457   : > { %1057 = vperm.xlu1 %2411, %v1054_v25  }
 0x45b   : > { %2412 = vset.pattern.permute.xlu1 %v2659_v18 }
 0x462   : > { %v1166_v2 = vpop.permute.xlu0 %1165 }
 0x463   : > { %v1168_v57 = vadd.f32 %v2533_v33, %v1166_v2 }
 0x466   : > { %v1418_v55 = vpop.permute.xlu0 %1417 }
 0x467   : > { %v1420_v49 = vadd.f32 %v2535_v10, %v1418_v55 }
 0x46a   : > { %v1171_v39 = vpop.permute.xlu0 %1170 }
 0x46b   : > { %v1292_v4 = vpop.permute.xlu1 %1291  ;;  %v1173_v43 = vadd.f32 %v1171_v39, %v1168_v57 }
 0x46c   : > { %v1294_v26 = vadd.f32 %v2537_v48, %v1292_v4 }
 0x46e   : > { %v1423_v53 = vpop.permute.xlu0 %1422 }
 0x46f   : > { %v1544_v19 = vpop.permute.xlu1 %1543  ;;  %v1425_v1 = vadd.f32 %v1423_v53, %v1420_v49 }
 0x470   : > { %v1546_v7 = vadd.f32 %v2539_v16, %v1544_v19  ;;  %v3603_v19 = vmov 0  }
 0x472   : > { %v1176_v62 = vpop.permute.xlu0 %1175 }
 0x473   : > { %v1178_v32 = vadd.f32 %v1176_v62, %v1173_v43  ;;  %v1297_v21 = vpop.permute.xlu1 %1296 }
 0x474   : > { %v1299_v61 = vadd.f32 %v1297_v21, %v1294_v26 }
 0x475   : > { %2540 = vrcp.f32 %v1178_v32 }
 0x476   : > { %v1428_v58 = vpop.permute.xlu0 %1427 }
 0x477   : > { %v1430_v15 = vadd.f32 %v1428_v58, %v1425_v1  ;;  %v1549_v37 = vpop.permute.xlu1 %1548 }
 0x478   : > { %v1551_v46 = vadd.f32 %v1549_v37, %v1546_v7  ;;  %v2661_v37 = vmov 3  }
 0x479   : > { %2542 = vrcp.f32 %v1430_v15 }
 0x47b   : > { %v1302_v17 = vpop.permute.xlu1 %1301 }
 0x47c   : > { %v1304_v24 = vadd.f32 %v1302_v17, %v1299_v61 }
 0x47e   : > { %2544 = vrcp.f32 %v1304_v24 }
 0x47f   : > { %v2541_v45 = vpop.eup %2540  ;;  %v1554_v25 = vpop.permute.xlu1 %1553 }
 0x480   : > { %v1556_v5 = vadd.f32 %v1554_v25, %v1551_v46  ;;  %1188 = vrot.lane.b32.xlu0 %v2541_v45, %s2655_s21  ;;  %v1180_v2 = vmul.f32 %v2541_v45, %v2533_v33 }
 0x482   : > { %2546 = vrcp.f32 %v1556_v5 }
 0x483   : > { %v2543_v29 = vpop.eup %2542 }
 0x484   : > { %1440 = vrot.lane.b32.xlu0 %v2543_v29, %s2655_s21  ;;  %v1432_v51 = vmul.f32 %v2543_v29, %v2535_v10 }
 0x488   : > { %v2545_v55 = vpop.eup %2544  ;;  %1199 = vrot.lane.b32.xlu0 %v2541_v45, %s2656_s19 }
 0x489   : > { %1314 = vrot.lane.b32.xlu1 %v2545_v55, %s2655_s21  ;;  %v1306_v63 = vmul.f32 %v2545_v55, %v2537_v48 }
 0x48c   : > { %v2547_v30 = vpop.eup %2546  ;;  %1451 = vrot.lane.b32.xlu0 %v2543_v29, %s2656_s19 }
 0x48d   : > { %1566 = vrot.lane.b32.xlu1 %v2547_v30, %s2655_s21  ;;  %v1558_v39 = vmul.f32 %v2547_v30, %v2539_v16  ;;  %s501_s21 = sand.u32 1, %s2632_s30  }
 0x48e   : > { %s3525_s16 = scalar_lea.sflag [#allocation3], %s501_s21 }
 0x490   : > { %1210 = vrot.lane.b32.xlu0 %v2541_v45, %s2657_s20 }
 0x491   : > { %1325 = vrot.lane.b32.xlu1 %v2545_v55, %s2656_s19 }
 0x494   : > { %1462 = vrot.lane.b32.xlu0 %v2543_v29, %s2657_s20 }
 0x495   : > { %1577 = vrot.lane.b32.xlu1 %v2547_v30, %s2656_s19 }
 0x499   : > { %1336 = vrot.lane.b32.xlu1 %v2545_v55, %s2657_s20 }
 0x49d   : > { %1588 = vrot.lane.b32.xlu1 %v2547_v30, %s2657_s20  ;;  %s2226_s20 = sshll.u32 %s501_s21, 4 }
 0x49e   : > { %s503_s27 = scalar_lea.vmem [#allocation2], %s2226_s20 }
 0x49f   : > { %s2128_s24 = sshll.u32 %s503_s27, 4  ;;  %s3520_s24 = int_to_ptr.vmem [resolvable:$true] %s2128_s24 }
 0x4a0   : > { %s2570_s20 = scalar_lea.vmem %s3520_s24, 256 }
 0x4a1   : > { %p2571_p12 = scmp.ne.s32.totalorder %s3520_s24, %s2570_s20 }
 0x4a3   : > { %p2572_p13 = pnand %p2571_p12, %p2780_p4 }
 0x4a5   : > { %p2573_p0 = pneg %p2572_p13 }
 0x4a9   : > { %v835_v4 = vpop.permute.xlu1 %834 }
 0x4aa   : > { %v837_v0 = vmul.f32 %v3169_v14, %v835_v4  ;;  %v721_v23 = vpop.permute.xlu0 %720 }
 0x4ab   : > { %v723_v33 = vmul.f32 %v3161_v47, %v721_v23 }
 0x4ac   : > { %840 = vperm.xlu0 %2413, %v837_v0  }
 0x4ad   : > { %726 = vperm.xlu1 %2412, %v723_v33   ;;  %v1063_v53 = vpop.permute.xlu1 %1062 }
 0x4ae   : > { %v949_v57 = vpop.permute.xlu0 %948  ;;  %v1065_v49 = vmul.f32 %v3175_v59, %v1063_v53  ;;  %v2660_v59 = vmov 2  }
 0x4af   : > { %v951_v10 = vmul.f32 %v3177_v38, %v949_v57 }
 0x4b0   : > { %2415 = vset.pattern.permute.xlu0 %v3603_v19 }
 0x4b1   : > { %2414 = vset.pattern.permute.xlu1 %v3603_v19  ;;  %1309 = vperm.xlu0 %2415, %v1306_v63   ;;  %v846_v62 = vpop.permute.xlu1 %845 }
 0x4b2   : > { %1183 = vperm.xlu1 %2414, %v1180_v2   ;;  %v732_v43 = vpop.permute.xlu0 %731  ;;  %v848_v58 = vmul.f32 %v3185_v40, %v846_v62 }
 0x4b3   : > { %v734_v21 = vmul.f32 %v3187_v42, %v732_v43 }
 0x4b5   : > { %2416 = vset.pattern.permute.xlu0 %v2659_v18  ;;  %v1074_v14 = vpop.permute.xlu1 %1073 }
 0x4b6   : > { %2417 = vset.pattern.permute.xlu1 %v2659_v18  ;;  %954 = vperm.xlu0 %2416, %v951_v10   ;;  %v960_v47 = vpop.permute.xlu0 %959  ;;  %v1076_v32 = vmul.f32 %v3193_v36, %v1074_v14 }
 0x4b7   : > { %1068 = vperm.xlu1 %2417, %v1065_v49   ;;  %v962_v36 = vmul.f32 %v3195_v3, %v960_v47 }
 0x4b9   : > { %v857_v1 = vpop.permute.xlu1 %856 }
 0x4ba   : > { %2418 = vset.pattern.permute.xlu0 %v3603_v19  ;;  %v743_v38 = vpop.permute.xlu0 %742  ;;  %v859_v48 = vmul.f32 %v3201_v44, %v857_v1 }
 0x4bb   : > { %2419 = vset.pattern.permute.xlu1 %v3603_v19  ;;  %1435 = vperm.xlu0 %2418, %v1432_v51   ;;  %v745_v42 = vmul.f32 %v3203_v52, %v743_v38 }
 0x4bc   : > { %1561 = vperm.xlu1 %2419, %v1558_v39  }
 0x4bd   : > { %v1085_v61 = vpop.permute.xlu1 %1084 }
 0x4be   : > { %v971_v15 = vpop.permute.xlu0 %970  ;;  %v1087_v40 = vmul.f32 %v3209_v13, %v1085_v61 }
 0x4bf   : > { %2421 = vset.pattern.permute.xlu0 %v2660_v59  ;;  %v973_v26 = vmul.f32 %v3211_v35, %v971_v15 }
 0x4c0   : > { %2420 = vset.pattern.permute.xlu1 %v2660_v59  ;;  %1079 = vperm.xlu0 %2421, %v1076_v32  }
 0x4c1   : > { %737 = vperm.xlu1 %2420, %v734_v21  }
 0x4c4   : > { %2423 = vset.pattern.permute.xlu0 %v2661_v37 }
 0x4c5   : > { %851 = vperm.xlu1 %2420, %v848_v58   ;;  %862 = vperm.xlu0 %2423, %v859_v48  }
 0x4c9   : > { %965 = vperm.xlu1 %2420, %v962_v36   ;;  %976 = vperm.xlu0 %2423, %v973_v26  }
 0x4cd   : > { %2422 = vset.pattern.permute.xlu1 %v2661_v37  ;;  %2425 = vset.pattern.permute.xlu0 %v2659_v18 }
 0x4ce   : > { %748 = vperm.xlu1 %2422, %v745_v42   ;;  %v830_v44 = vpop.permute.xlu1 %829 }
 0x4cf   : > { %v716_v16 = vpop.permute.xlu0 %715  ;;  %v832_v62 = vmul.f32 %v830_v44, %v2820_v8 }
 0x4d0   : > { %v718_v14 = vmul.f32 %v716_v16, %v2820_v8 }
 0x4d2   : > { %1090 = vperm.xlu1 %2422, %v1087_v40   ;;  %v3349_v17 = vpop.permute.xlu1 %943 }
 0x4d6   : > { %2424 = vset.pattern.permute.xlu1 %v2659_v18  ;;  %v3352_v52 = vpop.permute.xlu1 %1057 }
 0x4d7   : > { %v1060_v36 = vmul.f32 %v3352_v52, %v2820_v8 }
 0x4f2   : > { %v1189_v3 = vpop.permute.xlu0 %1188 }
 0x4f3   : > { %v1191_v35 = vmul.f32 %v3225_v22, %v1189_v3 }
 0x4f5   : > { %1194 = vperm.xlu1 %2424, %v1191_v35  }
 0x4f6   : > { %v1441_v7 = vpop.permute.xlu0 %1440 }
 0x4f7   : > { %v1443_v18 = vmul.f32 %v3231_v56, %v1441_v7 }
 0x4fa   : > { %v1200_v24 = vpop.permute.xlu0 %1199 }
 0x4fb   : > { %v1315_v46 = vpop.permute.xlu1 %1314  ;;  %v1202_v29 = vmul.f32 %v3237_v60, %v1200_v24 }
 0x4fc   : > { %v1317_v45 = vmul.f32 %v3239_v34, %v1315_v46 }
 0x4fe   : > { %1320 = vperm.xlu1 %2424, %v1317_v45   ;;  %v1452_v13 = vpop.permute.xlu0 %1451 }
 0x4ff   : > { %v1567_v25 = vpop.permute.xlu1 %1566  ;;  %v1454_v63 = vmul.f32 %v3246_v27, %v1452_v13 }
 0x500   : > { %v1569_v5 = vmul.f32 %v3248_v50, %v1567_v25 }
 0x502   : > { %1572 = vperm.xlu0 %2425, %v1569_v5   ;;  %1446 = vperm.xlu1 %2424, %v1443_v18   ;;  %v1211_v51 = vpop.permute.xlu0 %1210 }
 0x503   : > { %v1326_v2 = vpop.permute.xlu1 %1325  ;;  %v1213_v30 = vmul.f32 %v3255_v28, %v1211_v51 }
 0x504   : > { %v1328_v22 = vmul.f32 %v3257_v54, %v1326_v2 }
 0x506   : > { %2426 = vset.pattern.permute.xlu0 %v2660_v59  ;;  %2427 = vset.pattern.permute.xlu1 %v2660_v59  ;;  %v1463_v56 = vpop.permute.xlu0 %1462  ;;  %v946_v59 = vmul.f32 %v3349_v17, %v2820_v8 }
 0x507   : > { %v1578_v55 = vpop.permute.xlu1 %1577  ;;  %1331 = vperm.xlu1 %2427, %v1328_v22   ;;  %1205 = vperm.xlu0 %2426, %v1202_v29   ;;  %v1465_v54 = vmul.f32 %v3263_v9, %v1463_v56 }
 0x508   : > { %v1580_v34 = vmul.f32 %v3265_v41, %v1578_v55 }
 0x50b   : > { %1583 = vperm.xlu0 %2426, %v1580_v34   ;;  %1457 = vperm.xlu1 %2427, %v1454_v63   ;;  %v1337_v50 = vpop.permute.xlu1 %1336 }
 0x50c   : > { %v1339_v60 = vmul.f32 %v3271_v20, %v1337_v50 }
 0x50f   : > { %2429 = vset.pattern.permute.xlu0 %v2661_v37  ;;  %2428 = vset.pattern.permute.xlu1 %v2661_v37  ;;  %v1589_v39 = vpop.permute.xlu1 %1588 }
 0x510   : > { %1216 = vperm.xlu1 %2428, %v1213_v30   ;;  %1468 = vperm.xlu0 %2429, %v1465_v54   ;;  %v1591_v41 = vmul.f32 %v3275_v31, %v1589_v39  ;;  %v2454_v30 = vld [vmem:[%s3577_s4] sm:$0xff]  }
 0x511   : > { %2305 = vmatprep.subr.bf16.mxu0 %v2454_v30 }
 0x512   : > { %2306 = vmatpush3.bf16.msra.mxu0 %v2454_v30 }
 0x514   : > { %1342 = vperm.xlu1 %2428, %v1339_v60  }
 0x518   : > { %1594 = vperm.xlu1 %2428, %v1591_v41  }
 0x52b   : > { %v841_v27 = vpop.permute.xlu0 %840 }
 0x52c   : > { %v727_v4 = vpop.permute.xlu1 %726  ;;  %v843_v20 = vmul.f32 %v841_v27, %v2823_v11 }
 0x52d   : > { %v729_v31 = vmul.f32 %v727_v4, %v2823_v11 }
 0x52e   : > { %v844_v32 = vadd.f32 %v843_v20, %v832_v62 }
 0x52f   : > { %v730_v58 = vadd.f32 %v729_v31, %v718_v14 }
 0x530   : > { %v1310_v0 = vpop.permute.xlu0 %1309 }
 0x531   : > { %v1184_v23 = vpop.permute.xlu1 %1183  ;;  %v1312_v60 = vmul.f32 %v1310_v0, %v2820_v8 }
 0x532   : > { %v1186_v27 = vmul.f32 %v1184_v23, %v2820_v8 }
 0x535   : > { %v955_v33 = vpop.permute.xlu0 %954 }
 0x536   : > { %v1069_v53 = vpop.permute.xlu1 %1068  ;;  %v957_v38 = vmul.f32 %v955_v33, %v2823_v11 }
 0x537   : > { %v1071_v1 = vmul.f32 %v1069_v53, %v2823_v11 }
 0x538   : > { %v958_v61 = vadd.f32 %v957_v38, %v946_v59 }
 0x539   : > { %v1072_v17 = vadd.f32 %v1071_v1, %v1060_v36 }
 0x53a   : > { %v3367_v9 = vpop.permute.xlu0 %1435 }
 0x53b   : > { %v3365_v28 = vpop.permute.xlu1 %1561  ;;  %v1438_v23 = vmul.f32 %v3367_v9, %v2820_v8 }
 0x53c   : > { %v1564_v20 = vmul.f32 %v3365_v28, %v2820_v8 }
 0x53f   : > { %v1080_v19 = vpop.permute.xlu0 %1079 }
 0x540   : > { %v738_v57 = vpop.permute.xlu1 %737  ;;  %v1082_v44 = vmul.f32 %v1080_v19, %v2818_v6 }
 0x541   : > { %v740_v21 = vmul.f32 %v738_v57, %v2818_v6  ;;  %v2455_v57 = vld [vmem:[%s3577_s4 + $0x8] sm:$0xff]  }
 0x542   : > { %v1083_v45 = vadd.f32 %v1082_v44, %v1072_v17  ;;  %2307 = vmatprep.subr.bf16.mxu0 %v2455_v57 }
 0x543   : > { %v741_v40 = vadd.f32 %v740_v21, %v730_v58  ;;  %2308 = vmatpush3.bf16.msra.mxu0 %v2455_v57 }
 0x544   : > { %v852_v43 = vpop.permute.xlu1 %851  ;;  %v863_v10 = vpop.permute.xlu0 %862 }
 0x545   : > { %v854_v49 = vmul.f32 %v852_v43, %v2818_v6  ;;  %v865_v15 = vmul.f32 %v863_v10, %v2826_v12 }
 0x547   : > { %v855_v48 = vadd.f32 %v854_v49, %v844_v32 }
 0x548   : > { %v966_v47 = vpop.permute.xlu1 %965  ;;  %v977_v26 = vpop.permute.xlu0 %976 }
 0x549   : > { %v968_v37 = vmul.f32 %v966_v47, %v2818_v6  ;;  %v866_v3 = vadd.f32 %v865_v15, %v855_v48  ;;  %v979_v7 = vmul.f32 %v977_v26, %v2826_v12 }
 0x54b   : > { %v969_v35 = vadd.f32 %v968_v37, %v958_v61 }
 0x54d   : > { %v749_v42 = vpop.permute.xlu1 %748  ;;  %v980_v52 = vadd.f32 %v979_v7, %v969_v35 }
 0x54e   : > { %v751_v16 = vmul.f32 %v749_v42, %v2826_v12 }
 0x550   : > { %v752_v24 = vadd.f32 %v751_v16, %v741_v40 }
 0x551   : > { %v1091_v46 = vpop.permute.xlu1 %1090 }
 0x552   : > { %v2430_v13 = vpack.i.bf16 %v866_v3, %v752_v24  ;;  %v1093_v25 = vmul.f32 %v1091_v46, %v2826_v12 }
 0x554   : > { %v1094_v18 = vadd.f32 %v1093_v25, %v1083_v45  ;;  %2431 = vrot.lane.b32.xlu0 %v2430_v13, %s3592_s22 }
 0x556   : > { %v2435_v5 = vpack.i.bf16 %v1094_v18, %v980_v52  ;;  %v2237_v18 = vld [vmem:[%s3578_s5] ss:$0 sm:$0xff] }
 0x558   : > { %2436 = vrot.lane.b32.xlu0 %v2435_v5, %s3592_s22  ;;  %v2568_v5 = vld [vmem:[%s2809_s26] sm:$0xff]  }
 0x574   : > { %v1195_v2 = vpop.permute.xlu1 %1194 }
 0x575   : > { %v1197_v54 = vmul.f32 %v1195_v2, %v2823_v11  ;;  %v528_v2 = vunpack.c.l.bf16 %v2568_v5 }
 0x577   : > { %v1198_v19 = vadd.f32 %v1197_v54, %v1186_v27 }
 0x57d   : > { %v1321_v22 = vpop.permute.xlu1 %1320 }
 0x57e   : > { %v1323_v56 = vmul.f32 %v1321_v22, %v2823_v11 }
 0x580   : > { %v1324_v33 = vadd.f32 %v1323_v56, %v1312_v60 }
 0x581   : > { %v1447_v29 = vpop.permute.xlu1 %1446  ;;  %v1573_v51 = vpop.permute.xlu0 %1572 }
 0x582   : > { %v1449_v53 = vmul.f32 %v1447_v29, %v2823_v11  ;;  %v1575_v43 = vmul.f32 %v1573_v51, %v2823_v11  ;;  %v529_v51 = vunpack.c.h.bf16 %v2568_v5 }
 0x584   : > { %v1450_v11 = vadd.f32 %v1449_v53, %v1438_v23  ;;  %v1576_v38 = vadd.f32 %v1575_v43, %v1564_v20 }
 0x586   : > { %v1332_v55 = vpop.permute.xlu1 %1331  ;;  %v1206_v34 = vpop.permute.xlu0 %1205 }
 0x587   : > { %v1334_v39 = vmul.f32 %v1332_v55, %v2818_v6  ;;  %v1208_v4 = vmul.f32 %v1206_v34, %v2818_v6  ;;  %v2569_v55 = vld [vmem:[%s2809_s26 + $0x8] sm:$0xff]   ;;  %s3517_s26 = scalar_lea.hbm %s3587_s14, %s2274_s28  ;;  %s2663_s28 = smov [#allocation2]  }
 0x588   : > { %v530_v34 = vunpack.c.l.bf16 %v2569_v55  ;;  %s2574_s17 = sshll.u32 %s2663_s28, 4  ;;  %s2575_s17 = int_to_ptr.vmem [resolvable:$false] %s2574_s17 }
 0x589   : > { %v1335_v10 = vadd.f32 %v1334_v39, %v1324_v33  ;;  %v1209_v49 = vadd.f32 %v1208_v4, %v1198_v19  ;;  %v531_v39 = vunpack.c.h.bf16 %v2569_v55  ;;  %s2576_s19 = scalar_lea.vmem %s2575_s17, 512  ;;  %p2577_p1 = scmp.lt.s32.totalorder %s3520_s24, %s2575_s17 }
 0x58a   : > { %v1458_v63 = vpop.permute.xlu1 %1457  ;;  %v1584_v50 = vpop.permute.xlu0 %1583  ;;  %p2578_p2 = scmp.lt.s32.totalorder %s2576_s19, %s2570_s20 }
 0x58b   : > { %v1460_v47 = vmul.f32 %v1458_v63, %v2818_v6  ;;  %v1586_v14 = vmul.f32 %v1584_v50, %v2818_v6 }
 0x58c   : > { %p2579_p3 = por %p2578_p2, %p2577_p1 }
 0x58d   : > { %v1461_v8 = vadd.f32 %v1460_v47, %v1450_v11  ;;  %v1587_v9 = vadd.f32 %v1586_v14, %v1576_v38 }
 0x58e   : > { %p2580_p5 = pnand %p2579_p3, %p2573_p0 }
 0x58f   : > { %v1217_v41 = vpop.permute.xlu1 %1216  ;;  %v1469_v62 = vpop.permute.xlu0 %1468 }
 0x590   : > { %v1219_v0 = vmul.f32 %v1217_v41, %v2826_v12  ;;  %v1471_v28 = vmul.f32 %v1469_v62, %v2826_v12 }
 0x592   : > { %v1220_v21 = vadd.f32 %v1219_v0, %v1209_v49  ;;  %v1472_v15 = vadd.f32 %v1471_v28, %v1461_v8 }
 0x593   : > { %v1343_v31 = vpop.permute.xlu1 %1342 }
 0x594   : > { %v1345_v32 = vmul.f32 %v1343_v31, %v2826_v12 }
 0x596   : > { %v1346_v59 = vadd.f32 %v1345_v32, %v1335_v10 }
 0x597   : > { %v1595_v1 = vpop.permute.xlu1 %1594 }
 0x598   : > { %v2440_v58 = vpack.i.bf16 %v1346_v59, %v1220_v21  ;;  %v1597_v48 = vmul.f32 %v1595_v1, %v2826_v12 }
 0x59a   : > { %v1598_v37 = vadd.f32 %v1597_v48, %v1587_v9  ;;  %2441 = vrot.lane.b32.xlu1 %v2440_v58, %s3592_s22 }
 0x59c   : > { %v2445_v6 = vpack.i.bf16 %v1598_v37, %v1472_v15  ;;  %v2456_v15 = vld [vmem:[%s3581_s8] sm:$0xff]   ;;  %v2457_v37 = vld [vmem:[%s3581_s8 + $0x8] sm:$0xff]  }
 0x59d   : > { %2313 = vmatprep.subr.bf16.mxu0 %v2456_v15 }
 0x59e   : > { %2446 = vrot.lane.b32.xlu1 %v2445_v6, %s3592_s22 }
 0x5c6   : > { %v2432_v36 = vpop.permute.xlu0 %2431 }
 0x5c7   : > { %v2434_v42 = vunpack.i.h.bf16 %v2432_v36  ;;  %v2433_v61 = vunpack.i.l.bf16 %v2432_v36 }
 0x5ca   : > { %v2437_v16 = vpop.permute.xlu0 %2436 }
 0x5cb   : > { %v2439_v7 = vunpack.i.h.bf16 %v2437_v16  ;;  %v2438_v24 = vunpack.i.l.bf16 %v2437_v16 }
 0x60c   : > { %v2442_v26 = vpop.permute.xlu1 %2441 }
 0x60d   : > { %v2444_v40 = vunpack.i.h.bf16 %v2442_v26  ;;  %v2443_v44 = vunpack.i.l.bf16 %v2442_v26 }
 0x60f   : > { %v1631_v17 = vsel %vm627_vm1, %v2433_v61, %v2443_v44  ;;  %v1632_v3 = vsel %vm627_vm1, %v2434_v42, %v2444_v40 }
 0x610   : > { %v1635_v12 = vpack.c.bf16 %v1632_v3, %v1631_v17  ;;  %v2447_v35 = vpop.permute.xlu1 %2446 }
 0x611   : > { %v2449_v46 = vunpack.i.h.bf16 %v2447_v35  ;;  %v2448_v45 = vunpack.i.l.bf16 %v2447_v35 }
 0x612   : > { %2309 = vmatprep.mubr.msk.bf16.mxu0 %vm566_vm0, %v1635_v12 }
 0x613   : > { %v1633_v13 = vsel %vm627_vm1, %v2438_v24, %v2448_v45  ;;  %v1634_v25 = vsel %vm627_vm1, %v2439_v7, %v2449_v46  ;;  %v2242_v24 = vld [vmem:[%s3579_s6] ss:$0 sm:$0xff] }
 0x614   : > { %v1636_v52 = vpack.c.bf16 %v1634_v25, %v1633_v13 }
 0x616   : > { %2310 = vmatmul.mubr.msk.bf16.vlgmr.msra.gmra.mrb[4].mxu0 %vm566_vm0, %v1636_v52 }
 0x617   : > { %2314 = vmatpush3.bf16.msra.mxu0 %v2456_v15 }
 0x618   : > { %2315 = vmatprep.subr.bf16.mxu0 %v2457_v37 }
 0x61b   : > { %2316 = vmatpush3.bf16.msra.mxu0 %v2457_v37 }
 0x6e9   : > { %v2311_v22 = vpop.f32.mrb[4].mxu0 }
 0x6ea   : > { %v1700_v29 = vpop.f32.mrb[5].mxu0  ;;  %v1709_v63 = vadd.f32 %v2311_v22, %v2237_v18 }
 0x6eb   : > { %v1701_v56 = vadd.f32 %v2237_v18, %v1700_v29  ;;  %v2312_v50 = vpop.f32.mrb[6].mxu0 }
 0x6ec   : > { %v1703_v30 = vpop.f32.mrb[7].mxu0  ;;  %v1717_v41 = vadd.f32 %v1709_v63, %v530_v34  ;;  %v1712_v27 = vadd.f32 %v2312_v50, %v2237_v18 }
 0x6ed   : > { %v1715_v54 = vadd.f32 %v1701_v56, %v528_v2  ;;  %v1704_v60 = vadd.f32 %v2237_v18, %v1703_v30  ;;  %v2243_v18 = vld [vmem:[%s3580_s7] ss:$0 sm:$0xff] }
 0x6ee   : > { %v1718_v57 = vadd.f32 %v1712_v27, %v531_v39  ;;  %v1727_v19 = vsel %vm566_vm0, %v1717_v41, 0.0  ;;  %v2459_v39 = vld [vmem:[%s3583_s10 + $0x8] sm:$0xff]   ;;  %v2461_v27 = vld [vmem:[%s3583_s10 + $0x18] sm:$0xff]  }
 0x6ef   : > { %v1716_v4 = vadd.f32 %v1704_v60, %v529_v51  ;;  %v1721_v33 = vsel %vm566_vm0, %v1715_v54, 0.0  ;;  %v2458_v60 = vld [vmem:[%s3583_s10] sm:$0xff]  }
 0x6f0   : > { %1722 = vadd.xlane.f32.xlu0 %v1721_v33  ;;  %v1730_v43 = vsel %vm566_vm0, %v1718_v57, 0.0  ;;  %2321 = vmatprep.subr.bf16.mxu1 %v2458_v60  ;;  %v2463_v33 = vld [vmem:[%s3583_s10 + $0x28] sm:$0xff]  }
 0x6f1   : > { %v1724_v53 = vsel %vm566_vm0, %v1716_v4, 0.0  ;;  %2322 = vmatpush3.bf16.msra.mxu1 %v2458_v60 }
 0x6f2   : > { %1725 = vadd.xlane.f32.xlu1 %v1724_v53  ;;  %2323 = vmatprep.subr.bf16.mxu1 %v2459_v39  ;;  %v2464_v53 = vld [vmem:[%s3583_s10 + $0x30] sm:$0xff]  }
 0x6f4   : > { %1728 = vadd.xlane.f32.xlu0 %v1727_v19 }
 0x6f5   : > { %2324 = vmatpush3.bf16.msra.mxu1 %v2459_v39 }
 0x6f8   : > { %1731 = vadd.xlane.f32.xlu0 %v1730_v43  ;;  %v2244_v43 = vld [vmem:[%s3582_s9] ss:$0 sm:$0xff] }
 0x77d   : > { %v1723_v0 = vpop.xlane.xlu0 %1722 }
 0x77e   : > { %v1734_v20 = vmul.f32 0.03125, %v1723_v0 }
 0x77f   : > { %v1726_v23 = vpop.xlane.xlu1 %1725 }
 0x780   : > { %v1738_v10 = vsub.f32 %v1715_v54, %v1734_v20  ;;  %v1735_v62 = vmul.f32 0.03125, %v1726_v23 }
 0x781   : > { %v1729_v31 = vpop.xlane.xlu0 %1728 }
 0x782   : > { %v1739_v49 = vsub.f32 %v1716_v4, %v1735_v62  ;;  %v1736_v47 = vmul.f32 0.03125, %v1729_v31  ;;  %v1742_v14 = vmul.f32 %v1738_v10, %v1738_v10  ;;  %v2462_v4 = vld [vmem:[%s3583_s10 + $0x20] sm:$0xff]  }
 0x784   : > { %v1740_v32 = vsub.f32 %v1717_v41, %v1736_v47  ;;  %v1746_v11 = vsel %vm566_vm0, %v1742_v14, 0.0  ;;  %v1743_v38 = vmul.f32 %v1739_v49, %v1739_v49  ;;  %v2460_v41 = vld [vmem:[%s3583_s10 + $0x10] sm:$0xff]  }
 0x785   : > { %1747 = vadd.xlane.f32.xlu1 %v1746_v11  ;;  %v1732_v21 = vpop.xlane.xlu0 %1731  ;;  %2325 = vmatprep.subr.bf16.mxu1 %v2460_v41 }
 0x786   : > { %v1737_v28 = vmul.f32 0.03125, %v1732_v21  ;;  %v1749_v59 = vsel %vm566_vm0, %v1743_v38, 0.0  ;;  %v1744_v1 = vmul.f32 %v1740_v32, %v1740_v32  ;;  %2326 = vmatpush3.bf16.msra.mxu1 %v2460_v41 }
 0x787   : > { %1750 = vadd.xlane.f32.xlu0 %v1749_v59  ;;  %2327 = vmatprep.subr.bf16.mxu1 %v2461_v27 }
 0x788   : > { %v1741_v8 = vsub.f32 %v1718_v57, %v1737_v28  ;;  %v1752_v9 = vsel %vm566_vm0, %v1744_v1, 0.0  ;;  %v2465_v57 = vld [vmem:[%s3583_s10 + $0x38] sm:$0xff]  }
 0x789   : > { %1753 = vadd.xlane.f32.xlu1 %v1752_v9 }
 0x78a   : > { %v1745_v58 = vmul.f32 %v1741_v8, %v1741_v8  ;;  %2328 = vmatpush3.bf16.msra.mxu1 %v2461_v27 }
 0x78b   : > { %2329 = vmatprep.subr.bf16.mxu1 %v2462_v4 }
 0x78c   : > { %v1755_v48 = vsel %vm566_vm0, %v1745_v58, 0.0 }
 0x78d   : > { %1756 = vadd.xlane.f32.xlu0 %v1755_v48 }
 0x78e   : > { %2330 = vmatpush3.bf16.msra.mxu1 %v2462_v4 }
 0x78f   : > { %2331 = vmatprep.subr.bf16.mxu1 %v2463_v33 }
 0x792   : > { %2332 = vmatpush3.bf16.msra.mxu1 %v2463_v33 }
 0x793   : > { %2333 = vmatprep.subr.bf16.mxu1 %v2464_v53 }
 0x796   : > { %2334 = vmatpush3.bf16.msra.mxu1 %v2464_v53 }
 0x797   : > { %2335 = vmatprep.subr.bf16.mxu1 %v2465_v57 }
 0x79a   : > { %2336 = vmatpush3.bf16.msra.mxu1 %v2465_v57 }
 0x812   : > { %v1748_v6 = vpop.xlane.xlu1 %1747 }
 0x813   : > { %v1758_v36 = vmul.f32 0.03125, %v1748_v6 }
 0x814   : > { %v1751_v26 = vpop.xlane.xlu0 %1750 }
 0x815   : > { %v1762_v42 = vadd.f32 1e-12, %v1758_v36  ;;  %v1759_v61 = vmul.f32 0.03125, %v1751_v26 }
 0x816   : > { %v1754_v40 = vpop.xlane.xlu1 %1753 }
 0x817   : > { %2548 = vrsqrt.f32 %v1762_v42  ;;  %v1763_v44 = vadd.f32 1e-12, %v1759_v61  ;;  %v1760_v16 = vmul.f32 0.03125, %v1754_v40  ;;  %v2249_v40 = vld [vmem:[%s3584_s11] ss:$0 sm:$0xff] }
 0x819   : > { %2550 = vrsqrt.f32 %v1763_v44  ;;  %v1764_v17 = vadd.f32 1e-12, %v1760_v16 }
 0x81a   : > { %v1757_v3 = vpop.xlane.xlu0 %1756 }
 0x81b   : > { %2552 = vrsqrt.f32 %v1764_v17  ;;  %v1761_v12 = vmul.f32 0.03125, %v1757_v3 }
 0x81d   : > { %v1765_v35 = vadd.f32 1e-12, %v1761_v12 }
 0x81f   : > { %2554 = vrsqrt.f32 %v1765_v35 }
 0x821   : > { %v2549_v7 = vpop.eup %2548 }
 0x822   : > { %v1770_v46 = vmul.f32 %v2549_v7, %v1738_v10 }
 0x823   : > { %v2551_v45 = vpop.eup %2550 }
 0x824   : > { %v1771_v13 = vmul.f32 %v2551_v45, %v1739_v49  ;;  %v1780_v25 = vmul.f32 %v2242_v24, %v1770_v46 }
 0x825   : > { %v2553_v52 = vpop.eup %2552 }
 0x826   : > { %v1772_v5 = vmul.f32 %v2553_v52, %v1740_v32  ;;  %v1781_v2 = vmul.f32 %v2242_v24, %v1771_v13  ;;  %v3446_v22 = vadd.f32 %v2243_v18, %v1780_v25 }
 0x828   : > { %v3448_v29 = vadd.f32 %v2243_v18, %v1781_v2  ;;  %v1782_v55 = vmul.f32 %v2242_v24, %v1772_v5 }
 0x829   : > { %v2555_v51 = vpop.eup %2554 }
 0x82a   : > { %v1773_v34 = vmul.f32 %v2555_v51, %v1741_v8  ;;  %v1794_v63 = vpack.c.bf16 %v3448_v29, %v3446_v22  ;;  %v3453_v50 = vadd.f32 %v2243_v18, %v1782_v55 }
 0x82c   : > { %v1783_v56 = vmul.f32 %v2242_v24, %v1773_v34  ;;  %2317 = vmatprep.mubr.msk.bf16.mxu0 %vm566_vm0, %v1794_v63 }
 0x82e   : > { %v3455_v30 = vadd.f32 %v2243_v18, %v1783_v56 }
 0x830   : > { %v1795_v54 = vpack.c.bf16 %v3455_v30, %v3453_v50 }
 0x832   : > { %2318 = vmatmul.mubr.msk.bf16.vlgmr.msra.gmra.mrb[8].mxu0 %vm566_vm0, %v1795_v54 }
 0x905   : > { %v2319_v19 = vpop.f32.mrb[8].mxu0 }
 0x906   : > { %v1859_v0 = vpop.f32.mrb[9].mxu0  ;;  %v1868_v23 = vadd.f32 %v2319_v19, %v2244_v43 }
 0x907   : > { %v2320_v20 = vpop.f32.mrb[10].mxu0  ;;  %v1860_v31 = vadd.f32 %v2244_v43, %v1859_v0 }
 0x908   : > { %v1871_v10 = vadd.f32 %v2320_v20, %v2244_v43  ;;  %v1862_v62 = vpop.f32.mrb[11].mxu0 }
 0x909   : > { %v1863_v49 = vadd.f32 %v2244_v43, %v1862_v62 }
 0x90a   : > { %v1875_v47 = vpack.c.bf16 %v1871_v10, %v1868_v23 }
 0x90b   : > { %v1874_v14 = vpack.c.bf16 %v1863_v49, %v1860_v31 }
 0x90c   : > { %v1879_v32 = vmul.bf16 1027030327, %v1875_v47  ;;  %v1877_v26 = vmul.bf16 1056980736, %v1875_v47 }
 0x90d   : > { %v1878_v11 = vmul.bf16 1027030327, %v1874_v14  ;;  %v1876_v6 = vmul.bf16 1056980736, %v1874_v14 }
 0x90e   : > { %v1881_v38 = vmul.bf16 %v1879_v32, %v1875_v47 }
 0x90f   : > { %v1880_v21 = vmul.bf16 %v1878_v11, %v1874_v14 }
 0x910   : > { %v1883_v28 = vmul.bf16 %v1881_v38, %v1875_v47 }
 0x911   : > { %v1882_v59 = vmul.bf16 %v1880_v21, %v1874_v14 }
 0x912   : > { %v1885_v1 = vadd.bf16 %v1883_v28, %v1875_v47  ;;  %v2258_v28 = vld [vmem:[%s3585_s12] ss:$0 sm:$0xff] }
 0x913   : > { %v1884_v8 = vadd.bf16 %v1882_v59, %v1874_v14 }
 0x914   : > { %v1887_v9 = vmul.bf16 1061961548, %v1885_v1 }
 0x915   : > { %v1886_v58 = vmul.bf16 1061961548, %v1884_v8  ;;  %v2259_v8 = vld [vmem:[%s3586_s13] ss:$0 sm:$0xff] }
 0x916   : > { %2556 = vtanh.bf16 %v1887_v9 }
 0x917   : > { %2558 = vtanh.bf16 %v1886_v58 }
 0x921   : > { %v2557_v48 = vpop.eup %2556 }
 0x922   : > { %v2559_v15 = vpop.eup %2558  ;;  %v1891_v37 = vadd.bf16 1065369472, %v2557_v48 }
 0x923   : > { %v1890_v36 = vadd.bf16 1065369472, %v2559_v15 }
 0x924   : > { %v1893_v61 = vmul.bf16 %v1891_v37, %v1877_v26 }
 0x925   : > { %v1892_v42 = vmul.bf16 %v1890_v36, %v1876_v6 }
 0x927   : > { %2337 = vmatprep.mubr.bf16.mxu1 %v1892_v42 }
 0x928   : > { %2338 = vmatmul.mubr.bf16.vlgmr.msra.gmra.mrb[0].mxu1 %v1893_v61 }
 0x9fb   : > { %v2339_v44 = vpop.f32.mrb[0].mxu1 }
 0x9fc   : > { %v1999_v16 = vpop.f32.mrb[1].mxu1  ;;  %v2008_v17 = vadd.f32 %v2339_v44, %v2249_v40 }
 0x9fd   : > { %v2000_v3 = vadd.f32 %v2249_v40, %v1999_v16  ;;  %v2340_v12 = vpop.f32.mrb[2].mxu1 }
 0x9fe   : > { %v2002_v35 = vpop.f32.mrb[3].mxu1  ;;  %v2011_v24 = vadd.f32 %v2340_v12, %v2249_v40  ;;  %v2016_v45 = vadd.f32 %v2008_v17, %v3453_v50 }
 0x9ff   : > { %v2014_v7 = vadd.f32 %v2000_v3, %v3446_v22  ;;  %v2003_v46 = vadd.f32 %v2249_v40, %v2002_v35 }
 0xa00   : > { %v2017_v52 = vadd.f32 %v2011_v24, %v3455_v30  ;;  %v2026_v5 = vsel %vm566_vm0, %v2016_v45, 0.0 }
 0xa01   : > { %v2015_v13 = vadd.f32 %v2003_v46, %v3448_v29  ;;  %v2020_v25 = vsel %vm566_vm0, %v2014_v7, 0.0 }
 0xa02   : > { %2021 = vadd.xlane.f32.xlu1 %v2020_v25  ;;  %v2029_v2 = vsel %vm566_vm0, %v2017_v52, 0.0 }
 0xa03   : > { %v2023_v18 = vsel %vm566_vm0, %v2015_v13, 0.0 }
 0xa04   : > { %2024 = vadd.xlane.f32.xlu0 %v2023_v18 }
 0xa06   : > { %2027 = vadd.xlane.f32.xlu1 %v2026_v5 }
 0xa08   : > { %2030 = vadd.xlane.f32.xlu0 %v2029_v2 }
 0xa8f   : > { %v2022_v22 = vpop.xlane.xlu1 %2021 }
 0xa90   : > { %v2032_v51 = vmul.f32 0.03125, %v2022_v22 }
 0xa91   : > { %v2025_v55 = vpop.xlane.xlu0 %2024 }
 0xa92   : > { %v2036_v34 = vsub.f32 %v2014_v7, %v2032_v51  ;;  %v2033_v63 = vmul.f32 0.03125, %v2025_v55 }
 0xa93   : > { %v2028_v29 = vpop.xlane.xlu1 %2027 }
 0xa94   : > { %v2037_v56 = vsub.f32 %v2015_v13, %v2033_v63  ;;  %v2034_v50 = vmul.f32 0.03125, %v2028_v29  ;;  %v2040_v54 = vmul.f32 %v2036_v34, %v2036_v34 }
 0xa95   : > { %v2031_v60 = vpop.xlane.xlu0 %2030 }
 0xa96   : > { %v2038_v30 = vsub.f32 %v2016_v45, %v2034_v50  ;;  %v2035_v39 = vmul.f32 0.03125, %v2031_v60  ;;  %v2044_v41 = vsel %vm566_vm0, %v2040_v54, 0.0  ;;  %v2041_v27 = vmul.f32 %v2037_v56, %v2037_v56 }
 0xa97   : > { %2045 = vadd.xlane.f32.xlu1 %v2044_v41 }
 0xa98   : > { %v2039_v4 = vsub.f32 %v2017_v52, %v2035_v39  ;;  %v2047_v33 = vsel %vm566_vm0, %v2041_v27, 0.0  ;;  %v2042_v53 = vmul.f32 %v2038_v30, %v2038_v30 }
 0xa99   : > { %2048 = vadd.xlane.f32.xlu0 %v2047_v33 }
 0xa9a   : > { %v2050_v57 = vsel %vm566_vm0, %v2042_v53, 0.0  ;;  %v2043_v19 = vmul.f32 %v2039_v4, %v2039_v4 }
 0xa9b   : > { %2051 = vadd.xlane.f32.xlu1 %v2050_v57 }
 0xa9c   : > { %v2053_v43 = vsel %vm566_vm0, %v2043_v19, 0.0 }
 0xa9d   : > { %2054 = vadd.xlane.f32.xlu0 %v2053_v43 }
 0xb24   : > { %v2046_v0 = vpop.xlane.xlu1 %2045 }
 0xb25   : > { %v2056_v20 = vmul.f32 0.03125, %v2046_v0 }
 0xb26   : > { %v2049_v23 = vpop.xlane.xlu0 %2048 }
 0xb27   : > { %v2060_v10 = vadd.f32 1e-12, %v2056_v20  ;;  %v2057_v62 = vmul.f32 0.03125, %v2049_v23 }
 0xb28   : > { %v2052_v31 = vpop.xlane.xlu1 %2051 }
 0xb29   : > { %2560 = vrsqrt.f32 %v2060_v10  ;;  %v2061_v49 = vadd.f32 1e-12, %v2057_v62  ;;  %v2058_v47 = vmul.f32 0.03125, %v2052_v31 }
 0xb2a   : > { %v2055_v14 = vpop.xlane.xlu0 %2054 }
 0xb2b   : > { %2562 = vrsqrt.f32 %v2061_v49  ;;  %v2062_v32 = vadd.f32 1e-12, %v2058_v47  ;;  %v2059_v11 = vmul.f32 0.03125, %v2055_v14 }
 0xb2d   : > { %2564 = vrsqrt.f32 %v2062_v32  ;;  %v2063_v38 = vadd.f32 1e-12, %v2059_v11 }
 0xb2f   : > { %2566 = vrsqrt.f32 %v2063_v38 }
 0xb33   : > { %v2561_v21 = vpop.eup %2560 }
 0xb34   : > { %v2068_v59 = vmul.f32 %v2561_v21, %v2036_v34 }
 0xb35   : > { %v2563_v1 = vpop.eup %2562 }
 0xb36   : > { %v2078_v9 = vmul.f32 %v2258_v28, %v2068_v59  ;;  %v2069_v58 = vmul.f32 %v2563_v1, %v2037_v56 }
 0xb37   : > { %v2565_v48 = vpop.eup %2564 }
 0xb38   : > { %v2088_v15 = vadd.f32 %v2259_v8, %v2078_v9  ;;  %v2079_v37 = vmul.f32 %v2258_v28, %v2069_v58  ;;  %v2070_v6 = vmul.f32 %v2565_v48, %v2038_v30 }
 0xb39   : > { %v2567_v36 = vpop.eup %2566 }
 0xb3a   : > { %v2270_v26 = vpack.c.bf16 %v2088_v15, %v2088_v15  ;;  %v2089_v42 = vadd.f32 %v2259_v8, %v2079_v37  ;;  %v2080_v61 = vmul.f32 %v2258_v28, %v2070_v6  ;;  %v2071_v40 = vmul.f32 %v2567_v36, %v2039_v4 }
 0xb3c   : > { %v2271_v44 = vpack.c.bf16 %v2089_v42, %v2089_v42  ;;  %v2090_v16 = vadd.f32 %v2259_v8, %v2080_v61  ;;  %v2081_v17 = vmul.f32 %v2258_v28, %v2071_v40  ;;  %2109 = vst.msk [vmem:[%s503_s27] sm:$0xf] %vm2108_vm2, %v2270_v26 }
 0xb3e   : > { %v2272_v3 = vpack.c.bf16 %v2090_v16, %v2090_v16  ;;  %v2091_v12 = vadd.f32 %v2259_v8, %v2081_v17  ;;  %2110 = vst.msk [vmem:[%s503_s27 + $0x4] sm:$0xf] %vm2108_vm2, %v2271_v44 }
 0xb40   : > { %v2273_v35 = vpack.c.bf16 %v2091_v12, %v2091_v12  ;;  %2111 = vst.msk [vmem:[%s503_s27 + $0x8] sm:$0xf] %vm2108_vm2, %v2272_v3 }
 0xb42   : > { %2112 = vst.msk [vmem:[%s503_s27 + $0xc] sm:$0xf] %vm2108_vm2, %v2273_v35 }
 0xb43   : > { %2583 = shalt.err (!%p2580_p5)
}
 0xb44   : > { %s2584_s21 = scalar_lea.hbm %s3517_s26, 256  ;;  %s2588_s28 = scalar_lea.hbm %s3587_s14, 512 }
 0xb45   : > { %p2585_p6 = scmp.ne.s32.totalorder %s3517_s26, %s2584_s21  ;;  %p2589_p10 = scmp.lt.u32.totalorder %s3517_s26, %s3587_s14 }
 0xb46   : > { %p2590_p11 = scmp.lt.u32.totalorder %s2588_s28, %s2584_s21  ;;  %p2592_p13 = scmp.lt.u32.totalorder %s2584_s21, %s3517_s26 }
 0xb47   : > { %p2586_p7 = pnand %p2585_p6, %p2780_p4 }
 0xb48   : > { %p2591_p12 = por %p2590_p11, %p2589_p10 }
 0xb49   : > { %p2587_p9 = pneg %p2586_p7 }
 0xb4a   : > { %p2593_p0 = por %p2592_p13, %p2591_p12 }
 0xb4c   : > { %p2594_p1 = pnand %p2593_p0, %p2587_p9 }
 0xb4e   : > { %2597 = shalt.err (!%p2594_p1)
}
 0xb4f   : > { %s2664_s20 = smov 4   ;;  %s3604_s19 = smov 64  }
 0xb50   : > { %2341 = dma.vmem_to_hbm [thread:$0]  (%p2780_p4), %s3520_s24, 256, %s3517_s26, %s3525_s16, %s3604_s19, %s3604_s19, %s2664_s20  }
 0xb51 PF: > { %p2347_p2 = scmp.ge.s32.totalorder %s2648_s18, 2  ;;  %s2143_s0 = sand.u32 1, %s2628_s29  }
 0xb52   : > { %s2144_s22 = scalar_lea.sflag [#allocation3], %s2143_s0 }
 0xb53   : > { %p2344_p3 = pnand %p2347_p2, %p2787_p8 }
 0xb55   : > { %2623 = dma.done.wait (!%p2344_p3), %s2144_s22, 256  }
 0xb56   : > { %2625 = vsyncadd (!%p2344_p3), %s2144_s22, 4294967040  ;;  %s27_s18 = sadd.s32 1, %s2648_s18   ;;  %s3605_s23 = sld [smem:[#allocation7_spill]] }
 0xb57   : > { %p24_p5 = scmp.ge.s32.totalorder %s27_s18, 4   ;;  %s3606_s16 = sld [smem:[#allocation5_spill]] }
 0xb58   : > { %s3607_s17 = sld [smem:[#allocation6_spill]]  ;;  %s3608_s29 = smov %s2632_s30 }
 0xb59   : > { %s3609_s30 = smov %s2636_s15  ;;  %26 = sbr.rel (!%p24_p5) target bundleno = 6 (0x6), region = 114 }
 0xb5c   : > { %s3610_s15 = smov %s3605_s23 }
 0xb60   :  { %2149 = vsyncpa [#allocation3], 1 }
 0xb61   :  { %2151 = vsyncpa [#allocation3 + $0x1], 1 }

</bundles_post_ra>
